<compile_context>
chip_gen: v7x
topology: tpu7x:2x2x1
jax: 0.10.0
libtpu: 0.0.40
codegen_flags: <defaults>
</compile_context>

<pallas_src>
import functools

import jax
import jax.numpy as jnp
from jax.experimental import pallas as pl
from jax.experimental.pallas import tpu as pltpu


def _conv_band(x_ref, top_ref, bot_ref, w_ref, xband_ref, *, Ht, W, Cin, Cout):
    """3x3 'same' conv of one Ht-row band; returns (Ht*W, Cout) in f32."""
    # Assemble band + 1-row top/bottom halos in VMEM (W already zero-padded).
    # Single cast pass; no im2col gather / col scratch anymore.
    xband_ref[0:1] = top_ref[0].astype(jnp.float32)
    xband_ref[1:Ht + 1] = x_ref[0].astype(jnp.float32)
    xband_ref[Ht + 1:Ht + 2] = bot_ref[0].astype(jnp.float32)

    # 9 shifted views feed 9 accumulated K=Cin MXU matmuls (f32 accumulate).
    acc = None
    for dy in range(3):
        for dx in range(3):
            tap = xband_ref[dy:dy + Ht, dx:dx + W, :].reshape(Ht * W, Cin)
            part = jnp.dot(tap, w_ref[dy * 3 + dx],
                           preferred_element_type=jnp.float32)
            acc = part if acc is None else acc + part
    return acc


def _stats_kernel(x_ref, top_ref, bot_ref, w_ref, stats_ref, xband_ref,
                  *, Ht, W, Cin, Cout):
    """Pass 1: conv of one band -> per-band per-channel (sum, centered M2)."""
    acc = _conv_band(x_ref, top_ref, bot_ref, w_ref, xband_ref,
                     Ht=Ht, W=W, Cin=Cin, Cout=Cout)
    s = jnp.sum(acc, axis=0, keepdims=True)                      # (1, Cout)
    d = acc - s * jnp.float32(1.0 / (Ht * W))                    # centered
    m2 = jnp.sum(d * d, axis=0, keepdims=True)                   # (1, Cout)
    stats_ref[...] = jnp.concatenate([s, m2], axis=0).reshape(1, 1, 2, Cout)


def _apply_kernel(x_ref, top_ref, bot_ref, w_ref, a_ref, b_ref, o_ref,
                  xband_ref, *, Ht, W, Cin, Cout):
    """Pass 2: recompute conv, apply folded BN affine + ReLU, emit flat NCHW."""
    acc = _conv_band(x_ref, top_ref, bot_ref, w_ref, xband_ref,
                     Ht=Ht, W=W, Cin=Cin, Cout=Cout)
    y = jnp.maximum(acc * a_ref[...] + b_ref[...], 0.0)          # (Ht*W, Cout)
    # One XLU transpose per band -> lane-dense (Cout, Ht*W) store; the wrapper
    # reshape back to (N, Cout, H, W) is free (no HBM transpose pass).
    o_ref[...] = y.T.reshape(1, Cout, Ht * W).astype(o_ref.dtype)


def _vmem_capacity_bytes():
    try:
        return int(pltpu.get_tpu_info().vmem_capacity_bytes)
    except Exception:
        return 64 * 1024 * 1024      # conservative (v7x-sized) fallback


def _band_footprint_bytes(ht, W, cin, cout):
    """Per-band VMEM footprint with (8,128)/(16,128) layout padding, including
    double-buffered pipeline blocks, value temporaries and weights."""
    def rup(x, m):
        return -(-x // m) * m
    wp = W + 2
    band = (ht + 2) * rup(wp, 8) * rup(cin, 128) * 4          # f32 band+halo scratch
    xin = 2 * ht * rup(wp, 16) * rup(cin, 128) * 2            # 2x-buffered bf16 input block
    halo = 4 * rup(wp, 16) * rup(cin, 128) * 2                # 2x-buffered top+bot halo rows
    outp = 2 * rup(cout, 8) * rup(ht * W, 128) * 4            # 2x-buffered f32 flat-NCHW out
    vals = (2 * rup(ht * W, 8) * rup(cout, 128)               # conv acc + BN/ReLU temporary
            + ht * rup(W, 8) * rup(cin, 128)) * 4             # one shifted tap value
    wgt = 2 * 9 * rup(cin, 8) * rup(cout, 128) * 4            # 2x-buffered f32 tap weights
    return band + xin + halo + outp + vals + wgt + (1 << 20)  # + slack


def _pick_band_rows(H, W, cin, cout, budget_bytes, need_split=False):
    """Largest valid divisor of H whose footprint fits the budget.  Valid:
    Ht == H, or Ht*W a multiple of 128 (lane-dense flat-NCHW output block)."""
    def ok(ht):
        return H % ht == 0 and (ht == H or (ht * W) % 128 == 0)
    cands = [ht for ht in range(H, 0, -1) if ok(ht)]
    if need_split:
        sub = [ht for ht in cands if ht < H]
        if sub:
            cands = sub
    for ht in cands:
        if _band_footprint_bytes(ht, W, cin, cout) <= budget_bytes:
            return ht
    return cands[-1]


def cbrblock_forward(x_nchw, w_oihw, gamma, beta, eps=1e-5, band_rows=None):
    """x: (N, Cin, H, W); w: (Cout, Cin, 3, 3); gamma/beta: (Cout,) -> (N, Cout, H, W) f32."""
    N, Cin, H, W = x_nchw.shape
    Cout = w_oihw.shape[0]
    Wp = W + 2

    # Per-chip VMEM sizing (v7x: 64 MiB, v5e/v6e: 128 MiB per TensorCore).
    vmem_cap = _vmem_capacity_bytes()
    budget = vmem_cap // 2
    vmem_limit = int(vmem_cap * 0.8)

    if (band_rows is not None and H % band_rows == 0
            and (band_rows == H or (band_rows * W) % 128 == 0)):
        Ht = band_rows
    else:
        # For N == 1 force >= 2 bands so both v7x TensorCores get work.
        Ht = _pick_band_rows(H, W, Cin, Cout, budget, need_split=(N == 1))
    n_ht = H // Ht

    # Layout pass: NCHW -> NHWC, bf16 cast, W-only zero pad (fused by XLA);
    # halves the dominant HBM read stream of both passes.
    # TODO(synk): if the surrounding model kept NHWC activations end-to-end,
    # this input transpose would disappear entirely.
    x_nhwc = jnp.transpose(x_nchw, (0, 2, 3, 1)).astype(jnp.bfloat16)
    x_in = jnp.pad(x_nhwc, ((0, 0), (0, 0), (1, 1), (0, 0)))       # (N, H, Wp, Cin)

    # 1-row halos above/below every band (zeros at the image border) -- tiny.
    zrow = jnp.zeros((N, 1, Wp, Cin), x_in.dtype)
    if n_ht > 1:
        tops = jnp.concatenate([zrow, x_in[:, Ht - 1:H - 1:Ht]], axis=1)
        bots = jnp.concatenate([x_in[:, Ht:H:Ht], zrow], axis=1)
    else:
        tops, bots = zrow, zrow                                    # (N, n_ht, Wp, Cin)

    # Per-tap conv weights: w_taps[dy*3+dx] is the (Cin, Cout) matrix of tap (dy, dx).
    w_taps = jnp.transpose(w_oihw, (2, 3, 1, 0)).reshape(9, Cin, Cout).astype(jnp.float32)

    grid = (N, n_ht)
    x_spec = pl.BlockSpec((1, Ht, Wp, Cin), lambda n, h: (n, h, 0, 0))
    halo_spec = pl.BlockSpec((1, 1, Wp, Cin), lambda n, h: (n, h, 0, 0))
    w_spec = pl.BlockSpec((9, Cin, Cout), lambda n, h: (0, 0, 0))
    vec_spec = pl.BlockSpec((1, Cout), lambda n, h: (0, 0))
    scratch = [pltpu.VMEM((Ht + 2, Wp, Cin), jnp.float32)]         # band + halo rows
    cparams = pltpu.CompilerParams(
        dimension_semantics=("parallel", "parallel"),
        vmem_limit_bytes=vmem_limit)

    # Pass 1: conv + per-band per-channel (sum, centered M2) partials.
    stats = pl.pallas_call(
        functools.partial(_stats_kernel, Ht=Ht, W=W, Cin=Cin, Cout=Cout),
        out_shape=jax.ShapeDtypeStruct((N, n_ht, 2, Cout), jnp.float32),
        grid=grid,
        in_specs=[x_spec, halo_spec, halo_spec, w_spec],
        out_specs=pl.BlockSpec((1, 1, 2, Cout), lambda n, h: (n, h, 0, 0)),
        scratch_shapes=scratch,
        compiler_params=cparams,
    )(x_in, tops, bots, w_taps)

    # Global batch statistics via a Welford-style merge of per-band partials
    # (avoids E[x^2]-mean^2 cancellation), folded into y = conv*a + b.
    cnt_band = jnp.float32(Ht * W)
    total = jnp.float32(N * H * W)
    s_b = stats[:, :, 0, :]                                        # (N, n_ht, Cout)
    m2_b = stats[:, :, 1, :]
    mean = jnp.sum(s_b, axis=(0, 1)) / total
    bmean = s_b / cnt_band
    var = (jnp.sum(m2_b, axis=(0, 1))
           + cnt_band * jnp.sum((bmean - mean) ** 2, axis=(0, 1))) / total
    var = jnp.maximum(var, 0.0)                                    # biased (training-mode) var
    a_vec = gamma.astype(jnp.float32) * jax.lax.rsqrt(var + jnp.float32(eps))
    b_vec = beta.astype(jnp.float32) - mean * a_vec

    # Pass 2: recompute conv per band (cheaper than an HBM round trip of the
    # f32 conv intermediate while 2*Cout > Cin), apply y = max(conv*a + b, 0),
    # store directly as flat NCHW (N, Cout, H*W).
    # TODO(synk): if ever instantiated with Cin >> 2*Cout, store the bf16 conv
    # in pass 1 and make pass 2 a pure elementwise kernel instead.
    out_flat = pl.pallas_call(
        functools.partial(_apply_kernel, Ht=Ht, W=W, Cin=Cin, Cout=Cout),
        out_shape=jax.ShapeDtypeStruct((N, Cout, H * W), jnp.float32),
        grid=grid,
        in_specs=[x_spec, halo_spec, halo_spec, w_spec, vec_spec, vec_spec],
        out_specs=pl.BlockSpec((1, Cout, Ht * W), lambda n, h: (n, 0, h)),
        scratch_shapes=scratch,
        compiler_params=cparams,
    )(x_in, tops, bots, w_taps, a_vec.reshape(1, Cout), b_vec.reshape(1, Cout))

    # TODO(synk): BatchNorm2d running_mean/running_var momentum updates (a
    # training-time side effect of the PyTorch module) are not produced here.
    return out_flat.reshape(N, Cout, H, W)                         # free reshape


def _reference(x_nchw, w_oihw, gamma, beta, eps=1e-5):
    """Pure-JAX reference with matching bf16-input / f32-accumulate numerics."""
    xb = x_nchw.astype(jnp.bfloat16).astype(jnp.float32)
    conv = jax.lax.conv_general_dilated(
        xb, w_oihw, window_strides=(1, 1), padding="SAME",
        dimension_numbers=("NCHW", "OIHW", "NCHW"),
        preferred_element_type=jnp.float32)
    mean = jnp.mean(conv, axis=(0, 2, 3), keepdims=True)
    var = jnp.mean((conv - mean) ** 2, axis=(0, 2, 3), keepdims=True)
    y = (conv - mean) * jax.lax.rsqrt(var + eps)
    y = y * gamma.reshape(1, -1, 1, 1) + beta.reshape(1, -1, 1, 1)
    return jnp.maximum(y, 0.0)


if __name__ == "__main__":
    key = jax.random.PRNGKey(0)
    k_x, k_w = jax.random.split(key)

    N, Cin, H, W = 2, 4, 16, 16
    Cout = 8

    x = jax.random.normal(k_x, (N, Cin, H, W), dtype=jnp.float32)

    # Deterministic Conv2d weight init (kaiming-uniform-like bound), no bias.
    fan_in = Cin * 3 * 3
    bound = 1.0 / float(fan_in) ** 0.5
    w = jax.random.uniform(k_w, (Cout, Cin, 3, 3), jnp.float32, -bound, bound)

    # BatchNorm2d default affine params: gamma=1, beta=0.
    gamma = jnp.ones((Cout,), jnp.float32)
    beta = jnp.zeros((Cout,), jnp.float32)

    ref = jax.block_until_ready(_reference(x, w, gamma, beta))

    # Auto-sized bands (single band per image at this small shape).
    out = jax.block_until_ready(jax.jit(cbrblock_forward)(x, w, gamma, beta))
    assert out.shape == (N, Cout, H, W)
    assert bool(jnp.allclose(out, ref, rtol=1e-2, atol=1e-2)), "mismatch vs JAX reference"

    # Also exercise the multi-band path (halo rows + cross-tile BN-stat merge).
    fwd_banded = jax.jit(functools.partial(cbrblock_forward, band_rows=8))
    out_b = jax.block_until_ready(fwd_banded(x, w, gamma, beta))
    assert bool(jnp.allclose(out_b, ref, rtol=1e-2, atol=1e-2)), "mismatch (banded) vs reference"

    print("KERNEL_OK")
</pallas_src>

<mosaic_0001>
module attributes {stable_mosaic.version = 11 : i64} {
  func.func @_stats_kernel(%arg0: i32, %arg1: i32, %arg2: memref<1x16x18x4xbf16, #tpu.memory_space<vmem>>, %arg3: memref<1x1x18x4xbf16, #tpu.memory_space<vmem>>, %arg4: memref<1x1x18x4xbf16, #tpu.memory_space<vmem>>, %arg5: memref<9x4x8xf32, #tpu.memory_space<vmem>>, %arg6: memref<1x1x2x8xf32, #tpu.memory_space<vmem>>, %arg7: memref<18x18x4xf32, #tpu.memory_space<vmem>>) attributes {dimension_semantics = [#tpu.dimension_semantics<parallel>, #tpu.dimension_semantics<parallel>], iteration_bounds = array<i64: 2, 1>, scalar_prefetch = 0 : i64, scratch_operands = 1 : i64, tpu.core_type = #tpu.core_type<tc>, window_params = [{transform_indices = @transform_0, window_bounds = array<i64: 1, 16, 18, 4>}, {transform_indices = @transform_1, window_bounds = array<i64: 1, 1, 18, 4>}, {transform_indices = @transform_2, window_bounds = array<i64: 1, 1, 18, 4>}, {pipeline_mode = #tpu.pipeline_mode<synchronous>, transform_indices = @transform_3, window_bounds = array<i64: 9, 4, 8>}, {transform_indices = @transform_4, window_bounds = array<i64: 1, 1, 2, 8>}]} {
    %c0 = arith.constant 0 : index
    %c0_0 = arith.constant 0 : index
    %c0_1 = arith.constant 0 : index
    %c0_2 = arith.constant 0 : index
    %0 = vector.load %arg3[%c0, %c0_0, %c0_1, %c0_2] : memref<1x1x18x4xbf16, #tpu.memory_space<vmem>>, vector<1x1x18x4xbf16>
    %1 = vector.shape_cast %0 : vector<1x1x18x4xbf16> to vector<1x18x4xbf16>
    %2 = arith.extf %1 : vector<1x18x4xbf16> to vector<1x18x4xf32>
    %c0_3 = arith.constant 0 : index
    %c0_4 = arith.constant 0 : index
    %c0_5 = arith.constant 0 : index
    %3 = vector.load %arg7[%c0_3, %c0_4, %c0_5] : memref<18x18x4xf32, #tpu.memory_space<vmem>>, vector<1x18x4xf32>
    tpu.vector_store %arg7[%c0_3, %c0_4, %c0_5], %2 {strides = array<i32>} : memref<18x18x4xf32, #tpu.memory_space<vmem>>, vector<1x18x4xf32>,
    %c0_6 = arith.constant 0 : index
    %c0_7 = arith.constant 0 : index
    %c0_8 = arith.constant 0 : index
    %c0_9 = arith.constant 0 : index
    %4 = vector.load %arg2[%c0_6, %c0_7, %c0_8, %c0_9] : memref<1x16x18x4xbf16, #tpu.memory_space<vmem>>, vector<1x16x18x4xbf16>
    %5 = vector.shape_cast %4 : vector<1x16x18x4xbf16> to vector<16x18x4xbf16>
    %6 = arith.extf %5 : vector<16x18x4xbf16> to vector<16x18x4xf32>
    %c1 = arith.constant 1 : index
    %c0_10 = arith.constant 0 : index
    %c0_11 = arith.constant 0 : index
    %7 = vector.load %arg7[%c1, %c0_10, %c0_11] : memref<18x18x4xf32, #tpu.memory_space<vmem>>, vector<16x18x4xf32>
    tpu.vector_store %arg7[%c1, %c0_10, %c0_11], %6 {strides = array<i32>} : memref<18x18x4xf32, #tpu.memory_space<vmem>>, vector<16x18x4xf32>,
    %c0_12 = arith.constant 0 : index
    %c0_13 = arith.constant 0 : index
    %c0_14 = arith.constant 0 : index
    %c0_15 = arith.constant 0 : index
    %8 = vector.load %arg4[%c0_12, %c0_13, %c0_14, %c0_15] : memref<1x1x18x4xbf16, #tpu.memory_space<vmem>>, vector<1x1x18x4xbf16>
    %9 = vector.shape_cast %8 : vector<1x1x18x4xbf16> to vector<1x18x4xbf16>
    %10 = arith.extf %9 : vector<1x18x4xbf16> to vector<1x18x4xf32>
    %c17 = arith.constant 17 : index
    %c0_16 = arith.constant 0 : index
    %c0_17 = arith.constant 0 : index
    %11 = vector.load %arg7[%c17, %c0_16, %c0_17] : memref<18x18x4xf32, #tpu.memory_space<vmem>>, vector<1x18x4xf32>
    tpu.vector_store %arg7[%c17, %c0_16, %c0_17], %10 {strides = array<i32>} : memref<18x18x4xf32, #tpu.memory_space<vmem>>, vector<1x18x4xf32>,
    %c0_18 = arith.constant 0 : index
    %c0_19 = arith.constant 0 : index
    %c0_20 = arith.constant 0 : index
    %12 = vector.load %arg7[%c0_18, %c0_19, %c0_20] : memref<18x18x4xf32, #tpu.memory_space<vmem>>, vector<16x16x4xf32>
    %13 = vector.shape_cast %12 : vector<16x16x4xf32> to vector<256x4xf32>
    %c0_21 = arith.constant 0 : index
    %c0_22 = arith.constant 0 : index
    %c0_23 = arith.constant 0 : index
    %14 = vector.load %arg5[%c0_21, %c0_22, %c0_23] : memref<9x4x8xf32, #tpu.memory_space<vmem>>, vector<1x4x8xf32>
    %15 = vector.shape_cast %14 : vector<1x4x8xf32> to vector<4x8xf32>
    %cst = arith.constant dense<0.000000e+00> : vector<256x8xf32>
    %16 = tpu.matmul %13, %15, %cst {dimension_numbers = #tpu.dot_dimension_numbers<[1], [0], [0], [1], [0, 0, 1, 1], [], []>} : vector<256x4xf32>, vector<4x8xf32>, vector<256x8xf32> -> vector<256x8xf32>
    %c0_24 = arith.constant 0 : index
    %c1_25 = arith.constant 1 : index
    %c0_26 = arith.constant 0 : index
    %17 = vector.load %arg7[%c0_24, %c1_25, %c0_26] : memref<18x18x4xf32, #tpu.memory_space<vmem>>, vector<16x16x4xf32>
    %18 = vector.shape_cast %17 : vector<16x16x4xf32> to vector<256x4xf32>
    %c1_27 = arith.constant 1 : index
    %c0_28 = arith.constant 0 : index
    %c0_29 = arith.constant 0 : index
    %19 = vector.load %arg5[%c1_27, %c0_28, %c0_29] : memref<9x4x8xf32, #tpu.memory_space<vmem>>, vector<1x4x8xf32>
    %20 = vector.shape_cast %19 : vector<1x4x8xf32> to vector<4x8xf32>
    %cst_30 = arith.constant dense<0.000000e+00> : vector<256x8xf32>
    %21 = tpu.matmul %18, %20, %cst_30 {dimension_numbers = #tpu.dot_dimension_numbers<[1], [0], [0], [1], [0, 0, 1, 1], [], []>} : vector<256x4xf32>, vector<4x8xf32>, vector<256x8xf32> -> vector<256x8xf32>
    %22 = arith.addf %16, %21 : vector<256x8xf32>
    %c0_31 = arith.constant 0 : index
    %c2 = arith.constant 2 : index
    %c0_32 = arith.constant 0 : index
    %23 = vector.load %arg7[%c0_31, %c2, %c0_32] : memref<18x18x4xf32, #tpu.memory_space<vmem>>, vector<16x16x4xf32>
    %24 = vector.shape_cast %23 : vector<16x16x4xf32> to vector<256x4xf32>
    %c2_33 = arith.constant 2 : index
    %c0_34 = arith.constant 0 : index
    %c0_35 = arith.constant 0 : index
    %25 = vector.load %arg5[%c2_33, %c0_34, %c0_35] : memref<9x4x8xf32, #tpu.memory_space<vmem>>, vector<1x4x8xf32>
    %26 = vector.shape_cast %25 : vector<1x4x8xf32> to vector<4x8xf32>
    %cst_36 = arith.constant dense<0.000000e+00> : vector<256x8xf32>
    %27 = tpu.matmul %24, %26, %cst_36 {dimension_numbers = #tpu.dot_dimension_numbers<[1], [0], [0], [1], [0, 0, 1, 1], [], []>} : vector<256x4xf32>, vector<4x8xf32>, vector<256x8xf32> -> vector<256x8xf32>
    %28 = arith.addf %22, %27 : vector<256x8xf32>
    %c1_37 = arith.constant 1 : index
    %c0_38 = arith.constant 0 : index
    %c0_39 = arith.constant 0 : index
    %29 = vector.load %arg7[%c1_37, %c0_38, %c0_39] : memref<18x18x4xf32, #tpu.memory_space<vmem>>, vector<16x16x4xf32>
    %30 = vector.shape_cast %29 : vector<16x16x4xf32> to vector<256x4xf32>
    %c3 = arith.constant 3 : index
    %c0_40 = arith.constant 0 : index
    %c0_41 = arith.constant 0 : index
    %31 = vector.load %arg5[%c3, %c0_40, %c0_41] : memref<9x4x8xf32, #tpu.memory_space<vmem>>, vector<1x4x8xf32>
    %32 = vector.shape_cast %31 : vector<1x4x8xf32> to vector<4x8xf32>
    %cst_42 = arith.constant dense<0.000000e+00> : vector<256x8xf32>
    %33 = tpu.matmul %30, %32, %cst_42 {dimension_numbers = #tpu.dot_dimension_numbers<[1], [0], [0], [1], [0, 0, 1, 1], [], []>} : vector<256x4xf32>, vector<4x8xf32>, vector<256x8xf32> -> vector<256x8xf32>
    %34 = arith.addf %28, %33 : vector<256x8xf32>
    %c1_43 = arith.constant 1 : index
    %c1_44 = arith.constant 1 : index
    %c0_45 = arith.constant 0 : index
    %35 = vector.load %arg7[%c1_43, %c1_44, %c0_45] : memref<18x18x4xf32, #tpu.memory_space<vmem>>, vector<16x16x4xf32>
    %36 = vector.shape_cast %35 : vector<16x16x4xf32> to vector<256x4xf32>
    %c4 = arith.constant 4 : index
    %c0_46 = arith.constant 0 : index
    %c0_47 = arith.constant 0 : index
    %37 = vector.load %arg5[%c4, %c0_46, %c0_47] : memref<9x4x8xf32, #tpu.memory_space<vmem>>, vector<1x4x8xf32>
    %38 = vector.shape_cast %37 : vector<1x4x8xf32> to vector<4x8xf32>
    %cst_48 = arith.constant dense<0.000000e+00> : vector<256x8xf32>
    %39 = tpu.matmul %36, %38, %cst_48 {dimension_numbers = #tpu.dot_dimension_numbers<[1], [0], [0], [1], [0, 0, 1, 1], [], []>} : vector<256x4xf32>, vector<4x8xf32>, vector<256x8xf32> -> vector<256x8xf32>
    %40 = arith.addf %34, %39 : vector<256x8xf32>
    %c1_49 = arith.constant 1 : index
    %c2_50 = arith.constant 2 : index
    %c0_51 = arith.constant 0 : index
    %41 = vector.load %arg7[%c1_49, %c2_50, %c0_51] : memref<18x18x4xf32, #tpu.memory_space<vmem>>, vector<16x16x4xf32>
    %42 = vector.shape_cast %41 : vector<16x16x4xf32> to vector<256x4xf32>
    %c5 = arith.constant 5 : index
    %c0_52 = arith.constant 0 : index
    %c0_53 = arith.constant 0 : index
    %43 = vector.load %arg5[%c5, %c0_52, %c0_53] : memref<9x4x8xf32, #tpu.memory_space<vmem>>, vector<1x4x8xf32>
    %44 = vector.shape_cast %43 : vector<1x4x8xf32> to vector<4x8xf32>
    %cst_54 = arith.constant dense<0.000000e+00> : vector<256x8xf32>
    %45 = tpu.matmul %42, %44, %cst_54 {dimension_numbers = #tpu.dot_dimension_numbers<[1], [0], [0], [1], [0, 0, 1, 1], [], []>} : vector<256x4xf32>, vector<4x8xf32>, vector<256x8xf32> -> vector<256x8xf32>
    %46 = arith.addf %40, %45 : vector<256x8xf32>
    %c2_55 = arith.constant 2 : index
    %c0_56 = arith.constant 0 : index
    %c0_57 = arith.constant 0 : index
    %47 = vector.load %arg7[%c2_55, %c0_56, %c0_57] : memref<18x18x4xf32, #tpu.memory_space<vmem>>, vector<16x16x4xf32>
    %48 = vector.shape_cast %47 : vector<16x16x4xf32> to vector<256x4xf32>
    %c6 = arith.constant 6 : index
    %c0_58 = arith.constant 0 : index
    %c0_59 = arith.constant 0 : index
    %49 = vector.load %arg5[%c6, %c0_58, %c0_59] : memref<9x4x8xf32, #tpu.memory_space<vmem>>, vector<1x4x8xf32>
    %50 = vector.shape_cast %49 : vector<1x4x8xf32> to vector<4x8xf32>
    %cst_60 = arith.constant dense<0.000000e+00> : vector<256x8xf32>
    %51 = tpu.matmul %48, %50, %cst_60 {dimension_numbers = #tpu.dot_dimension_numbers<[1], [0], [0], [1], [0, 0, 1, 1], [], []>} : vector<256x4xf32>, vector<4x8xf32>, vector<256x8xf32> -> vector<256x8xf32>
    %52 = arith.addf %46, %51 : vector<256x8xf32>
    %c2_61 = arith.constant 2 : index
    %c1_62 = arith.constant 1 : index
    %c0_63 = arith.constant 0 : index
    %53 = vector.load %arg7[%c2_61, %c1_62, %c0_63] : memref<18x18x4xf32, #tpu.memory_space<vmem>>, vector<16x16x4xf32>
    %54 = vector.shape_cast %53 : vector<16x16x4xf32> to vector<256x4xf32>
    %c7 = arith.constant 7 : index
    %c0_64 = arith.constant 0 : index
    %c0_65 = arith.constant 0 : index
    %55 = vector.load %arg5[%c7, %c0_64, %c0_65] : memref<9x4x8xf32, #tpu.memory_space<vmem>>, vector<1x4x8xf32>
    %56 = vector.shape_cast %55 : vector<1x4x8xf32> to vector<4x8xf32>
    %cst_66 = arith.constant dense<0.000000e+00> : vector<256x8xf32>
    %57 = tpu.matmul %54, %56, %cst_66 {dimension_numbers = #tpu.dot_dimension_numbers<[1], [0], [0], [1], [0, 0, 1, 1], [], []>} : vector<256x4xf32>, vector<4x8xf32>, vector<256x8xf32> -> vector<256x8xf32>
    %58 = arith.addf %52, %57 : vector<256x8xf32>
    %c2_67 = arith.constant 2 : index
    %c2_68 = arith.constant 2 : index
    %c0_69 = arith.constant 0 : index
    %59 = vector.load %arg7[%c2_67, %c2_68, %c0_69] : memref<18x18x4xf32, #tpu.memory_space<vmem>>, vector<16x16x4xf32>
    %60 = vector.shape_cast %59 : vector<16x16x4xf32> to vector<256x4xf32>
    %c8 = arith.constant 8 : index
    %c0_70 = arith.constant 0 : index
    %c0_71 = arith.constant 0 : index
    %61 = vector.load %arg5[%c8, %c0_70, %c0_71] : memref<9x4x8xf32, #tpu.memory_space<vmem>>, vector<1x4x8xf32>
    %62 = vector.shape_cast %61 : vector<1x4x8xf32> to vector<4x8xf32>
    %cst_72 = arith.constant dense<0.000000e+00> : vector<256x8xf32>
    %63 = tpu.matmul %60, %62, %cst_72 {dimension_numbers = #tpu.dot_dimension_numbers<[1], [0], [0], [1], [0, 0, 1, 1], [], []>} : vector<256x4xf32>, vector<4x8xf32>, vector<256x8xf32> -> vector<256x8xf32>
    %64 = arith.addf %58, %63 : vector<256x8xf32>
    %cst_73 = arith.constant dense<0.000000e+00> : vector<8xf32>
    %65 = vector.multi_reduction <add>, %64, %cst_73 [0] : vector<256x8xf32> to vector<8xf32>
    %66 = vector.shape_cast %65 : vector<8xf32> to vector<1x8xf32>
    %cst_74 = arith.constant 3.906250e-03 : f32
    %67 = vector.broadcast %cst_74 : f32 to vector<1x8xf32>
    %68 = arith.mulf %66, %67 : vector<1x8xf32>
    %69 = vector.broadcast %68 : vector<1x8xf32> to vector<256x8xf32>
    %70 = arith.subf %64, %69 : vector<256x8xf32>
    %71 = arith.mulf %70, %70 : vector<256x8xf32>
    %cst_75 = arith.constant dense<0.000000e+00> : vector<8xf32>
    %72 = vector.multi_reduction <add>, %71, %cst_75 [0] : vector<256x8xf32> to vector<8xf32>
    %73 = vector.shape_cast %72 : vector<8xf32> to vector<1x8xf32>
    %74 = tpu.concatenate %66, %73 in 0 : vector<1x8xf32>, vector<1x8xf32> -> vector<2x8xf32>
    %75 = vector.shape_cast %74 : vector<2x8xf32> to vector<1x1x2x8xf32>
    %c0_76 = arith.constant 0 : index
    %c0_77 = arith.constant 0 : index
    %c0_78 = arith.constant 0 : index
    %c0_79 = arith.constant 0 : index
    %76 = vector.load %arg6[%c0_76, %c0_77, %c0_78, %c0_79] : memref<1x1x2x8xf32, #tpu.memory_space<vmem>>, vector<1x1x2x8xf32>
    tpu.vector_store %arg6[%c0_76, %c0_77, %c0_78, %c0_79], %75 {strides = array<i32>} : memref<1x1x2x8xf32, #tpu.memory_space<vmem>>, vector<1x1x2x8xf32>,
    return
  }
  func.func @transform_0(%arg0: i32, %arg1: i32) -> (i32, i32, i32, i32) {
    %c0_i32 = arith.constant 0 : i32
    %c0_i32_0 = arith.constant 0 : i32
    %c0_i32_1 = arith.constant 0 : i32
    return %arg0, %arg1, %c0_i32, %c0_i32_0 : i32, i32, i32, i32
  }
  func.func @transform_1(%arg0: i32, %arg1: i32) -> (i32, i32, i32, i32) {
    %c0_i32 = arith.constant 0 : i32
    %c0_i32_0 = arith.constant 0 : i32
    %c0_i32_1 = arith.constant 0 : i32
    return %arg0, %arg1, %c0_i32, %c0_i32_0 : i32, i32, i32, i32
  }
  func.func @transform_2(%arg0: i32, %arg1: i32) -> (i32, i32, i32, i32) {
    %c0_i32 = arith.constant 0 : i32
    %c0_i32_0 = arith.constant 0 : i32
    %c0_i32_1 = arith.constant 0 : i32
    return %arg0, %arg1, %c0_i32, %c0_i32_0 : i32, i32, i32, i32
  }
  func.func @transform_3(%arg0: i32, %arg1: i32) -> (i32, i32, i32) {
    %c0_i32 = arith.constant 0 : i32
    %c0_i32_0 = arith.constant 0 : i32
    %c0_i32_1 = arith.constant 0 : i32
    %c0_i32_2 = arith.constant 0 : i32
    return %c0_i32, %c0_i32_0, %c0_i32_1 : i32, i32, i32
  }
  func.func @transform_4(%arg0: i32, %arg1: i32) -> (i32, i32, i32, i32) {
    %c0_i32 = arith.constant 0 : i32
    %c0_i32_0 = arith.constant 0 : i32
    %c0_i32_1 = arith.constant 0 : i32
    return %arg0, %arg1, %c0_i32, %c0_i32_0 : i32, i32, i32, i32
  }
}

module attributes {stable_mosaic.version = 11 : i64} {
  func.func @_apply_kernel(%arg0: i32, %arg1: i32, %arg2: memref<1x16x18x4xbf16, #tpu.memory_space<vmem>>, %arg3: memref<1x1x18x4xbf16, #tpu.memory_space<vmem>>, %arg4: memref<1x1x18x4xbf16, #tpu.memory_space<vmem>>, %arg5: memref<9x4x8xf32, #tpu.memory_space<vmem>>, %arg6: memref<1x8xf32, #tpu.memory_space<vmem>>, %arg7: memref<1x8xf32, #tpu.memory_space<vmem>>, %arg8: memref<1x8x256xf32, #tpu.memory_space<vmem>>, %arg9: memref<18x18x4xf32, #tpu.memory_space<vmem>>) attributes {dimension_semantics = [#tpu.dimension_semantics<parallel>, #tpu.dimension_semantics<parallel>], iteration_bounds = array<i64: 2, 1>, scalar_prefetch = 0 : i64, scratch_operands = 1 : i64, tpu.core_type = #tpu.core_type<tc>, window_params = [{transform_indices = @transform_0, window_bounds = array<i64: 1, 16, 18, 4>}, {transform_indices = @transform_1, window_bounds = array<i64: 1, 1, 18, 4>}, {transform_indices = @transform_2, window_bounds = array<i64: 1, 1, 18, 4>}, {pipeline_mode = #tpu.pipeline_mode<synchronous>, transform_indices = @transform_3, window_bounds = array<i64: 9, 4, 8>}, {pipeline_mode = #tpu.pipeline_mode<synchronous>, transform_indices = @transform_4, window_bounds = array<i64: 1, 8>}, {pipeline_mode = #tpu.pipeline_mode<synchronous>, transform_indices = @transform_5, window_bounds = array<i64: 1, 8>}, {transform_indices = @transform_6, window_bounds = array<i64: 1, 8, 256>}]} {
    %c0 = arith.constant 0 : index
    %c0_0 = arith.constant 0 : index
    %c0_1 = arith.constant 0 : index
    %c0_2 = arith.constant 0 : index
    %0 = vector.load %arg3[%c0, %c0_0, %c0_1, %c0_2] : memref<1x1x18x4xbf16, #tpu.memory_space<vmem>>, vector<1x1x18x4xbf16>
    %1 = vector.shape_cast %0 : vector<1x1x18x4xbf16> to vector<1x18x4xbf16>
    %2 = arith.extf %1 : vector<1x18x4xbf16> to vector<1x18x4xf32>
    %c0_3 = arith.constant 0 : index
    %c0_4 = arith.constant 0 : index
    %c0_5 = arith.constant 0 : index
    %3 = vector.load %arg9[%c0_3, %c0_4, %c0_5] : memref<18x18x4xf32, #tpu.memory_space<vmem>>, vector<1x18x4xf32>
    tpu.vector_store %arg9[%c0_3, %c0_4, %c0_5], %2 {strides = array<i32>} : memref<18x18x4xf32, #tpu.memory_space<vmem>>, vector<1x18x4xf32>,
    %c0_6 = arith.constant 0 : index
    %c0_7 = arith.constant 0 : index
    %c0_8 = arith.constant 0 : index
    %c0_9 = arith.constant 0 : index
    %4 = vector.load %arg2[%c0_6, %c0_7, %c0_8, %c0_9] : memref<1x16x18x4xbf16, #tpu.memory_space<vmem>>, vector<1x16x18x4xbf16>
    %5 = vector.shape_cast %4 : vector<1x16x18x4xbf16> to vector<16x18x4xbf16>
    %6 = arith.extf %5 : vector<16x18x4xbf16> to vector<16x18x4xf32>
    %c1 = arith.constant 1 : index
    %c0_10 = arith.constant 0 : index
    %c0_11 = arith.constant 0 : index
    %7 = vector.load %arg9[%c1, %c0_10, %c0_11] : memref<18x18x4xf32, #tpu.memory_space<vmem>>, vector<16x18x4xf32>
    tpu.vector_store %arg9[%c1, %c0_10, %c0_11], %6 {strides = array<i32>} : memref<18x18x4xf32, #tpu.memory_space<vmem>>, vector<16x18x4xf32>,
    %c0_12 = arith.constant 0 : index
    %c0_13 = arith.constant 0 : index
    %c0_14 = arith.constant 0 : index
    %c0_15 = arith.constant 0 : index
    %8 = vector.load %arg4[%c0_12, %c0_13, %c0_14, %c0_15] : memref<1x1x18x4xbf16, #tpu.memory_space<vmem>>, vector<1x1x18x4xbf16>
    %9 = vector.shape_cast %8 : vector<1x1x18x4xbf16> to vector<1x18x4xbf16>
    %10 = arith.extf %9 : vector<1x18x4xbf16> to vector<1x18x4xf32>
    %c17 = arith.constant 17 : index
    %c0_16 = arith.constant 0 : index
    %c0_17 = arith.constant 0 : index
    %11 = vector.load %arg9[%c17, %c0_16, %c0_17] : memref<18x18x4xf32, #tpu.memory_space<vmem>>, vector<1x18x4xf32>
    tpu.vector_store %arg9[%c17, %c0_16, %c0_17], %10 {strides = array<i32>} : memref<18x18x4xf32, #tpu.memory_space<vmem>>, vector<1x18x4xf32>,
    %c0_18 = arith.constant 0 : index
    %c0_19 = arith.constant 0 : index
    %c0_20 = arith.constant 0 : index
    %12 = vector.load %arg9[%c0_18, %c0_19, %c0_20] : memref<18x18x4xf32, #tpu.memory_space<vmem>>, vector<16x16x4xf32>
    %13 = vector.shape_cast %12 : vector<16x16x4xf32> to vector<256x4xf32>
    %c0_21 = arith.constant 0 : index
    %c0_22 = arith.constant 0 : index
    %c0_23 = arith.constant 0 : index
    %14 = vector.load %arg5[%c0_21, %c0_22, %c0_23] : memref<9x4x8xf32, #tpu.memory_space<vmem>>, vector<1x4x8xf32>
    %15 = vector.shape_cast %14 : vector<1x4x8xf32> to vector<4x8xf32>
    %cst = arith.constant dense<0.000000e+00> : vector<256x8xf32>
    %16 = tpu.matmul %13, %15, %cst {dimension_numbers = #tpu.dot_dimension_numbers<[1], [0], [0], [1], [0, 0, 1, 1], [], []>} : vector<256x4xf32>, vector<4x8xf32>, vector<256x8xf32> -> vector<256x8xf32>
    %c0_24 = arith.constant 0 : index
    %c1_25 = arith.constant 1 : index
    %c0_26 = arith.constant 0 : index
    %17 = vector.load %arg9[%c0_24, %c1_25, %c0_26] : memref<18x18x4xf32, #tpu.memory_space<vmem>>, vector<16x16x4xf32>
    %18 = vector.shape_cast %17 : vector<16x16x4xf32> to vector<256x4xf32>
    %c1_27 = arith.constant 1 : index
    %c0_28 = arith.constant 0 : index
    %c0_29 = arith.constant 0 : index
    %19 = vector.load %arg5[%c1_27, %c0_28, %c0_29] : memref<9x4x8xf32, #tpu.memory_space<vmem>>, vector<1x4x8xf32>
    %20 = vector.shape_cast %19 : vector<1x4x8xf32> to vector<4x8xf32>
    %cst_30 = arith.constant dense<0.000000e+00> : vector<256x8xf32>
    %21 = tpu.matmul %18, %20, %cst_30 {dimension_numbers = #tpu.dot_dimension_numbers<[1], [0], [0], [1], [0, 0, 1, 1], [], []>} : vector<256x4xf32>, vector<4x8xf32>, vector<256x8xf32> -> vector<256x8xf32>
    %22 = arith.addf %16, %21 : vector<256x8xf32>
    %c0_31 = arith.constant 0 : index
    %c2 = arith.constant 2 : index
    %c0_32 = arith.constant 0 : index
    %23 = vector.load %arg9[%c0_31, %c2, %c0_32] : memref<18x18x4xf32, #tpu.memory_space<vmem>>, vector<16x16x4xf32>
    %24 = vector.shape_cast %23 : vector<16x16x4xf32> to vector<256x4xf32>
    %c2_33 = arith.constant 2 : index
    %c0_34 = arith.constant 0 : index
    %c0_35 = arith.constant 0 : index
    %25 = vector.load %arg5[%c2_33, %c0_34, %c0_35] : memref<9x4x8xf32, #tpu.memory_space<vmem>>, vector<1x4x8xf32>
    %26 = vector.shape_cast %25 : vector<1x4x8xf32> to vector<4x8xf32>
    %cst_36 = arith.constant dense<0.000000e+00> : vector<256x8xf32>
    %27 = tpu.matmul %24, %26, %cst_36 {dimension_numbers = #tpu.dot_dimension_numbers<[1], [0], [0], [1], [0, 0, 1, 1], [], []>} : vector<256x4xf32>, vector<4x8xf32>, vector<256x8xf32> -> vector<256x8xf32>
    %28 = arith.addf %22, %27 : vector<256x8xf32>
    %c1_37 = arith.constant 1 : index
    %c0_38 = arith.constant 0 : index
    %c0_39 = arith.constant 0 : index
    %29 = vector.load %arg9[%c1_37, %c0_38, %c0_39] : memref<18x18x4xf32, #tpu.memory_space<vmem>>, vector<16x16x4xf32>
    %30 = vector.shape_cast %29 : vector<16x16x4xf32> to vector<256x4xf32>
    %c3 = arith.constant 3 : index
    %c0_40 = arith.constant 0 : index
    %c0_41 = arith.constant 0 : index
    %31 = vector.load %arg5[%c3, %c0_40, %c0_41] : memref<9x4x8xf32, #tpu.memory_space<vmem>>, vector<1x4x8xf32>
    %32 = vector.shape_cast %31 : vector<1x4x8xf32> to vector<4x8xf32>
    %cst_42 = arith.constant dense<0.000000e+00> : vector<256x8xf32>
    %33 = tpu.matmul %30, %32, %cst_42 {dimension_numbers = #tpu.dot_dimension_numbers<[1], [0], [0], [1], [0, 0, 1, 1], [], []>} : vector<256x4xf32>, vector<4x8xf32>, vector<256x8xf32> -> vector<256x8xf32>
    %34 = arith.addf %28, %33 : vector<256x8xf32>
    %c1_43 = arith.constant 1 : index
    %c1_44 = arith.constant 1 : index
    %c0_45 = arith.constant 0 : index
    %35 = vector.load %arg9[%c1_43, %c1_44, %c0_45] : memref<18x18x4xf32, #tpu.memory_space<vmem>>, vector<16x16x4xf32>
    %36 = vector.shape_cast %35 : vector<16x16x4xf32> to vector<256x4xf32>
    %c4 = arith.constant 4 : index
    %c0_46 = arith.constant 0 : index
    %c0_47 = arith.constant 0 : index
    %37 = vector.load %arg5[%c4, %c0_46, %c0_47] : memref<9x4x8xf32, #tpu.memory_space<vmem>>, vector<1x4x8xf32>
    %38 = vector.shape_cast %37 : vector<1x4x8xf32> to vector<4x8xf32>
    %cst_48 = arith.constant dense<0.000000e+00> : vector<256x8xf32>
    %39 = tpu.matmul %36, %38, %cst_48 {dimension_numbers = #tpu.dot_dimension_numbers<[1], [0], [0], [1], [0, 0, 1, 1], [], []>} : vector<256x4xf32>, vector<4x8xf32>, vector<256x8xf32> -> vector<256x8xf32>
    %40 = arith.addf %34, %39 : vector<256x8xf32>
    %c1_49 = arith.constant 1 : index
    %c2_50 = arith.constant 2 : index
    %c0_51 = arith.constant 0 : index
    %41 = vector.load %arg9[%c1_49, %c2_50, %c0_51] : memref<18x18x4xf32, #tpu.memory_space<vmem>>, vector<16x16x4xf32>
    %42 = vector.shape_cast %41 : vector<16x16x4xf32> to vector<256x4xf32>
    %c5 = arith.constant 5 : index
    %c0_52 = arith.constant 0 : index
    %c0_53 = arith.constant 0 : index
    %43 = vector.load %arg5[%c5, %c0_52, %c0_53] : memref<9x4x8xf32, #tpu.memory_space<vmem>>, vector<1x4x8xf32>
    %44 = vector.shape_cast %43 : vector<1x4x8xf32> to vector<4x8xf32>
    %cst_54 = arith.constant dense<0.000000e+00> : vector<256x8xf32>
    %45 = tpu.matmul %42, %44, %cst_54 {dimension_numbers = #tpu.dot_dimension_numbers<[1], [0], [0], [1], [0, 0, 1, 1], [], []>} : vector<256x4xf32>, vector<4x8xf32>, vector<256x8xf32> -> vector<256x8xf32>
    %46 = arith.addf %40, %45 : vector<256x8xf32>
    %c2_55 = arith.constant 2 : index
    %c0_56 = arith.constant 0 : index
    %c0_57 = arith.constant 0 : index
    %47 = vector.load %arg9[%c2_55, %c0_56, %c0_57] : memref<18x18x4xf32, #tpu.memory_space<vmem>>, vector<16x16x4xf32>
    %48 = vector.shape_cast %47 : vector<16x16x4xf32> to vector<256x4xf32>
    %c6 = arith.constant 6 : index
    %c0_58 = arith.constant 0 : index
    %c0_59 = arith.constant 0 : index
    %49 = vector.load %arg5[%c6, %c0_58, %c0_59] : memref<9x4x8xf32, #tpu.memory_space<vmem>>, vector<1x4x8xf32>
    %50 = vector.shape_cast %49 : vector<1x4x8xf32> to vector<4x8xf32>
    %cst_60 = arith.constant dense<0.000000e+00> : vector<256x8xf32>
    %51 = tpu.matmul %48, %50, %cst_60 {dimension_numbers = #tpu.dot_dimension_numbers<[1], [0], [0], [1], [0, 0, 1, 1], [], []>} : vector<256x4xf32>, vector<4x8xf32>, vector<256x8xf32> -> vector<256x8xf32>
    %52 = arith.addf %46, %51 : vector<256x8xf32>
    %c2_61 = arith.constant 2 : index
    %c1_62 = arith.constant 1 : index
    %c0_63 = arith.constant 0 : index
    %53 = vector.load %arg9[%c2_61, %c1_62, %c0_63] : memref<18x18x4xf32, #tpu.memory_space<vmem>>, vector<16x16x4xf32>
    %54 = vector.shape_cast %53 : vector<16x16x4xf32> to vector<256x4xf32>
    %c7 = arith.constant 7 : index
    %c0_64 = arith.constant 0 : index
    %c0_65 = arith.constant 0 : index
    %55 = vector.load %arg5[%c7, %c0_64, %c0_65] : memref<9x4x8xf32, #tpu.memory_space<vmem>>, vector<1x4x8xf32>
    %56 = vector.shape_cast %55 : vector<1x4x8xf32> to vector<4x8xf32>
    %cst_66 = arith.constant dense<0.000000e+00> : vector<256x8xf32>
    %57 = tpu.matmul %54, %56, %cst_66 {dimension_numbers = #tpu.dot_dimension_numbers<[1], [0], [0], [1], [0, 0, 1, 1], [], []>} : vector<256x4xf32>, vector<4x8xf32>, vector<256x8xf32> -> vector<256x8xf32>
    %58 = arith.addf %52, %57 : vector<256x8xf32>
    %c2_67 = arith.constant 2 : index
    %c2_68 = arith.constant 2 : index
    %c0_69 = arith.constant 0 : index
    %59 = vector.load %arg9[%c2_67, %c2_68, %c0_69] : memref<18x18x4xf32, #tpu.memory_space<vmem>>, vector<16x16x4xf32>
    %60 = vector.shape_cast %59 : vector<16x16x4xf32> to vector<256x4xf32>
    %c8 = arith.constant 8 : index
    %c0_70 = arith.constant 0 : index
    %c0_71 = arith.constant 0 : index
    %61 = vector.load %arg5[%c8, %c0_70, %c0_71] : memref<9x4x8xf32, #tpu.memory_space<vmem>>, vector<1x4x8xf32>
    %62 = vector.shape_cast %61 : vector<1x4x8xf32> to vector<4x8xf32>
    %cst_72 = arith.constant dense<0.000000e+00> : vector<256x8xf32>
    %63 = tpu.matmul %60, %62, %cst_72 {dimension_numbers = #tpu.dot_dimension_numbers<[1], [0], [0], [1], [0, 0, 1, 1], [], []>} : vector<256x4xf32>, vector<4x8xf32>, vector<256x8xf32> -> vector<256x8xf32>
    %64 = arith.addf %58, %63 : vector<256x8xf32>
    %c0_73 = arith.constant 0 : index
    %c0_74 = arith.constant 0 : index
    %65 = vector.load %arg6[%c0_73, %c0_74] : memref<1x8xf32, #tpu.memory_space<vmem>>, vector<1x8xf32>
    %66 = vector.broadcast %65 : vector<1x8xf32> to vector<256x8xf32>
    %67 = arith.mulf %64, %66 : vector<256x8xf32>
    %c0_75 = arith.constant 0 : index
    %c0_76 = arith.constant 0 : index
    %68 = vector.load %arg7[%c0_75, %c0_76] : memref<1x8xf32, #tpu.memory_space<vmem>>, vector<1x8xf32>
    %69 = vector.broadcast %68 : vector<1x8xf32> to vector<256x8xf32>
    %70 = arith.addf %67, %69 : vector<256x8xf32>
    %cst_77 = arith.constant 0.000000e+00 : f32
    %71 = vector.broadcast %cst_77 : f32 to vector<256x8xf32>
    %72 = arith.maximumf %70, %71 : vector<256x8xf32>
    %73 = tpu.transpose %72, [1, 0] : vector<256x8xf32> -> vector<8x256xf32>
    %74 = vector.shape_cast %73 : vector<8x256xf32> to vector<1x8x256xf32>
    %c0_78 = arith.constant 0 : index
    %c0_79 = arith.constant 0 : index
    %c0_80 = arith.constant 0 : index
    %75 = vector.load %arg8[%c0_78, %c0_79, %c0_80] : memref<1x8x256xf32, #tpu.memory_space<vmem>>, vector<1x8x256xf32>
    tpu.vector_store %arg8[%c0_78, %c0_79, %c0_80], %74 {strides = array<i32>} : memref<1x8x256xf32, #tpu.memory_space<vmem>>, vector<1x8x256xf32>,
    return
  }
  func.func @transform_0(%arg0: i32, %arg1: i32) -> (i32, i32, i32, i32) {
    %c0_i32 = arith.constant 0 : i32
    %c0_i32_0 = arith.constant 0 : i32
    %c0_i32_1 = arith.constant 0 : i32
    return %arg0, %arg1, %c0_i32, %c0_i32_0 : i32, i32, i32, i32
  }
  func.func @transform_1(%arg0: i32, %arg1: i32) -> (i32, i32, i32, i32) {
    %c0_i32 = arith.constant 0 : i32
    %c0_i32_0 = arith.constant 0 : i32
    %c0_i32_1 = arith.constant 0 : i32
    return %arg0, %arg1, %c0_i32, %c0_i32_0 : i32, i32, i32, i32
  }
  func.func @transform_2(%arg0: i32, %arg1: i32) -> (i32, i32, i32, i32) {
    %c0_i32 = arith.constant 0 : i32
    %c0_i32_0 = arith.constant 0 : i32
    %c0_i32_1 = arith.constant 0 : i32
    return %arg0, %arg1, %c0_i32, %c0_i32_0 : i32, i32, i32, i32
  }
  func.func @transform_3(%arg0: i32, %arg1: i32) -> (i32, i32, i32) {
    %c0_i32 = arith.constant 0 : i32
    %c0_i32_0 = arith.constant 0 : i32
    %c0_i32_1 = arith.constant 0 : i32
    %c0_i32_2 = arith.constant 0 : i32
    return %c0_i32, %c0_i32_0, %c0_i32_1 : i32, i32, i32
  }
  func.func @transform_4(%arg0: i32, %arg1: i32) -> (i32, i32) {
    %c0_i32 = arith.constant 0 : i32
    %c0_i32_0 = arith.constant 0 : i32
    %c0_i32_1 = arith.constant 0 : i32
    return %c0_i32, %c0_i32_0 : i32, i32
  }
  func.func @transform_5(%arg0: i32, %arg1: i32) -> (i32, i32) {
    %c0_i32 = arith.constant 0 : i32
    %c0_i32_0 = arith.constant 0 : i32
    %c0_i32_1 = arith.constant 0 : i32
    return %c0_i32, %c0_i32_0 : i32, i32
  }
  func.func @transform_6(%arg0: i32, %arg1: i32) -> (i32, i32, i32) {
    %c0_i32 = arith.constant 0 : i32
    %c0_i32_0 = arith.constant 0 : i32
    return %arg0, %c0_i32, %arg1 : i32, i32, i32
  }
}

</mosaic_0001>

<bundles_post_ra>
// kernel: cbrblock_forward.2
= control target key start
LH: loop header
LB: loop body
LE: loop exit
PB: predicated region body
PF: predicated region fallthrough
CT: control target
= control target key end

     0   :  { %s5689_s15 = smov 0   ;;  %s5691_s16 = smov 0   ;;  %s6884_s0 = inlined_call_operand.vmem [shape: bf16[2,16,18,4], index: 0, kind: input, shape index: {}]   ;;  %s6885_s1 = inlined_call_operand.vmem [shape: bf16[2,1,18,4], index: 1, kind: input, shape index: {}, may-alias: {1,2}]   ;;  %s6886_s2 = inlined_call_operand.vmem [shape: bf16[2,1,18,4], index: 2, kind: input, shape index: {}, may-alias: {1,2}]   ;;  %s6887_s3 = inlined_call_operand.vmem [shape: f32[9,4,8], index: 3, kind: input, shape index: {}]   ;;  %s6888_s4 = inlined_call_operand.vmem [shape: f32[2,1,2,8], index: 4, kind: output, shape index: {}]  }
   0x1   :  { %s5693_s17 = smov 0  }
   0x2 LB: > { %s26_s18 = sadd.s32 1, %s5658_s16  ;;  %p4250_p0 = scmp.ge.s32.totalorder %s5662_s17, 1  ;;  %s5662_s17 = sphi %s5693_s17, %s14_s17   ;;  %s5658_s16 = sphi %s5691_s16, %s6994_s16   ;;  %s5654_s15 = sphi %s5689_s15, %s6993_s15  }
   0x3   : > { %p28_p1 = scmp.ge.s32.totalorder %s26_s18, 2  ;;  %p216_p2 = scmp.lt.s32.totalorder %s5662_s17, 3 }
   0x5   : > { %s6996_s18 = smov (%p28_p1, %s26_s18), 0  ;;  %p217_p3 = pnand %p4250_p0, %p216_p2 }
   0x7   : > { %220 = sbr.rel (%p217_p3) target bundleno = 637 (0x27d), region = 36 }
   0xe   : > { %v4255_v0 = vld [vmem:[%s6887_s3 + $0x4] sm:$0xf]  ;;  %vm632_vm0 = vcmask 1043456   ;;  %v5713_v1 = vld [vmem:[%s6887_s3 + $0x10] sm:$0xf]  ;;  %p268_p4 = scmp.lt.s32.totalorder %s5654_s15, 1 }
   0xf   : > { %4906 = vmatprep.subr.msk.mxu1 %vm632_vm0, %v4255_v0  ;;  %5106 = vmatprep.subr.msk.mxu0 %vm632_vm0, %v5713_v1  ;;  %v5721_v2 = vld [vmem:[%s6887_s3] sm:$0xf]  ;;  %v5726_v3 = vld [vmem:[%s6887_s3 + $0x14] sm:$0xf]  ;;  %vm309_vm1 = vcmask 31744   ;;  %vm312_vm2 = vcmask 25600  }
  0x10   : > { %4907 = vmatpush3.msk.msra.mxu1 %vm632_vm0, %v4255_v0  ;;  %5107 = vmatpush3.msk.msra.mxu0 %vm632_vm0, %v5713_v1  ;;  %s6998_s15 = smov (!%p268_p4, %s5654_s15), 1  ;;  %vm3916_vm3 = vcmask 64512   ;;  %vm4120_vm4 = vcmask 1040384   ;;  %vm4122_vm5 = vcmask 58368  }
  0x11   : > { %4956 = vmatprep.subr.msk.mxu1 %vm632_vm0, %v5721_v2  ;;  %5156 = vmatprep.subr.msk.mxu0 %vm632_vm0, %v5726_v3  ;;  %s5614_s27 = smul.u32 192, %s6998_s15  ;;  %s4254_s26 = sshll.u32 %s6998_s15, 1 }
  0x12   : > { %s5615_s28 = smul.u32 12, %s6998_s15  ;;  %s302_s29 = scalar_lea.vmem %s6888_s4, %s4254_s26 }
  0x13   : > { %s5742_s5 = scalar_lea.vmem %s6884_s0, %s5614_s27 }
  0x14   : > { %s286_s8 = scalar_lea.vmem %s6885_s1, %s5615_s28  ;;  %v4567_v4 = vld [vmem:[%s5742_s5] sm:$0xff]   ;;  %v316_v5 = vld [vmem:[%s5742_s5 + $0x8] sm:$0x1]  ;;  %v317_v6 = vld [vmem:[%s5742_s5 + $0xc] sm:$0xff]   ;;  %s5941_s19 = scalar_lea.vmem %s6886_s2, %s5615_s28 }
  0x15   : > { %v4563_v7 = vld [vmem:[%s286_s8] sm:$0xff]   ;;  %v305_v8 = vld [vmem:[%s286_s8 + $0x8] sm:$0x1]  ;;  %v4568_v9 = vunpack.c.l.bf16 %v4567_v4  ;;  %v4569_v10 = vunpack.c.h.bf16 %v4567_v4  ;;  %v364_v11 = vunpack.c.l.bf16 %v316_v5  ;;  %v365_v12 = vunpack.c.l.bf16 %v317_v6  ;;  %v319_v13 = vld [vmem:[%s5742_s5 + $0x14] sm:$0x1] }
  0x16   : > { %v4564_v14 = vunpack.c.l.bf16 %v4563_v7  ;;  %v4565_v15 = vunpack.c.h.bf16 %v4563_v7  ;;  %v308_v16 = vunpack.c.l.bf16 %v305_v8  ;;  %v366_v17 = vunpack.c.h.bf16 %v317_v6  ;;  %v4602_v18 = vld [vmem:[%s5742_s5 + $0x18] sm:$0xff]   ;;  %v322_v19 = vld [vmem:[%s5742_s5 + $0x20] sm:$0x1]  ;;  %v323_v20 = vld [vmem:[%s5742_s5 + $0x24] sm:$0xff]  }
  0x17   : > { %411 = vst.msk [vmem:[#allocation2 + $0x18] sm:$0xff] %vm309_vm1, %v4568_v9  ;;  %412 = vst.msk [vmem:[#allocation2 + $0x20] sm:$0xff] %vm309_vm1, %v4569_v10  ;;  %v367_v21 = vunpack.c.l.bf16 %v319_v13  ;;  %v4572_v22 = vunpack.c.l.bf16 %v4602_v18  ;;  %v4573_v23 = vunpack.c.h.bf16 %v4602_v18  ;;  %v370_v24 = vunpack.c.l.bf16 %v322_v19  ;;  %v325_v25 = vld [vmem:[%s5742_s5 + $0x2c] sm:$0x1]  ;;  %v4603_v26 = vld [vmem:[%s5742_s5 + $0x30] sm:$0xff]  }
  0x18   : > { %413 = vst.msk [vmem:[#allocation2 + $0x28] sm:$0x3] %vm312_vm2, %v364_v11  ;;  %v328_v27 = vld [vmem:[%s5742_s5 + $0x38] sm:$0x1]  ;;  %313 = vst.msk [vmem:[#allocation2 + $0x10] sm:$0x3] %vm312_vm2, %v308_v16  ;;  %v371_v28 = vunpack.c.l.bf16 %v323_v20  ;;  %v372_v29 = vunpack.c.h.bf16 %v323_v20  ;;  %v373_v30 = vunpack.c.l.bf16 %v325_v25  ;;  %v4576_v31 = vunpack.c.l.bf16 %v4603_v26 }
  0x19   : > { %414 = vst.msk [vmem:[#allocation2 + $0x30] sm:$0xff] %vm309_vm1, %v365_v12  ;;  %310 = vst.msk [vmem:[#allocation2] sm:$0xff] %vm309_vm1, %v4564_v14  ;;  %v329_v32 = vld [vmem:[%s5742_s5 + $0x3c] sm:$0xff]   ;;  %v331_v33 = vld [vmem:[%s5742_s5 + $0x44] sm:$0x1]  ;;  %v4577_v35 = vunpack.c.h.bf16 %v4603_v26  ;;  %v376_v36 = vunpack.c.l.bf16 %v328_v27 }
  0x1a   : > { %311 = vst.msk [vmem:[#allocation2 + $0x8] sm:$0xff] %vm309_vm1, %v4565_v15  ;;  %415 = vst.msk [vmem:[#allocation2 + $0x38] sm:$0xff] %vm309_vm1, %v366_v17  ;;  %v4604_v34 = vld [vmem:[%s5742_s5 + $0x48] sm:$0xff]   ;;  %v377_v37 = vunpack.c.l.bf16 %v329_v32  ;;  %v378_v38 = vunpack.c.h.bf16 %v329_v32  ;;  %v334_v39 = vld [vmem:[%s5742_s5 + $0x50] sm:$0x1]  ;;  %v379_v42 = vunpack.c.l.bf16 %v331_v33 }
  0x1b   : > { %416 = vst.msk [vmem:[#allocation2 + $0x40] sm:$0x3] %vm312_vm2, %v367_v21  ;;  %419 = vst.msk [vmem:[#allocation2 + $0x58] sm:$0x3] %vm312_vm2, %v370_v24  ;;  %v335_v40 = vld [vmem:[%s5742_s5 + $0x54] sm:$0xff]   ;;  %v4580_v43 = vunpack.c.l.bf16 %v4604_v34  ;;  %v4581_v44 = vunpack.c.h.bf16 %v4604_v34  ;;  %v382_v45 = vunpack.c.l.bf16 %v334_v39  ;;  %v4605_v46 = vld [vmem:[%s5742_s5 + $0x60] sm:$0xff]  }
  0x1c   : > { %417 = vst.msk [vmem:[#allocation2 + $0x48] sm:$0xff] %vm309_vm1, %v4572_v22  ;;  %418 = vst.msk [vmem:[#allocation2 + $0x50] sm:$0xff] %vm309_vm1, %v4573_v23  ;;  %v337_v41 = vld [vmem:[%s5742_s5 + $0x5c] sm:$0x1]  ;;  %v340_v47 = vld [vmem:[%s5742_s5 + $0x68] sm:$0x1]  ;;  %v383_v49 = vunpack.c.l.bf16 %v335_v40  ;;  %v384_v50 = vunpack.c.h.bf16 %v335_v40  ;;  %v4584_v52 = vunpack.c.l.bf16 %v4605_v46  ;;  %v4585_v56 = vunpack.c.h.bf16 %v4605_v46 }
  0x1d   : > { %420 = vst.msk [vmem:[#allocation2 + $0x60] sm:$0xff] %vm309_vm1, %v371_v28  ;;  %421 = vst.msk [vmem:[#allocation2 + $0x68] sm:$0xff] %vm309_vm1, %v372_v29  ;;  %v341_v48 = vld [vmem:[%s5742_s5 + $0x6c] sm:$0xff]   ;;  %v385_v51 = vunpack.c.l.bf16 %v337_v41  ;;  %v343_v53 = vld [vmem:[%s5742_s5 + $0x74] sm:$0x1]  ;;  %v388_v57 = vunpack.c.l.bf16 %v340_v47 }
  0x1e   : > { %422 = vst.msk [vmem:[#allocation2 + $0x70] sm:$0x3] %vm312_vm2, %v373_v30  ;;  %425 = vst.msk [vmem:[#allocation2 + $0x88] sm:$0x3] %vm312_vm2, %v376_v36  ;;  %v4606_v54 = vld [vmem:[%s5742_s5 + $0x78] sm:$0xff]   ;;  %v389_v58 = vunpack.c.l.bf16 %v341_v48  ;;  %v390_v59 = vunpack.c.h.bf16 %v341_v48  ;;  %v347_v60 = vld [vmem:[%s5742_s5 + $0x84] sm:$0xff]   ;;  %v391_v63 = vunpack.c.l.bf16 %v343_v53 }
  0x1f   : > { %423 = vst.msk [vmem:[#allocation2 + $0x78] sm:$0xff] %vm309_vm1, %v4576_v31  ;;  %424 = vst.msk [vmem:[#allocation2 + $0x80] sm:$0xff] %vm309_vm1, %v4577_v35  ;;  %v346_v55 = vld [vmem:[%s5742_s5 + $0x80] sm:$0x1]  ;;  %v349_v61 = vld [vmem:[%s5742_s5 + $0x8c] sm:$0x1]  ;;  %v4588_v0 = vunpack.c.l.bf16 %v4606_v54  ;;  %v4589_v4 = vunpack.c.h.bf16 %v4606_v54  ;;  %v395_v11 = vunpack.c.l.bf16 %v347_v60  ;;  %v396_v12 = vunpack.c.h.bf16 %v347_v60 }
  0x20   : > { %426 = vst.msk [vmem:[#allocation2 + $0x90] sm:$0xff] %vm309_vm1, %v377_v37  ;;  %427 = vst.msk [vmem:[#allocation2 + $0x98] sm:$0xff] %vm309_vm1, %v378_v38  ;;  %v4607_v62 = vld [vmem:[%s5742_s5 + $0x90] sm:$0xff]   ;;  %v394_v5 = vunpack.c.l.bf16 %v346_v55  ;;  %v352_v6 = vld [vmem:[%s5742_s5 + $0x98] sm:$0x1]  ;;  %v397_v13 = vunpack.c.l.bf16 %v349_v61 }
  0x21   : > { %428 = vst.msk [vmem:[#allocation2 + $0xa0] sm:$0x3] %vm312_vm2, %v379_v42  ;;  %431 = vst.msk [vmem:[#allocation2 + $0xb8] sm:$0x3] %vm312_vm2, %v382_v45  ;;  %v353_v7 = vld [vmem:[%s5742_s5 + $0x9c] sm:$0xff]   ;;  %v4592_v14 = vunpack.c.l.bf16 %v4607_v62  ;;  %v503_v16 = vld [vmem:[#allocation2 + $0x9] sm:$0xff]  ;;  %v4593_v17 = vunpack.c.h.bf16 %v4607_v62  ;;  %v400_v18 = vunpack.c.l.bf16 %v352_v6 }
  0x22   : > { %429 = vst.msk [vmem:[#allocation2 + $0xa8] sm:$0xff] %vm309_vm1, %v4580_v43  ;;  %430 = vst.msk [vmem:[#allocation2 + $0xb0] sm:$0xff] %vm309_vm1, %v4581_v44  ;;  %v355_v8 = vld [vmem:[%s5742_s5 + $0xa4] sm:$0x1]  ;;  %v1965_v9 = vld [vmem:[#allocation2 + $0x19] sm:$0xff]  ;;  %v401_v19 = vunpack.c.l.bf16 %v353_v7  ;;  %v402_v20 = vunpack.c.h.bf16 %v353_v7 }
  0x23   : > { %432 = vst.msk [vmem:[#allocation2 + $0xc0] sm:$0xff] %vm309_vm1, %v383_v49  ;;  %433 = vst.msk [vmem:[#allocation2 + $0xc8] sm:$0xff] %vm309_vm1, %v384_v50  ;;  %v1966_v10 = vld [vmem:[#allocation2 + $0x21] sm:$0xff]  ;;  %5108 = vmatprep.mubr.msk.f32.mxu0 %vm309_vm1, %v1965_v9  ;;  %v5816_v21 = vld [vmem:[#allocation2 + $0x31] sm:$0xff]  ;;  %v403_v23 = vunpack.c.l.bf16 %v355_v8 }
  0x24   : > { %434 = vst.msk [vmem:[#allocation2 + $0xd0] sm:$0x3] %vm312_vm2, %v385_v51  ;;  %437 = vst.msk [vmem:[#allocation2 + $0xe8] sm:$0x3] %vm312_vm2, %v388_v57  ;;  %v502_v15 = vld [vmem:[#allocation2 + $0x1] sm:$0xff]  ;;  %5109 = vmatmul.mubr.msk.f32.vlgmr.msra.gmra.mrb[0].mxu0 %vm309_vm1, %v1966_v10  ;;  %v5830_v24 = vld [vmem:[#allocation2 + $0x39] sm:$0xff] }
  0x25   : > { %435 = vst.msk [vmem:[#allocation2 + $0xd8] sm:$0xff] %vm309_vm1, %v4584_v52  ;;  %436 = vst.msk [vmem:[#allocation2 + $0xe0] sm:$0xff] %vm309_vm1, %v4585_v56  ;;  %4908 = vmatprep.mubr.msk.f32.mxu1 %vm309_vm1, %v502_v15  ;;  %v5821_v22 = vld [vmem:[%s6887_s3 + $0x18] sm:$0xf]  ;;  %5157 = vmatpush3.msk.msra.mxu0 %vm632_vm0, %v5726_v3  ;;  %v5839_v25 = vld [vmem:[%s6887_s3 + $0x8] sm:$0xf] }
  0x26   : > { %438 = vst.msk [vmem:[#allocation2 + $0xf0] sm:$0xff] %vm309_vm1, %v389_v58  ;;  %439 = vst.msk [vmem:[#allocation2 + $0xf8] sm:$0xff] %vm309_vm1, %v390_v59  ;;  %4909 = vmatmul.mubr.msk.f32.vlgmr.msra.gmra.mrb[0].mxu1 %vm309_vm1, %v503_v16  ;;  %v5844_v3 = vld [vmem:[#allocation2 + $0x49] sm:$0xff]  ;;  %5111 = vmatprep.mubr.msk.f32.mxu0 %vm309_vm1, %v5816_v21  ;;  %v5862_v26 = vld [vmem:[#allocation2 + $0x61] sm:$0xff] }
  0x27   : > { %440 = vst.msk [vmem:[#allocation2 + $0x100] sm:$0x3] %vm312_vm2, %v391_v63  ;;  %443 = vst.msk [vmem:[#allocation2 + $0x118] sm:$0x3] %vm312_vm2, %v394_v5  ;;  %4957 = vmatpush3.msk.msra.mxu1 %vm632_vm0, %v5721_v2  ;;  %4911 = vmatprep.mubr.msk.f32.mxu1 %vm309_vm1, %v1965_v9  ;;  %v5858_v2 = vld [vmem:[#allocation2 + $0x51] sm:$0xff]  ;;  %v5870_v27 = vld [vmem:[#allocation2 + $0x69] sm:$0xff] }
  0x28   : > { %441 = vst.msk [vmem:[#allocation2 + $0x108] sm:$0xff] %vm309_vm1, %v4588_v0  ;;  %442 = vst.msk [vmem:[#allocation2 + $0x110] sm:$0xff] %vm309_vm1, %v4589_v4  ;;  %5206 = vmatprep.subr.msk.mxu0 %vm632_vm0, %v5821_v22  ;;  %5112 = vmatmul.mubr.msk.f32.gmra.mrb[2].mxu0 %vm309_vm1, %v5830_v24  ;;  %v5874_v28 = vld [vmem:[#allocation2 + $0x79] sm:$0xff]  ;;  %v4608_v29 = vld [vmem:[%s5742_s5 + $0xa8] sm:$0xff]  }
  0x29   : > { %444 = vst.msk [vmem:[#allocation2 + $0x120] sm:$0xff] %vm309_vm1, %v395_v11  ;;  %445 = vst.msk [vmem:[#allocation2 + $0x128] sm:$0xff] %vm309_vm1, %v396_v12  ;;  %5006 = vmatprep.subr.msk.mxu1 %vm632_vm0, %v5839_v25  ;;  %5114 = vmatprep.mubr.msk.f32.mxu0 %vm309_vm1, %v5844_v3  ;;  %v5883_v30 = vld [vmem:[#allocation2 + $0x81] sm:$0xff]  ;;  %v4596_v31 = vunpack.c.l.bf16 %v4608_v29  ;;  %v4597_v32 = vunpack.c.h.bf16 %v4608_v29  ;;  %v358_v33 = vld [vmem:[%s5742_s5 + $0xb0] sm:$0x1] }
  0x2a   : > { %446 = vst.msk [vmem:[#allocation2 + $0x130] sm:$0x3] %vm312_vm2, %v397_v13  ;;  %449 = vst.msk [vmem:[#allocation2 + $0x148] sm:$0x3] %vm312_vm2, %v400_v18  ;;  %4912 = vmatmul.mubr.msk.f32.gmra.mrb[2].mxu1 %vm309_vm1, %v1966_v10  ;;  %v5888_v34 = vld [vmem:[#allocation2 + $0x91] sm:$0xff]  ;;  %v406_v35 = vunpack.c.l.bf16 %v358_v33  ;;  %v5899_v36 = vld [vmem:[#allocation2 + $0x99] sm:$0xff] }
  0x2b   : > { %447 = vst.msk [vmem:[#allocation2 + $0x138] sm:$0xff] %vm309_vm1, %v4592_v14  ;;  %448 = vst.msk [vmem:[#allocation2 + $0x140] sm:$0xff] %vm309_vm1, %v4593_v17  ;;  %4914 = vmatprep.mubr.msk.f32.mxu1 %vm309_vm1, %v5816_v21  ;;  %v5903_v37 = vld [vmem:[#allocation2 + $0xa9] sm:$0xff]  ;;  %v5911_v38 = vld [vmem:[#allocation2 + $0xb1] sm:$0xff] }
  0x2c   : > { %450 = vst.msk [vmem:[#allocation2 + $0x150] sm:$0xff] %vm309_vm1, %v401_v19  ;;  %451 = vst.msk [vmem:[#allocation2 + $0x158] sm:$0xff] %vm309_vm1, %v402_v20  ;;  %5115 = vmatmul.mubr.msk.f32.gmra.mrb[4].mxu0 %vm309_vm1, %v5858_v2  ;;  %v5915_v39 = vld [vmem:[#allocation2 + $0xc1] sm:$0xff]  ;;  %v359_v40 = vld [vmem:[%s5742_s5 + $0xb4] sm:$0xff]  }
  0x2d   : > { %452 = vst.msk [vmem:[#allocation2 + $0x160] sm:$0x3] %vm312_vm2, %v403_v23  ;;  %5117 = vmatprep.mubr.msk.f32.mxu0 %vm309_vm1, %v5862_v26  ;;  %455 = vst.msk [vmem:[#allocation2 + $0x178] sm:$0x3] %vm312_vm2, %v406_v35  ;;  %v5924_v41 = vld [vmem:[#allocation2 + $0xc9] sm:$0xff]  ;;  %v407_v42 = vunpack.c.l.bf16 %v359_v40  ;;  %v408_v43 = vunpack.c.h.bf16 %v359_v40  ;;  %v5929_v45 = vld [vmem:[#allocation2 + $0x1a] sm:$0xff] }
  0x2e   : > { %4915 = vmatmul.mubr.msk.f32.gmra.mrb[4].mxu1 %vm309_vm1, %v5830_v24  ;;  %453 = vst.msk [vmem:[#allocation2 + $0x168] sm:$0xff] %vm309_vm1, %v4596_v31  ;;  %454 = vst.msk [vmem:[#allocation2 + $0x170] sm:$0xff] %vm309_vm1, %v4597_v32  ;;  %v361_v44 = vld [vmem:[%s5742_s5 + $0xbc] sm:$0x1]  ;;  %v5947_v47 = vld [vmem:[#allocation2 + $0x22] sm:$0xff] }
  0x2f   : > { %4917 = vmatprep.mubr.msk.f32.mxu1 %vm309_vm1, %v5844_v3  ;;  %v409_v46 = vunpack.c.l.bf16 %v361_v44  ;;  %456 = vst.msk [vmem:[#allocation2 + $0x180] sm:$0xff] %vm309_vm1, %v407_v42  ;;  %457 = vst.msk [vmem:[#allocation2 + $0x188] sm:$0xff] %vm309_vm1, %v408_v43  ;;  %v5951_v48 = vld [vmem:[#allocation2 + $0xd9] sm:$0xff]  ;;  %v5973_v55 = vld [vmem:[#allocation2 + $0xe1] sm:$0xff] }
  0x30   : > { %5118 = vmatmul.mubr.msk.f32.gmra.mrb[6].mxu0 %vm309_vm1, %v5870_v27  ;;  %v5953_v49 = vld [vmem:[#allocation2 + $0x32] sm:$0xff]  ;;  %v4599_v50 = vld [vmem:[%s5941_s19] sm:$0xff]   ;;  %v5961_v51 = vld [vmem:[%s6887_s3 + $0x1c] sm:$0xf] }
  0x31   : > { %5120 = vmatprep.mubr.msk.f32.mxu0 %vm309_vm1, %v5874_v28  ;;  %458 = vst.msk [vmem:[#allocation2 + $0x190] sm:$0x3] %vm312_vm2, %v409_v46  ;;  %v4600_v52 = vunpack.c.l.bf16 %v4599_v50  ;;  %v4601_v53 = vunpack.c.h.bf16 %v4599_v50  ;;  %v5967_v54 = vld [vmem:[#allocation2 + $0x3a] sm:$0xff]  ;;  %v5975_v56 = vld [vmem:[#allocation2 + $0x4a] sm:$0xff]  ;;  %v5989_v58 = vld [vmem:[#allocation2 + $0x52] sm:$0xff] }
  0x32   : > { %4918 = vmatmul.mubr.msk.f32.gmra.mrb[6].mxu1 %vm309_vm1, %v5858_v2  ;;  %v5979_v57 = vld [vmem:[#allocation2 + $0xf1] sm:$0xff]  ;;  %v5993_v59 = vld [vmem:[#allocation2 + $0xf9] sm:$0xff]  ;;  %v5995_v60 = vld [vmem:[#allocation2 + $0x62] sm:$0xff] }
  0x33   : > { %4920 = vmatprep.mubr.msk.f32.mxu1 %vm309_vm1, %v5862_v26  ;;  %466 = vst.msk [vmem:[#allocation2 + $0x198] sm:$0xff] %vm309_vm1, %v4600_v52  ;;  %467 = vst.msk [vmem:[#allocation2 + $0x1a0] sm:$0xff] %vm309_vm1, %v4601_v53  ;;  %v5997_v61 = vld [vmem:[#allocation2 + $0x109] sm:$0xff]  ;;  %v6009_v63 = vld [vmem:[#allocation2 + $0x111] sm:$0xff] }
  0x34   : > { %5121 = vmatmul.mubr.msk.f32.gmra.mrb[8].mxu0 %vm309_vm1, %v5883_v30  ;;  %6931 = vst [vmem:[#allocation3_spill] sm:$0xff] %v5979_v57  ;;  %6932 = vst [vmem:[#allocation4_spill] sm:$0xff] %v5993_v59  ;;  %v6005_v62 = vld [vmem:[#allocation2 + $0x6a] sm:$0xff]  ;;  %v6011_v0 = vld [vmem:[#allocation2 + $0x7a] sm:$0xff] }
  0x35   : > { %5123 = vmatprep.mubr.msk.f32.mxu0 %vm309_vm1, %v5888_v34  ;;  %6933 = vst [vmem:[#allocation5_spill] sm:$0xff] %v5997_v61  ;;  %6934 = vst [vmem:[#allocation6_spill] sm:$0xff] %v6009_v63  ;;  %v6013_v4 = vld [vmem:[#allocation2 + $0x121] sm:$0xff]  ;;  %v6025_v6 = vld [vmem:[#allocation2 + $0x129] sm:$0xff] }
  0x36   : > { %4921 = vmatmul.mubr.msk.f32.gmra.mrb[8].mxu1 %vm309_vm1, %v5870_v27  ;;  %6935 = vst [vmem:[#allocation7_spill] sm:$0xff] %v6013_v4  ;;  %v6021_v5 = vld [vmem:[#allocation2 + $0x82] sm:$0xff]  ;;  %6936 = vst [vmem:[#allocation8_spill] sm:$0xff] %v6025_v6  ;;  %v6027_v7 = vld [vmem:[#allocation2 + $0x92] sm:$0xff] }
  0x37   : > { %4923 = vmatprep.mubr.msk.f32.mxu1 %vm309_vm1, %v5874_v28  ;;  %v6029_v8 = vld [vmem:[#allocation2 + $0x139] sm:$0xff]  ;;  %v6041_v10 = vld [vmem:[#allocation2 + $0x141] sm:$0xff]  ;;  %v6043_v11 = vld [vmem:[#allocation2 + $0xaa] sm:$0xff] }
  0x38   : > { %5124 = vmatmul.mubr.msk.f32.gmra.mrb[10].mxu0 %vm309_vm1, %v5899_v36  ;;  %6937 = vst [vmem:[#allocation9_spill] sm:$0xff] %v6029_v8  ;;  %v6037_v9 = vld [vmem:[#allocation2 + $0x9a] sm:$0xff]  ;;  %6938 = vst [vmem:[#allocation10_spill] sm:$0xff] %v6041_v10  ;;  %v6045_v12 = vld [vmem:[#allocation2 + $0x151] sm:$0xff] }
  0x39   : > { %5126 = vmatprep.mubr.msk.f32.mxu0 %vm309_vm1, %v5903_v37  ;;  %6939 = vst [vmem:[#allocation11_spill] sm:$0xff] %v6045_v12  ;;  %v6053_v13 = vld [vmem:[#allocation2 + $0xb2] sm:$0xff]  ;;  %v6059_v15 = vld [vmem:[#allocation2 + $0xc2] sm:$0xff]  ;;  %v6069_v17 = vld [vmem:[#allocation2 + $0xca] sm:$0xff] }
  0x3a   : > { %4924 = vmatmul.mubr.msk.f32.gmra.mrb[10].mxu1 %vm309_vm1, %v5883_v30  ;;  %v6057_v14 = vld [vmem:[#allocation2 + $0x159] sm:$0xff]  ;;  %v6061_v16 = vld [vmem:[#allocation2 + $0x169] sm:$0xff]  ;;  %v6073_v18 = vld [vmem:[#allocation2 + $0x171] sm:$0xff] }
  0x3b   : > { %4926 = vmatprep.mubr.msk.f32.mxu1 %vm309_vm1, %v5888_v34  ;;  %6940 = vst [vmem:[#allocation12_spill] sm:$0xff] %v6057_v14  ;;  %6941 = vst [vmem:[#allocation13_spill] sm:$0xff] %v6061_v16  ;;  %v6075_v19 = vld [vmem:[#allocation2 + $0xda] sm:$0xff]  ;;  %v470_v23 = vld [vmem:[#allocation2 + $0x8] sm:$0xff] }
  0x3c   : > { %5127 = vmatmul.mubr.msk.f32.gmra.mrb[12].mxu0 %vm309_vm1, %v5911_v38  ;;  %6942 = vst [vmem:[#allocation14_spill] sm:$0xff] %v6073_v18  ;;  %v469_v20 = vld [vmem:[#allocation2] sm:$0xff]  ;;  %v6086_v29 = vld [vmem:[#allocation2 + $0xf2] sm:$0xff]  ;;  %v6095_v32 = vld [vmem:[%s6887_s3 + $0xc] sm:$0xf] }
  0x3d   : > { %5129 = vmatprep.mubr.msk.f32.mxu0 %vm309_vm1, %v5915_v39  ;;  %v6088_v31 = vld [vmem:[#allocation2 + $0x18] sm:$0xff]  ;;  %v6106_v35 = vld [vmem:[#allocation2 + $0x20] sm:$0xff]  ;;  %v6108_v40 = vld [vmem:[#allocation2 + $0x10a] sm:$0xff] }
  0x3e   : > { %4927 = vmatmul.mubr.msk.f32.gmra.mrb[12].mxu1 %vm309_vm1, %v5899_v36  ;;  %6943 = vst [vmem:[#allocation15_spill] sm:$0xff] %v6088_v31  ;;  %v6100_v33 = vld [vmem:[#allocation2 + $0xfa] sm:$0xff]  ;;  %6944 = vst [vmem:[#allocation16_spill] sm:$0xff] %v6106_v35  ;;  %v6110_v42 = vld [vmem:[#allocation2 + $0x30] sm:$0xff] }
  0x3f   : > { %4929 = vmatprep.mubr.msk.f32.mxu1 %vm309_vm1, %v5903_v37  ;;  %6945 = vst [vmem:[#allocation17_spill] sm:$0xff] %v6110_v42  ;;  %v6124_v43 = vld [vmem:[#allocation2 + $0x38] sm:$0xff]  ;;  %v6126_v44 = vld [vmem:[#allocation2 + $0x122] sm:$0xff]  ;;  %v6136_v50 = vld [vmem:[#allocation2 + $0x12a] sm:$0xff] }
  0x40   : > { %5130 = vmatmul.mubr.msk.f32.gmra.mrb[14].mxu0 %vm309_vm1, %v5924_v41  ;;  %6946 = vst [vmem:[#allocation18_spill] sm:$0xff] %v6124_v43  ;;  %v6128_v46 = vld [vmem:[#allocation2 + $0x48] sm:$0xff]  ;;  %v6140_v52 = vld [vmem:[#allocation2 + $0x50] sm:$0xff]  ;;  %v6142_v53 = vld [vmem:[#allocation2 + $0x13a] sm:$0xff] }
  0x41   : > { %5158 = vmatprep.mubr.msk.f32.mxu0 %vm309_vm1, %v5929_v45  ;;  %6947 = vst [vmem:[#allocation19_spill] sm:$0xff] %v6128_v46  ;;  %6948 = vst [vmem:[#allocation20_spill] sm:$0xff] %v6140_v52 }
  0x42   : > { %4930 = vmatmul.mubr.msk.f32.gmra.mrb[14].mxu1 %vm309_vm1, %v5911_v38 }
  0x43   : > { %4932 = vmatprep.mubr.msk.f32.mxu1 %vm309_vm1, %v5915_v39 }
  0x44   : > { %5159 = vmatmul.mubr.msk.f32.vlgmr.msra.gmra.mrb[0].mxu0 %vm309_vm1, %v5947_v47 }
  0x45   : > { %5207 = vmatpush3.msk.msra.mxu0 %vm632_vm0, %v5821_v22  ;;  %5161 = vmatprep.mubr.msk.f32.mxu0 %vm309_vm1, %v5953_v49  ;;  %v6083_v22 = vld [vmem:[#allocation2 + $0xe2] sm:$0xff] }
  0x46   : > { %4933 = vmatmul.mubr.msk.f32.gmra.mrb[16].mxu1 %vm309_vm1, %v5924_v41  ;;  %5256 = vmatprep.subr.msk.mxu0 %vm632_vm0, %v5961_v51 }
  0x47   : > { %4935 = vmatprep.mubr.msk.f32.mxu1 %vm309_vm1, %v5951_v48 }
  0x48   : > { %5162 = vmatmul.mubr.msk.f32.gmra.mrb[2].mxu0 %vm309_vm1, %v5967_v54 }
  0x49   : > { %5164 = vmatprep.mubr.msk.f32.mxu0 %vm309_vm1, %v5975_v56 }
  0x4a   : > { %4936 = vmatmul.mubr.msk.f32.gmra.mrb[18].mxu1 %vm309_vm1, %v5973_v55 }
  0x4b   : > { %4938 = vmatprep.mubr.msk.f32.mxu1 %vm309_vm1, %v5979_v57  ;;  %v6208_v57 = vld [vmem:[#allocation2 + $0xc0] sm:$0xff] }
  0x4c   : > { %5165 = vmatmul.mubr.msk.f32.gmra.mrb[4].mxu0 %vm309_vm1, %v5989_v58  ;;  %6960 = vst [vmem:[#allocation32_spill] sm:$0xff] %v6208_v57 }
  0x4d   : > { %5167 = vmatprep.mubr.msk.f32.mxu0 %vm309_vm1, %v5995_v60 }
  0x4e   : > { %4939 = vmatmul.mubr.msk.f32.gmra.mrb[20].mxu1 %vm309_vm1, %v5993_v59  ;;  %v6192_v59 = vld [vmem:[#allocation2 + $0x182] sm:$0xff] }
  0x4f   : > { %4941 = vmatprep.mubr.msk.f32.mxu1 %vm309_vm1, %v5997_v61  ;;  %v6185_v61 = vld [vmem:[#allocation2 + $0x172] sm:$0xff]  ;;  %6956 = vst [vmem:[#allocation28_spill] sm:$0xff] %v6192_v59 }
  0x50   : > { %5168 = vmatmul.mubr.msk.f32.gmra.mrb[6].mxu0 %vm309_vm1, %v6005_v62  ;;  %6954 = vst [vmem:[#allocation26_spill] sm:$0xff] %v6185_v61 }
  0x51   : > { %5170 = vmatprep.mubr.msk.f32.mxu0 %vm309_vm1, %v6011_v0 }
  0x52   : > { %4942 = vmatmul.mubr.msk.f32.gmra.mrb[22].mxu1 %vm309_vm1, %v6009_v63 }
  0x53   : > { %4944 = vmatprep.mubr.msk.f32.mxu1 %vm309_vm1, %v6013_v4  ;;  %v6177_v4 = vld [vmem:[#allocation2 + $0x90] sm:$0xff] }
  0x54   : > { %5171 = vmatmul.mubr.msk.f32.gmra.mrb[8].mxu0 %vm309_vm1, %v6021_v5  ;;  %6953 = vst [vmem:[#allocation25_spill] sm:$0xff] %v6177_v4 }
  0x55   : > { %5173 = vmatprep.mubr.msk.f32.mxu0 %vm309_vm1, %v6027_v7 }
  0x56   : > { %4945 = vmatmul.mubr.msk.f32.gmra.mrb[24].mxu1 %vm309_vm1, %v6025_v6  ;;  %v461_v6 = vld [vmem:[%s5941_s19 + $0x8] sm:$0x1] }
  0x57   : > { %4947 = vmatprep.mubr.msk.f32.mxu1 %vm309_vm1, %v6029_v8  ;;  %v6174_v8 = vld [vmem:[#allocation2 + $0x16a] sm:$0xff]  ;;  %v464_v63 = vunpack.c.l.bf16 %v461_v6 }
  0x58   : > { %5174 = vmatmul.mubr.msk.f32.gmra.mrb[10].mxu0 %vm309_vm1, %v6037_v9  ;;  %v6194_v6 = vld [vmem:[#allocation2 + $0xa8] sm:$0xff] }
  0x59   : > { %5176 = vmatprep.mubr.msk.f32.mxu0 %vm309_vm1, %v6043_v11  ;;  %468 = vst.msk [vmem:[#allocation2 + $0x1a8] sm:$0x3] %vm312_vm2, %v464_v63  ;;  %6957 = vst [vmem:[#allocation29_spill] sm:$0xff] %v6194_v6  ;;  %v6206_v63 = vld [vmem:[#allocation2 + $0xb0] sm:$0xff] }
  0x5a   : > { %4948 = vmatmul.mubr.msk.f32.gmra.mrb[26].mxu1 %vm309_vm1, %v6041_v10  ;;  %v6172_v10 = vld [vmem:[#allocation2 + $0x80] sm:$0xff]  ;;  %6959 = vst [vmem:[#allocation31_spill] sm:$0xff] %v6206_v63 }
  0x5b   : > { %4950 = vmatprep.mubr.msk.f32.mxu1 %vm309_vm1, %v6045_v12  ;;  %v6168_v12 = vld [vmem:[#allocation2 + $0x15a] sm:$0xff]  ;;  %6952 = vst [vmem:[#allocation24_spill] sm:$0xff] %v6172_v10 }
  0x5c   : > { %5177 = vmatmul.mubr.msk.f32.gmra.mrb[12].mxu0 %vm309_vm1, %v6053_v13 }
  0x5d   : > { %5179 = vmatprep.mubr.msk.f32.mxu0 %vm309_vm1, %v6059_v15 }
  0x5e   : > { %4951 = vmatmul.mubr.msk.f32.gmra.mrb[28].mxu1 %vm309_vm1, %v6057_v14  ;;  %v6160_v14 = vld [vmem:[#allocation2 + $0x78] sm:$0xff] }
  0x5f   : > { %4953 = vmatprep.mubr.msk.f32.mxu1 %vm309_vm1, %v6061_v16  ;;  %v6158_v16 = vld [vmem:[#allocation2 + $0x152] sm:$0xff]  ;;  %6951 = vst [vmem:[#allocation23_spill] sm:$0xff] %v6160_v14 }
  0x60   : > { %5180 = vmatmul.mubr.msk.f32.gmra.mrb[14].mxu0 %vm309_vm1, %v6069_v17 }
  0x61   : > { %5182 = vmatprep.mubr.msk.f32.mxu0 %vm309_vm1, %v6075_v19 }
  0x62   : > { %4954 = vmatmul.mubr.msk.f32.gmra.mrb[30].mxu1 %vm309_vm1, %v6073_v18  ;;  %v6156_v18 = vld [vmem:[#allocation2 + $0x68] sm:$0xff] }
  0x63   : > { %4958 = vmatprep.mubr.msk.f32.mxu1 %vm309_vm1, %v469_v20  ;;  %v6144_v20 = vld [vmem:[#allocation2 + $0x60] sm:$0xff]  ;;  %6950 = vst [vmem:[#allocation22_spill] sm:$0xff] %v6156_v18 }
  0x64   : > { %5183 = vmatmul.mubr.msk.f32.gmra.mrb[16].mxu0 %vm309_vm1, %v6083_v22  ;;  %6949 = vst [vmem:[#allocation21_spill] sm:$0xff] %v6144_v20 }
  0x65   : > { %5185 = vmatprep.mubr.msk.f32.mxu0 %vm309_vm1, %v6086_v29 }
  0x66   : > { %4959 = vmatmul.mubr.msk.f32.vlgmr.msra.gmra.mrb[0].mxu1 %vm309_vm1, %v470_v23  ;;  %v6152_v23 = vld [vmem:[#allocation2 + $0x142] sm:$0xff] }
  0x67   : > { %5007 = vmatpush3.msk.msra.mxu1 %vm632_vm0, %v5839_v25  ;;  %4961 = vmatprep.mubr.msk.f32.mxu1 %vm309_vm1, %v6088_v31  ;;  %v6120_v25 = vld [vmem:[#allocation2 + $0x112] sm:$0xff]  ;;  %v6202_v31 = vld [vmem:[#allocation2 + $0x18a] sm:$0xff] }
  0x68   : > { %5056 = vmatprep.subr.msk.mxu1 %vm632_vm0, %v6095_v32  ;;  %5186 = vmatmul.mubr.msk.f32.gmra.mrb[18].mxu0 %vm309_vm1, %v6100_v33  ;;  %6958 = vst [vmem:[#allocation30_spill] sm:$0xff] %v6202_v31 }
  0x69   : > { %5188 = vmatprep.mubr.msk.f32.mxu0 %vm309_vm1, %v6108_v40 }
  0x6a   : > { %4962 = vmatmul.mubr.msk.f32.gmra.mrb[2].mxu1 %vm309_vm1, %v6106_v35  ;;  %v6190_v35 = vld [vmem:[#allocation2 + $0x98] sm:$0xff] }
  0x6b   : > { %4964 = vmatprep.mubr.msk.f32.mxu1 %vm309_vm1, %v6110_v42  ;;  %6955 = vst [vmem:[#allocation27_spill] sm:$0xff] %v6190_v35 }
  0x6c   : > { %5189 = vmatmul.mubr.msk.f32.gmra.mrb[20].mxu0 %vm309_vm1, %v6120_v25 }
  0x6d   : > { %5191 = vmatprep.mubr.msk.f32.mxu0 %vm309_vm1, %v6126_v44 }
  0x6e   : > { %4965 = vmatmul.mubr.msk.f32.gmra.mrb[4].mxu1 %vm309_vm1, %v6124_v43 }
  0x6f   : > { %4967 = vmatprep.mubr.msk.f32.mxu1 %vm309_vm1, %v6128_v46 }
  0x70   : > { %5192 = vmatmul.mubr.msk.f32.gmra.mrb[22].mxu0 %vm309_vm1, %v6136_v50 }
  0x71   : > { %5194 = vmatprep.mubr.msk.f32.mxu0 %vm309_vm1, %v6142_v53 }
  0x72   : > { %4968 = vmatmul.mubr.msk.f32.gmra.mrb[6].mxu1 %vm309_vm1, %v6140_v52 }
  0x73   : > { %4970 = vmatprep.mubr.msk.f32.mxu1 %vm309_vm1, %v6144_v20 }
  0x74   : > { %5195 = vmatmul.mubr.msk.f32.gmra.mrb[24].mxu0 %vm309_vm1, %v6152_v23 }
  0x75   : > { %5197 = vmatprep.mubr.msk.f32.mxu0 %vm309_vm1, %v6158_v16 }
  0x76   : > { %4971 = vmatmul.mubr.msk.f32.gmra.mrb[8].mxu1 %vm309_vm1, %v6156_v18 }
  0x77   : > { %4973 = vmatprep.mubr.msk.f32.mxu1 %vm309_vm1, %v6160_v14 }
  0x78   : > { %5198 = vmatmul.mubr.msk.f32.gmra.mrb[26].mxu0 %vm309_vm1, %v6168_v12 }
  0x79   : > { %5200 = vmatprep.mubr.msk.f32.mxu0 %vm309_vm1, %v6174_v8 }
  0x7a   : > { %4974 = vmatmul.mubr.msk.f32.gmra.mrb[10].mxu1 %vm309_vm1, %v6172_v10 }
  0x7b   : > { %4976 = vmatprep.mubr.msk.f32.mxu1 %vm309_vm1, %v6177_v4 }
  0x7c   : > { %5201 = vmatmul.mubr.msk.f32.gmra.mrb[28].mxu0 %vm309_vm1, %v6185_v61  ;;  %v6220_v61 = vld [vmem:[#allocation2 + $0xd8] sm:$0xff] }
  0x7d   : > { %5203 = vmatprep.mubr.msk.f32.mxu0 %vm309_vm1, %v6192_v59  ;;  %v6218_v59 = vld [vmem:[#allocation2 + $0xc8] sm:$0xff] }
  0x7e   : > { %4977 = vmatmul.mubr.msk.f32.gmra.mrb[12].mxu1 %vm309_vm1, %v6190_v35  ;;  %6961 = vst [vmem:[#allocation33_spill] sm:$0xff] %v6218_v59 }
  0x7f   : > { %4979 = vmatprep.mubr.msk.f32.mxu1 %vm309_vm1, %v6194_v6 }
  0x80   : > { %5204 = vmatmul.mubr.msk.f32.gmra.mrb[30].mxu0 %vm309_vm1, %v6202_v31  ;;  %v6227_v31 = vld [vmem:[%s6887_s3 + $0x20] sm:$0xf] }
  0x81   : > { %5208 = vmatprep.mubr.msk.f32.mxu0 %vm309_vm1, %v6110_v42  ;;  %v6237_v42 = vld [vmem:[#allocation2 + $0xe0] sm:$0xff] }
  0x82   : > { %4980 = vmatmul.mubr.msk.f32.gmra.mrb[14].mxu1 %vm309_vm1, %v6206_v63 }
  0x83   : > { %4982 = vmatprep.mubr.msk.f32.mxu1 %vm309_vm1, %v6208_v57 }
  0x84   : > { %5209 = vmatmul.mubr.msk.f32.vlgmr.msra.gmra.mrb[0].mxu0 %vm309_vm1, %v6124_v43  ;;  %v6239_v43 = vld [vmem:[#allocation2 + $0xf0] sm:$0xff] }
  0x85   : > { %5257 = vmatpush3.msk.msra.mxu0 %vm632_vm0, %v5961_v51  ;;  %5211 = vmatprep.mubr.msk.f32.mxu0 %vm309_vm1, %v6128_v46  ;;  %v6251_v51 = vld [vmem:[#allocation2 + $0xf8] sm:$0xff]  ;;  %v6253_v46 = vld [vmem:[#allocation2 + $0x108] sm:$0xff] }
  0x86   : > { %4983 = vmatmul.mubr.msk.f32.gmra.mrb[16].mxu1 %vm309_vm1, %v6218_v59  ;;  %5306 = vmatprep.subr.msk.mxu0 %vm632_vm0, %v6227_v31 }
  0x87   : > { %4985 = vmatprep.mubr.msk.f32.mxu1 %vm309_vm1, %v6220_v61 }
  0x88   : > { %5212 = vmatmul.mubr.msk.f32.gmra.mrb[2].mxu0 %vm309_vm1, %v6140_v52  ;;  %v6265_v52 = vld [vmem:[#allocation2 + $0x120] sm:$0xff] }
  0x89   : > { %5214 = vmatprep.mubr.msk.f32.mxu0 %vm309_vm1, %v6144_v20  ;;  %v6263_v20 = vld [vmem:[#allocation2 + $0x110] sm:$0xff] }
  0x8a   : > { %4986 = vmatmul.mubr.msk.f32.gmra.mrb[18].mxu1 %vm309_vm1, %v6237_v42 }
  0x8b   : > { %4988 = vmatprep.mubr.msk.f32.mxu1 %vm309_vm1, %v6239_v43 }
  0x8c   : > { %5215 = vmatmul.mubr.msk.f32.gmra.mrb[4].mxu0 %vm309_vm1, %v6156_v18  ;;  %v6277_v18 = vld [vmem:[#allocation2 + $0x138] sm:$0xff] }
  0x8d   : > { %5217 = vmatprep.mubr.msk.f32.mxu0 %vm309_vm1, %v6160_v14  ;;  %v6275_v14 = vld [vmem:[#allocation2 + $0x128] sm:$0xff] }
  0x8e   : > { %4989 = vmatmul.mubr.msk.f32.gmra.mrb[20].mxu1 %vm309_vm1, %v6251_v51 }
  0x8f   : > { %4991 = vmatprep.mubr.msk.f32.mxu1 %vm309_vm1, %v6253_v46 }
  0x90   : > { %5218 = vmatmul.mubr.msk.f32.gmra.mrb[6].mxu0 %vm309_vm1, %v6172_v10  ;;  %v6289_v10 = vld [vmem:[#allocation2 + $0x150] sm:$0xff] }
  0x91   : > { %5220 = vmatprep.mubr.msk.f32.mxu0 %vm309_vm1, %v6177_v4  ;;  %v6287_v4 = vld [vmem:[#allocation2 + $0x140] sm:$0xff] }
  0x92   : > { %4992 = vmatmul.mubr.msk.f32.gmra.mrb[22].mxu1 %vm309_vm1, %v6263_v20 }
  0x93   : > { %4994 = vmatprep.mubr.msk.f32.mxu1 %vm309_vm1, %v6265_v52 }
  0x94   : > { %5221 = vmatmul.mubr.msk.f32.gmra.mrb[8].mxu0 %vm309_vm1, %v6190_v35  ;;  %v6301_v35 = vld [vmem:[#allocation2 + $0x168] sm:$0xff] }
  0x95   : > { %5223 = vmatprep.mubr.msk.f32.mxu0 %vm309_vm1, %v6194_v6  ;;  %v6299_v6 = vld [vmem:[#allocation2 + $0x158] sm:$0xff] }
  0x96   : > { %4995 = vmatmul.mubr.msk.f32.gmra.mrb[24].mxu1 %vm309_vm1, %v6275_v14 }
  0x97   : > { %4997 = vmatprep.mubr.msk.f32.mxu1 %vm309_vm1, %v6277_v18 }
  0x98   : > { %5224 = vmatmul.mubr.msk.f32.gmra.mrb[10].mxu0 %vm309_vm1, %v6206_v63  ;;  %v1185_v63 = vld [vmem:[#allocation2 + $0x2] sm:$0xff] }
  0x99   : > { %5226 = vmatprep.mubr.msk.f32.mxu0 %vm309_vm1, %v6208_v57  ;;  %v6311_v57 = vld [vmem:[#allocation2 + $0x170] sm:$0xff] }
  0x9a   : > { %4998 = vmatmul.mubr.msk.f32.gmra.mrb[26].mxu1 %vm309_vm1, %v6287_v4 }
  0x9b   : > { %5000 = vmatprep.mubr.msk.f32.mxu1 %vm309_vm1, %v6289_v10 }
  0x9c   : > { %5227 = vmatmul.mubr.msk.f32.gmra.mrb[12].mxu0 %vm309_vm1, %v6218_v59  ;;  %v1186_v59 = vld [vmem:[#allocation2 + $0xa] sm:$0xff] }
  0x9d   : > { %5229 = vmatprep.mubr.msk.f32.mxu0 %vm309_vm1, %v6220_v61 }
  0x9e   : > { %5001 = vmatmul.mubr.msk.f32.gmra.mrb[28].mxu1 %vm309_vm1, %v6299_v6 }
  0x9f   : > { %5003 = vmatprep.mubr.msk.f32.mxu1 %vm309_vm1, %v6301_v35 }
  0xa0   : > { %5230 = vmatmul.mubr.msk.f32.gmra.mrb[14].mxu0 %vm309_vm1, %v6237_v42 }
  0xa1   : > { %5232 = vmatprep.mubr.msk.f32.mxu0 %vm309_vm1, %v6239_v43 }
  0xa2   : > { %5004 = vmatmul.mubr.msk.f32.gmra.mrb[30].mxu1 %vm309_vm1, %v6311_v57 }
  0xa3   : > { %5008 = vmatprep.mubr.msk.f32.mxu1 %vm309_vm1, %v1185_v63  ;;  %v6980_v63 = vld [vmem:[#allocation23_spill] sm:$0xff] }
  0xa4   : > { %5233 = vmatmul.mubr.msk.f32.gmra.mrb[16].mxu0 %vm309_vm1, %v6251_v51 }
  0xa5   : > { %5235 = vmatprep.mubr.msk.f32.mxu0 %vm309_vm1, %v6253_v46 }
  0xa6   : > { %5009 = vmatmul.mubr.msk.f32.vlgmr.msra.gmra.mrb[0].mxu1 %vm309_vm1, %v1186_v59  ;;  %v2776_v59 = vld [vmem:[#allocation2 + $0x198] sm:$0xff] }
  0xa7   : > { %5057 = vmatpush3.msk.msra.mxu1 %vm632_vm0, %v6095_v32  ;;  %5011 = vmatprep.mubr.msk.f32.mxu1 %vm309_vm1, %v5929_v45  ;;  %v6363_v45 = vld [vmem:[#allocation2 + $0x180] sm:$0xff] }
  0xa8   : > { %5356 = vmatprep.subr.msk.mxu1 %vm632_vm0, %v5713_v1  ;;  %5236 = vmatmul.mubr.msk.f32.gmra.mrb[18].mxu0 %vm309_vm1, %v6263_v20  ;;  %v2777_v32 = vld [vmem:[#allocation2 + $0x1a0] sm:$0xff] }
  0xa9   : > { %5238 = vmatprep.mubr.msk.f32.mxu0 %vm309_vm1, %v6265_v52 }
  0xaa   : > { %5012 = vmatmul.mubr.msk.f32.gmra.mrb[2].mxu1 %vm309_vm1, %v5947_v47  ;;  %v6371_v47 = vld [vmem:[#allocation2 + $0x188] sm:$0xff] }
  0xab   : > { %5014 = vmatprep.mubr.msk.f32.mxu1 %vm309_vm1, %v5953_v49 }
  0xac   : > { %5239 = vmatmul.mubr.msk.f32.gmra.mrb[20].mxu0 %vm309_vm1, %v6275_v14 }
  0xad   : > { %5241 = vmatprep.mubr.msk.f32.mxu0 %vm309_vm1, %v6277_v18 }
  0xae   : > { %5015 = vmatmul.mubr.msk.f32.gmra.mrb[4].mxu1 %vm309_vm1, %v5967_v54 }
  0xaf   : > { %5017 = vmatprep.mubr.msk.f32.mxu1 %vm309_vm1, %v5975_v56 }
  0xb0   : > { %5242 = vmatmul.mubr.msk.f32.gmra.mrb[22].mxu0 %vm309_vm1, %v6287_v4 }
  0xb1   : > { %5244 = vmatprep.mubr.msk.f32.mxu0 %vm309_vm1, %v6289_v10 }
  0xb2   : > { %5018 = vmatmul.mubr.msk.f32.gmra.mrb[6].mxu1 %vm309_vm1, %v5989_v58 }
  0xb3   : > { %5020 = vmatprep.mubr.msk.f32.mxu1 %vm309_vm1, %v5995_v60 }
  0xb4   : > { %5245 = vmatmul.mubr.msk.f32.gmra.mrb[24].mxu0 %vm309_vm1, %v6299_v6 }
  0xb5   : > { %5247 = vmatprep.mubr.msk.f32.mxu0 %vm309_vm1, %v6301_v35 }
  0xb6   : > { %5021 = vmatmul.mubr.msk.f32.gmra.mrb[8].mxu1 %vm309_vm1, %v6005_v62 }
  0xb7   : > { %5023 = vmatprep.mubr.msk.f32.mxu1 %vm309_vm1, %v6011_v0 }
  0xb8   : > { %5248 = vmatmul.mubr.msk.f32.gmra.mrb[26].mxu0 %vm309_vm1, %v6311_v57 }
  0xb9   : > { %5250 = vmatprep.mubr.msk.f32.mxu0 %vm309_vm1, %v6363_v45 }
  0xba   : > { %5024 = vmatmul.mubr.msk.f32.gmra.mrb[10].mxu1 %vm309_vm1, %v6021_v5 }
  0xbb   : > { %5026 = vmatprep.mubr.msk.f32.mxu1 %vm309_vm1, %v6027_v7 }
  0xbc   : > { %5251 = vmatmul.mubr.msk.f32.gmra.mrb[28].mxu0 %vm309_vm1, %v6371_v47 }
  0xbd   : > { %5253 = vmatprep.mubr.msk.f32.mxu0 %vm309_vm1, %v2776_v59  ;;  %v6981_v59 = vld [vmem:[#allocation12_spill] sm:$0xff] }
  0xbe   : > { %5027 = vmatmul.mubr.msk.f32.gmra.mrb[12].mxu1 %vm309_vm1, %v6037_v9 }
  0xbf   : > { %5029 = vmatprep.mubr.msk.f32.mxu1 %vm309_vm1, %v6043_v11 }
  0xc0   : > { %5254 = vmatmul.mubr.msk.f32.gmra.mrb[30].mxu0 %vm309_vm1, %v2777_v32  ;;  %v6982_v32 = vld [vmem:[#allocation24_spill] sm:$0xff] }
  0xc1   : > { %5258 = vmatprep.mubr.msk.f32.mxu0 %vm309_vm1, %v5816_v21  ;;  %v6962_v21 = vld [vmem:[#allocation26_spill] sm:$0xff] }
  0xc2   : > { %5030 = vmatmul.mubr.msk.f32.gmra.mrb[14].mxu1 %vm309_vm1, %v6053_v13 }
  0xc3   : > { %5032 = vmatprep.mubr.msk.f32.mxu1 %vm309_vm1, %v6059_v15 }
  0xc4   : > { %5259 = vmatmul.mubr.msk.f32.vlgmr.msra.gmra.mrb[0].mxu0 %vm309_vm1, %v5830_v24  ;;  %v6963_v24 = vld [vmem:[#allocation3_spill] sm:$0xff] }
  0xc5   : > { %5307 = vmatpush3.msk.msra.mxu0 %vm632_vm0, %v6227_v31  ;;  %5261 = vmatprep.mubr.msk.f32.mxu0 %vm309_vm1, %v5844_v3  ;;  %v6964_v3 = vld [vmem:[#allocation15_spill] sm:$0xff] }
  0xc6   : > { %5033 = vmatmul.mubr.msk.f32.gmra.mrb[16].mxu1 %vm309_vm1, %v6069_v17  ;;  %v6979_v31 = vld [vmem:[#allocation11_spill] sm:$0xff] }
  0xc7   : > { %5035 = vmatprep.mubr.msk.f32.mxu1 %vm309_vm1, %v6075_v19 }
  0xc8   : > { %5262 = vmatmul.mubr.msk.f32.gmra.mrb[2].mxu0 %vm309_vm1, %v5858_v2  ;;  %v6965_v2 = vld [vmem:[#allocation4_spill] sm:$0xff] }
  0xc9   : > { %5264 = vmatprep.mubr.msk.f32.mxu0 %vm309_vm1, %v5862_v26  ;;  %v6966_v26 = vld [vmem:[#allocation16_spill] sm:$0xff] }
  0xca   : > { %5036 = vmatmul.mubr.msk.f32.gmra.mrb[18].mxu1 %vm309_vm1, %v6083_v22 }
  0xcb   : > { %5038 = vmatprep.mubr.msk.f32.mxu1 %vm309_vm1, %v6086_v29 }
  0xcc   : > { %5265 = vmatmul.mubr.msk.f32.gmra.mrb[4].mxu0 %vm309_vm1, %v5870_v27  ;;  %v6967_v27 = vld [vmem:[#allocation5_spill] sm:$0xff] }
  0xcd   : > { %5267 = vmatprep.mubr.msk.f32.mxu0 %vm309_vm1, %v5874_v28  ;;  %v6968_v28 = vld [vmem:[#allocation17_spill] sm:$0xff] }
  0xce   : > { %5039 = vmatmul.mubr.msk.f32.gmra.mrb[20].mxu1 %vm309_vm1, %v6100_v33 }
  0xcf   : > { %5041 = vmatprep.mubr.msk.f32.mxu1 %vm309_vm1, %v6108_v40 }
  0xd0   : > { %5268 = vmatmul.mubr.msk.f32.gmra.mrb[6].mxu0 %vm309_vm1, %v5883_v30  ;;  %v6969_v30 = vld [vmem:[#allocation6_spill] sm:$0xff] }
  0xd1   : > { %5270 = vmatprep.mubr.msk.f32.mxu0 %vm309_vm1, %v5888_v34  ;;  %v6970_v34 = vld [vmem:[#allocation18_spill] sm:$0xff] }
  0xd2   : > { %5042 = vmatmul.mubr.msk.f32.gmra.mrb[22].mxu1 %vm309_vm1, %v6120_v25 }
  0xd3   : > { %5044 = vmatprep.mubr.msk.f32.mxu1 %vm309_vm1, %v6126_v44 }
  0xd4   : > { %5271 = vmatmul.mubr.msk.f32.gmra.mrb[8].mxu0 %vm309_vm1, %v5899_v36  ;;  %v6971_v36 = vld [vmem:[#allocation7_spill] sm:$0xff] }
  0xd5   : > { %5273 = vmatprep.mubr.msk.f32.mxu0 %vm309_vm1, %v5903_v37  ;;  %v6972_v37 = vld [vmem:[#allocation19_spill] sm:$0xff] }
  0xd6   : > { %5045 = vmatmul.mubr.msk.f32.gmra.mrb[24].mxu1 %vm309_vm1, %v6136_v50 }
  0xd7   : > { %5047 = vmatprep.mubr.msk.f32.mxu1 %vm309_vm1, %v6142_v53 }
  0xd8   : > { %5274 = vmatmul.mubr.msk.f32.gmra.mrb[10].mxu0 %vm309_vm1, %v5911_v38  ;;  %v6973_v38 = vld [vmem:[#allocation8_spill] sm:$0xff] }
  0xd9   : > { %5276 = vmatprep.mubr.msk.f32.mxu0 %vm309_vm1, %v5915_v39  ;;  %v6974_v39 = vld [vmem:[#allocation20_spill] sm:$0xff] }
  0xda   : > { %5048 = vmatmul.mubr.msk.f32.gmra.mrb[26].mxu1 %vm309_vm1, %v6152_v23 }
  0xdb   : > { %5050 = vmatprep.mubr.msk.f32.mxu1 %vm309_vm1, %v6158_v16 }
  0xdc   : > { %5277 = vmatmul.mubr.msk.f32.gmra.mrb[12].mxu0 %vm309_vm1, %v5924_v41  ;;  %v6976_v41 = vld [vmem:[#allocation21_spill] sm:$0xff] }
  0xdd   : > { %5279 = vmatprep.mubr.msk.f32.mxu0 %vm309_vm1, %v5951_v48  ;;  %v6977_v48 = vld [vmem:[#allocation10_spill] sm:$0xff] }
  0xde   : > { %5051 = vmatmul.mubr.msk.f32.gmra.mrb[28].mxu1 %vm309_vm1, %v6168_v12 }
  0xdf   : > { %5053 = vmatprep.mubr.msk.f32.mxu1 %vm309_vm1, %v6174_v8 }
  0xe0   : > { %5280 = vmatmul.mubr.msk.f32.gmra.mrb[14].mxu0 %vm309_vm1, %v5973_v55  ;;  %v6978_v55 = vld [vmem:[#allocation22_spill] sm:$0xff] }
  0xe1   : > { %5282 = vmatprep.mubr.msk.f32.mxu0 %vm309_vm1, %v6963_v24  ;;  %v6983_v24 = vld [vmem:[#allocation13_spill] sm:$0xff] }
  0xe2   : > { %5054 = vmatmul.mubr.msk.f32.gmra.mrb[30].mxu1 %vm309_vm1, %v6962_v21 }
  0xe3   : > { %5058 = vmatprep.mubr.msk.f32.mxu1 %vm309_vm1, %v6964_v3  ;;  %v6984_v3 = vld [vmem:[#allocation25_spill] sm:$0xff] }
  0xe4   : > { %5283 = vmatmul.mubr.msk.f32.gmra.mrb[16].mxu0 %vm309_vm1, %v6965_v2  ;;  %v6497_v2 = vld [vmem:[#allocation2 + $0x181] sm:$0xff] }
  0xe5   : > { %5285 = vmatprep.mubr.msk.f32.mxu0 %vm309_vm1, %v6967_v27 }
  0xe6   : > { %5059 = vmatmul.mubr.msk.f32.vlgmr.msra.gmra.mrb[0].mxu1 %vm309_vm1, %v6966_v26  ;;  %v6985_v26 = vld [vmem:[#allocation14_spill] sm:$0xff] }
  0xe7   : > { %5357 = vmatpush3.msk.msra.mxu1 %vm632_vm0, %v5713_v1  ;;  %5061 = vmatprep.mubr.msk.f32.mxu1 %vm309_vm1, %v6968_v28  ;;  %v6975_v1 = vld [vmem:[#allocation9_spill] sm:$0xff]  ;;  %v6986_v28 = vld [vmem:[#allocation27_spill] sm:$0xff] }
  0xe8   : > { %5286 = vmatmul.mubr.msk.f32.gmra.mrb[18].mxu0 %vm309_vm1, %v6969_v30 }
  0xe9   : > { %5288 = vmatprep.mubr.msk.f32.mxu0 %vm309_vm1, %v6971_v36 }
  0xea   : > { %5062 = vmatmul.mubr.msk.f32.gmra.mrb[2].mxu1 %vm309_vm1, %v6970_v34  ;;  %v6505_v34 = vld [vmem:[#allocation2 + $0x189] sm:$0xff] }
  0xeb   : > { %5064 = vmatprep.mubr.msk.f32.mxu1 %vm309_vm1, %v6972_v37  ;;  %v6987_v37 = vld [vmem:[#allocation29_spill] sm:$0xff] }
  0xec   : > { %5289 = vmatmul.mubr.msk.f32.gmra.mrb[20].mxu0 %vm309_vm1, %v6973_v38 }
  0xed   : > { %5291 = vmatprep.mubr.msk.f32.mxu0 %vm309_vm1, %v6975_v1 }
  0xee   : > { %5065 = vmatmul.mubr.msk.f32.gmra.mrb[4].mxu1 %vm309_vm1, %v6974_v39  ;;  %v3166_v39 = vld [vmem:[#allocation2 + $0x199] sm:$0xff] }
  0xef   : > { %5067 = vmatprep.mubr.msk.f32.mxu1 %vm309_vm1, %v6976_v41  ;;  %v6988_v41 = vld [vmem:[#allocation31_spill] sm:$0xff] }
  0xf0   : > { %5292 = vmatmul.mubr.msk.f32.gmra.mrb[22].mxu0 %vm309_vm1, %v6977_v48 }
  0xf1   : > { %5294 = vmatprep.mubr.msk.f32.mxu0 %vm309_vm1, %v6979_v31 }
  0xf2   : > { %5068 = vmatmul.mubr.msk.f32.gmra.mrb[6].mxu1 %vm309_vm1, %v6978_v55  ;;  %v3167_v55 = vld [vmem:[#allocation2 + $0x1a1] sm:$0xff] }
  0xf3   : > { %5070 = vmatprep.mubr.msk.f32.mxu1 %vm309_vm1, %v6980_v63  ;;  %v6989_v63 = vld [vmem:[#allocation32_spill] sm:$0xff] }
  0xf4   : > { %5295 = vmatmul.mubr.msk.f32.gmra.mrb[24].mxu0 %vm309_vm1, %v6981_v59 }
  0xf5   : > { %5297 = vmatprep.mubr.msk.f32.mxu0 %vm309_vm1, %v6983_v24 }
  0xf6   : > { %5071 = vmatmul.mubr.msk.f32.gmra.mrb[8].mxu1 %vm309_vm1, %v6982_v32  ;;  %v6990_v32 = vld [vmem:[#allocation33_spill] sm:$0xff] }
  0xf7   : > { %5073 = vmatprep.mubr.msk.f32.mxu1 %vm309_vm1, %v6984_v3 }
  0xf8   : > { %5298 = vmatmul.mubr.msk.f32.gmra.mrb[26].mxu0 %vm309_vm1, %v6985_v26 }
  0xf9   : > { %5300 = vmatprep.mubr.msk.f32.mxu0 %vm309_vm1, %v6497_v2 }
  0xfa   : > { %5074 = vmatmul.mubr.msk.f32.gmra.mrb[10].mxu1 %vm309_vm1, %v6986_v28 }
  0xfb   : > { %5076 = vmatprep.mubr.msk.f32.mxu1 %vm309_vm1, %v6987_v37 }
  0xfc   : > { %5301 = vmatmul.mubr.msk.f32.gmra.mrb[28].mxu0 %vm309_vm1, %v6505_v34 }
  0xfd   : > { %5303 = vmatprep.mubr.msk.f32.mxu0 %vm309_vm1, %v3166_v39 }
  0xfe   : > { %5077 = vmatmul.mubr.msk.f32.gmra.mrb[12].mxu1 %vm309_vm1, %v6988_v41 }
  0xff   : > { %5079 = vmatprep.mubr.msk.f32.mxu1 %vm309_vm1, %v6989_v63 }
 0x100   : > { %5304 = vmatmul.mubr.msk.f32.gmra.mrb[30].mxu0 %vm309_vm1, %v3167_v55 }
 0x101   : > { %5308 = vmatprep.mubr.msk.f32.mxu0 %vm309_vm1, %v5953_v49  ;;  %v1981_v49 = vld [vmem:[#allocation2 + $0xd9] sm:$0xff] }
 0x102   : > { %5080 = vmatmul.mubr.msk.f32.gmra.mrb[14].mxu1 %vm309_vm1, %v6990_v32 }
 0x103   : > { %5082 = vmatprep.mubr.msk.f32.mxu1 %vm309_vm1, %v6220_v61  ;;  %v6992_v61 = vld [vmem:[#allocation30_spill] sm:$0xff] }
 0x104   : > { %5309 = vmatmul.mubr.msk.f32.vlgmr.msra.gmra.mrb[0].mxu0 %vm309_vm1, %v5967_v54  ;;  %v1982_v54 = vld [vmem:[#allocation2 + $0xe1] sm:$0xff] }
 0x105   : > { %5311 = vmatprep.mubr.msk.f32.mxu0 %vm309_vm1, %v5975_v56  ;;  %v1983_v56 = vld [vmem:[#allocation2 + $0xf1] sm:$0xff] }
 0x106   : > { %5083 = vmatmul.mubr.msk.f32.gmra.mrb[16].mxu1 %vm309_vm1, %v6237_v42 }
 0x107   : > { %5085 = vmatprep.mubr.msk.f32.mxu1 %vm309_vm1, %v6239_v43 }
 0x108   : > { %5312 = vmatmul.mubr.msk.f32.gmra.mrb[2].mxu0 %vm309_vm1, %v5989_v58  ;;  %v6991_v58 = vld [vmem:[#allocation28_spill] sm:$0xff] }
 0x109   : > { %5314 = vmatprep.mubr.msk.f32.mxu0 %vm309_vm1, %v5995_v60  ;;  %v3556_v60 = vld [vmem:[#allocation2 + $0x19a] sm:$0xff] }
 0x10a   : > { %5086 = vmatmul.mubr.msk.f32.gmra.mrb[18].mxu1 %vm309_vm1, %v6251_v51 }
 0x10b   : > { %5088 = vmatprep.mubr.msk.f32.mxu1 %vm309_vm1, %v6253_v46 }
 0x10c   : > { %5315 = vmatmul.mubr.msk.f32.gmra.mrb[4].mxu0 %vm309_vm1, %v6005_v62  ;;  %v3557_v62 = vld [vmem:[#allocation2 + $0x1a2] sm:$0xff] }
 0x10d   : > { %5317 = vmatprep.mubr.msk.f32.mxu0 %vm309_vm1, %v6011_v0 }
 0x10e   : > { %5089 = vmatmul.mubr.msk.f32.gmra.mrb[20].mxu1 %vm309_vm1, %v6263_v20 }
 0x10f   : > { %5091 = vmatprep.mubr.msk.f32.mxu1 %vm309_vm1, %v6265_v52 }
 0x110   : > { %5318 = vmatmul.mubr.msk.f32.gmra.mrb[6].mxu0 %vm309_vm1, %v6021_v5 }
 0x111   : > { %5320 = vmatprep.mubr.msk.f32.mxu0 %vm309_vm1, %v6027_v7 }
 0x112   : > { %5092 = vmatmul.mubr.msk.f32.gmra.mrb[22].mxu1 %vm309_vm1, %v6275_v14 }
 0x113   : > { %5094 = vmatprep.mubr.msk.f32.mxu1 %vm309_vm1, %v6277_v18 }
 0x114   : > { %5321 = vmatmul.mubr.msk.f32.gmra.mrb[8].mxu0 %vm309_vm1, %v6037_v9 }
 0x115   : > { %5323 = vmatprep.mubr.msk.f32.mxu0 %vm309_vm1, %v6043_v11 }
 0x116   : > { %5095 = vmatmul.mubr.msk.f32.gmra.mrb[24].mxu1 %vm309_vm1, %v6287_v4 }
 0x117   : > { %5097 = vmatprep.mubr.msk.f32.mxu1 %vm309_vm1, %v6289_v10 }
 0x118   : > { %5324 = vmatmul.mubr.msk.f32.gmra.mrb[10].mxu0 %vm309_vm1, %v6053_v13 }
 0x119   : > { %5326 = vmatprep.mubr.msk.f32.mxu0 %vm309_vm1, %v6059_v15 }
 0x11a   : > { %5098 = vmatmul.mubr.msk.f32.gmra.mrb[26].mxu1 %vm309_vm1, %v6299_v6 }
 0x11b   : > { %5100 = vmatprep.mubr.msk.f32.mxu1 %vm309_vm1, %v6301_v35 }
 0x11c   : > { %5327 = vmatmul.mubr.msk.f32.gmra.mrb[12].mxu0 %vm309_vm1, %v6069_v17 }
 0x11d   : > { %5329 = vmatprep.mubr.msk.f32.mxu0 %vm309_vm1, %v6075_v19 }
 0x11e   : > { %5101 = vmatmul.mubr.msk.f32.gmra.mrb[28].mxu1 %vm309_vm1, %v6311_v57  ;;  %v1984_v57 = vld [vmem:[#allocation2 + $0xf9] sm:$0xff] }
 0x11f   : > { %5103 = vmatprep.mubr.msk.f32.mxu1 %vm309_vm1, %v6363_v45 }
 0x120   : > { %5330 = vmatmul.mubr.msk.f32.gmra.mrb[14].mxu0 %vm309_vm1, %v6083_v22 }
 0x121   : > { %5332 = vmatprep.mubr.msk.f32.mxu0 %vm309_vm1, %v6086_v29 }
 0x122   : > { %5104 = vmatmul.mubr.msk.f32.gmra.mrb[30].mxu1 %vm309_vm1, %v6371_v47 }
 0x123   : > { %5132 = vmatprep.mubr.msk.f32.mxu1 %vm309_vm1, %v1981_v49 }
 0x124   : > { %5333 = vmatmul.mubr.msk.f32.gmra.mrb[16].mxu0 %vm309_vm1, %v6100_v33 }
 0x125   : > { %5335 = vmatprep.mubr.msk.f32.mxu0 %vm309_vm1, %v6108_v40 }
 0x126   : > { %5133 = vmatmul.mubr.msk.f32.vlgmr.msra.gmra.mrb[16].mxu1 %vm309_vm1, %v1982_v54 }
 0x127   : > { %5135 = vmatprep.mubr.msk.f32.mxu1 %vm309_vm1, %v1983_v56 }
 0x128   : > { %5336 = vmatmul.mubr.msk.f32.gmra.mrb[18].mxu0 %vm309_vm1, %v6120_v25 }
 0x129   : > { %5338 = vmatprep.mubr.msk.f32.mxu0 %vm309_vm1, %v6126_v44 }
 0x12a   : > { %5136 = vmatmul.mubr.msk.f32.gmra.mrb[18].mxu1 %vm309_vm1, %v1984_v57 }
 0x12b   : > { %5138 = vmatprep.mubr.msk.f32.mxu1 %vm309_vm1, %v6967_v27 }
 0x12c   : > { %5339 = vmatmul.mubr.msk.f32.gmra.mrb[20].mxu0 %vm309_vm1, %v6136_v50 }
 0x12d   : > { %5341 = vmatprep.mubr.msk.f32.mxu0 %vm309_vm1, %v6142_v53 }
 0x12e   : > { %5139 = vmatmul.mubr.msk.f32.gmra.mrb[20].mxu1 %vm309_vm1, %v6969_v30 }
 0x12f   : > { %5141 = vmatprep.mubr.msk.f32.mxu1 %vm309_vm1, %v6971_v36 }
 0x130   : > { %5342 = vmatmul.mubr.msk.f32.gmra.mrb[22].mxu0 %vm309_vm1, %v6152_v23 }
 0x131   : > { %5344 = vmatprep.mubr.msk.f32.mxu0 %vm309_vm1, %v6158_v16 }
 0x132   : > { %5142 = vmatmul.mubr.msk.f32.gmra.mrb[22].mxu1 %vm309_vm1, %v6973_v38 }
 0x133   : > { %5144 = vmatprep.mubr.msk.f32.mxu1 %vm309_vm1, %v6975_v1 }
 0x134   : > { %5345 = vmatmul.mubr.msk.f32.gmra.mrb[24].mxu0 %vm309_vm1, %v6168_v12 }
 0x135   : > { %5347 = vmatprep.mubr.msk.f32.mxu0 %vm309_vm1, %v6174_v8 }
 0x136   : > { %5145 = vmatmul.mubr.msk.f32.gmra.mrb[24].mxu1 %vm309_vm1, %v6977_v48 }
 0x137   : > { %5147 = vmatprep.mubr.msk.f32.mxu1 %vm309_vm1, %v6979_v31 }
 0x138   : > { %5348 = vmatmul.mubr.msk.f32.gmra.mrb[26].mxu0 %vm309_vm1, %v6962_v21 }
 0x139   : > { %5350 = vmatprep.mubr.msk.f32.mxu0 %vm309_vm1, %v6991_v58 }
 0x13a   : > { %5148 = vmatmul.mubr.msk.f32.gmra.mrb[26].mxu1 %vm309_vm1, %v6981_v59 }
 0x13b   : > { %5150 = vmatprep.mubr.msk.f32.mxu1 %vm309_vm1, %v6983_v24 }
 0x13c   : > { %5351 = vmatmul.mubr.msk.f32.gmra.mrb[28].mxu0 %vm309_vm1, %v6992_v61 }
 0x13d   : > { %5353 = vmatprep.mubr.msk.f32.mxu0 %vm309_vm1, %v3556_v60 }
 0x13e   : > { %5151 = vmatmul.mubr.msk.f32.gmra.mrb[28].mxu1 %vm309_vm1, %v6985_v26 }
 0x13f   : > { %5153 = vmatprep.mubr.msk.f32.mxu1 %vm309_vm1, %v6497_v2 }
 0x140   : > { %5354 = vmatmul.mubr.msk.f32.gmra.mrb[30].mxu0 %vm309_vm1, %v3557_v62 }
 0x142   : > { %5154 = vmatmul.mubr.msk.f32.gmra.mrb[30].mxu1 %vm309_vm1, %v6505_v34 }
 0x1b9   : > { %v5060_v0 = vpop.f32.mrb[0].mxu1 }
 0x1ba   : > { %v1774_v4 = vpop.f32.mrb[1].mxu1 }
 0x1bd   : > { %v5063_v5 = vpop.f32.mrb[2].mxu1 }
 0x1be   : > { %v1784_v7 = vpop.f32.mrb[3].mxu1 }
 0x1c1   : > { %v5066_v8 = vpop.f32.mrb[4].mxu1 }
 0x1c2   : > { %v1794_v9 = vpop.f32.mrb[5].mxu1 }
 0x1c5   : > { %v5069_v10 = vpop.f32.mrb[6].mxu1 }
 0x1c6   : > { %v1804_v11 = vpop.f32.mrb[7].mxu1 }
 0x1c9   : > { %v5072_v12 = vpop.f32.mrb[8].mxu1 }
 0x1ca   : > { %v1814_v13 = vpop.f32.mrb[9].mxu1 }
 0x1cd   : > { %v5075_v14 = vpop.f32.mrb[10].mxu1 }
 0x1ce   : > { %v1824_v15 = vpop.f32.mrb[11].mxu1 }
 0x1d1   : > { %v5078_v16 = vpop.f32.mrb[12].mxu1 }
 0x1d2   : > { %v1834_v17 = vpop.f32.mrb[13].mxu1 }
 0x1d5   : > { %v5081_v18 = vpop.f32.mrb[14].mxu1 }
 0x1d6   : > { %v1844_v19 = vpop.f32.mrb[15].mxu1 }
 0x1d7   : > { %v5310_v22 = vpop.f32.mrb[0].mxu0 }
 0x1d8   : > { %v6641_v29 = vadd.f32 %v5310_v22, %v5060_v0  ;;  %v3725_v33 = vpop.f32.mrb[1].mxu0 }
 0x1d9   : > { %v6643_v35 = vadd.f32 %v3725_v33, %v1774_v4 }
 0x1da   : > { %v3918_v40 = vsel %vm3916_vm3, %v6641_v29, 0.0 }
 0x1db   : > { %v3917_v42 = vsel %vm3916_vm3, %v6643_v35, 0.0  ;;  %v5313_v25 = vpop.f32.mrb[2].mxu0 }
 0x1dc   : > { %v6649_v43 = vadd.f32 %v5313_v25, %v5063_v5  ;;  %v3735_v44 = vpop.f32.mrb[3].mxu0  ;;  %v3919_v50 = vadd.f32 %v3918_v40, %v3917_v42 }
 0x1dd   : > { %v6651_v46 = vadd.f32 %v3735_v44, %v1784_v7 }
 0x1de   : > { %v3922_v51 = vsel %vm3916_vm3, %v6649_v43, 0.0 }
 0x1df   : > { %v3920_v52 = vsel %vm3916_vm3, %v6651_v46, 0.0  ;;  %v5316_v53 = vpop.f32.mrb[4].mxu0 }
 0x1e0   : > { %v3921_v20 = vadd.f32 %v3920_v52, %v3919_v50  ;;  %v6655_v23 = vadd.f32 %v5316_v53, %v5066_v8  ;;  %v3745_v6 = vpop.f32.mrb[5].mxu0 }
 0x1e1   : > { %v6659_v45 = vadd.f32 %v3745_v6, %v1794_v9 }
 0x1e2   : > { %v3923_v47 = vadd.f32 %v3922_v51, %v3921_v20  ;;  %v3926_v1 = vsel %vm3916_vm3, %v6655_v23, 0.0 }
 0x1e3   : > { %v3924_v21 = vsel %vm3916_vm3, %v6659_v45, 0.0  ;;  %v5319_v27 = vpop.f32.mrb[6].mxu0 }
 0x1e4   : > { %v3925_v30 = vadd.f32 %v3924_v21, %v3923_v47  ;;  %v6663_v36 = vadd.f32 %v5319_v27, %v5069_v10  ;;  %v3755_v38 = vpop.f32.mrb[7].mxu0 }
 0x1e5   : > { %v6667_v48 = vadd.f32 %v3755_v38, %v1804_v11 }
 0x1e6   : > { %v3927_v31 = vadd.f32 %v3926_v1, %v3925_v30  ;;  %v3930_v28 = vsel %vm3916_vm3, %v6663_v36, 0.0 }
 0x1e7   : > { %v3928_v59 = vsel %vm3916_vm3, %v6667_v48, 0.0  ;;  %v5322_v24 = vpop.f32.mrb[8].mxu0 }
 0x1e8   : > { %v3929_v3 = vadd.f32 %v3928_v59, %v3927_v31  ;;  %v6671_v2 = vadd.f32 %v5322_v24, %v5072_v12  ;;  %v3765_v26 = vpop.f32.mrb[9].mxu0 }
 0x1e9   : > { %v6675_v34 = vadd.f32 %v3765_v26, %v1814_v13 }
 0x1ea   : > { %v3931_v37 = vadd.f32 %v3930_v28, %v3929_v3  ;;  %v3934_v49 = vsel %vm3916_vm3, %v6671_v2, 0.0 }
 0x1eb   : > { %v3932_v39 = vsel %vm3916_vm3, %v6675_v34, 0.0  ;;  %v5325_v41 = vpop.f32.mrb[10].mxu0 }
 0x1ec   : > { %v3933_v55 = vadd.f32 %v3932_v39, %v3931_v37  ;;  %v6679_v63 = vadd.f32 %v5325_v41, %v5075_v14  ;;  %v3775_v32 = vpop.f32.mrb[11].mxu0 }
 0x1ed   : > { %v6683_v54 = vadd.f32 %v3775_v32, %v1824_v15 }
 0x1ee   : > { %v3935_v56 = vadd.f32 %v3934_v49, %v3933_v55  ;;  %v3938_v0 = vsel %vm3916_vm3, %v6679_v63, 0.0 }
 0x1ef   : > { %v3936_v57 = vsel %vm3916_vm3, %v6683_v54, 0.0  ;;  %v5328_v58 = vpop.f32.mrb[12].mxu0 }
 0x1f0   : > { %v3937_v60 = vadd.f32 %v3936_v57, %v3935_v56  ;;  %v6687_v61 = vadd.f32 %v5328_v58, %v5078_v16  ;;  %v3785_v62 = vpop.f32.mrb[13].mxu0 }
 0x1f1   : > { %v6691_v4 = vadd.f32 %v3785_v62, %v1834_v17 }
 0x1f2   : > { %v3939_v5 = vadd.f32 %v3938_v0, %v3937_v60  ;;  %v3942_v12 = vsel %vm3916_vm3, %v6687_v61, 0.0 }
 0x1f3   : > { %v3940_v7 = vsel %vm3916_vm3, %v6691_v4, 0.0  ;;  %v5331_v8 = vpop.f32.mrb[14].mxu0 }
 0x1f4   : > { %v3941_v9 = vadd.f32 %v3940_v7, %v3939_v5  ;;  %v6695_v10 = vadd.f32 %v5331_v8, %v5081_v18  ;;  %v3795_v11 = vpop.f32.mrb[15].mxu0 }
 0x1f5   : > { %v6699_v13 = vadd.f32 %v3795_v11, %v1844_v19 }
 0x1f6   : > { %v3943_v14 = vadd.f32 %v3942_v12, %v3941_v9  ;;  %v3946_v40 = vsel %vm3916_vm3, %v6695_v10, 0.0 }
 0x1f7   : > { %v3944_v15 = vsel %vm3916_vm3, %v6699_v13, 0.0  ;;  %v5334_v16 = vpop.f32.mrb[16].mxu0 }
 0x1f8   : > { %v3945_v17 = vadd.f32 %v3944_v15, %v3943_v14  ;;  %v3805_v33 = vpop.f32.mrb[17].mxu0 }
 0x1f9   : > { %v5134_v22 = vpop.f32.mrb[16].mxu1 }
 0x1fa   : > { %v6705_v42 = vadd.f32 %v5334_v16, %v5134_v22  ;;  %v2244_v18 = vpop.f32.mrb[17].mxu1  ;;  %v3947_v44 = vadd.f32 %v3946_v40, %v3945_v17 }
 0x1fb   : > { %v6707_v25 = vadd.f32 %v3805_v33, %v2244_v18  ;;  %v5337_v50 = vpop.f32.mrb[18].mxu0 }
 0x1fc   : > { %v3815_v53 = vpop.f32.mrb[19].mxu0  ;;  %v3950_v47 = vsel %vm3916_vm3, %v6705_v42, 0.0 }
 0x1fd   : > { %v3948_v19 = vsel %vm3916_vm3, %v6707_v25, 0.0  ;;  %v5137_v52 = vpop.f32.mrb[18].mxu1 }
 0x1fe   : > { %v3949_v20 = vadd.f32 %v3948_v19, %v3947_v44  ;;  %v6711_v6 = vadd.f32 %v5337_v50, %v5137_v52  ;;  %v2254_v51 = vpop.f32.mrb[19].mxu1 }
 0x1ff   : > { %v6715_v21 = vadd.f32 %v3815_v53, %v2254_v51  ;;  %v5340_v30 = vpop.f32.mrb[20].mxu0 }
 0x200   : > { %v3951_v27 = vadd.f32 %v3950_v47, %v3949_v20  ;;  %v3825_v31 = vpop.f32.mrb[21].mxu0  ;;  %v3954_v26 = vsel %vm3916_vm3, %v6711_v6, 0.0 }
 0x201   : > { %v3952_v38 = vsel %vm3916_vm3, %v6715_v21, 0.0  ;;  %v5140_v1 = vpop.f32.mrb[20].mxu1 }
 0x202   : > { %v3953_v59 = vadd.f32 %v3952_v38, %v3951_v27  ;;  %v6719_v24 = vadd.f32 %v5340_v30, %v5140_v1  ;;  %v2264_v3 = vpop.f32.mrb[21].mxu1 }
 0x203   : > { %v6723_v28 = vadd.f32 %v3825_v31, %v2264_v3  ;;  %v5343_v39 = vpop.f32.mrb[22].mxu0 }
 0x204   : > { %v3955_v37 = vadd.f32 %v3954_v26, %v3953_v59  ;;  %v3835_v32 = vpop.f32.mrb[23].mxu0  ;;  %v3958_v58 = vsel %vm3916_vm3, %v6719_v24, 0.0 }
 0x205   : > { %v3956_v41 = vsel %vm3916_vm3, %v6723_v28, 0.0  ;;  %v5143_v55 = vpop.f32.mrb[22].mxu1 }
 0x206   : > { %v3957_v49 = vadd.f32 %v3956_v41, %v3955_v37  ;;  %v6727_v56 = vadd.f32 %v5343_v39, %v5143_v55  ;;  %v2274_v57 = vpop.f32.mrb[23].mxu1 }
 0x207   : > { %v6731_v60 = vadd.f32 %v3835_v32, %v2274_v57  ;;  %v5346_v0 = vpop.f32.mrb[24].mxu0 }
 0x208   : > { %v3959_v62 = vadd.f32 %v3958_v58, %v3957_v49  ;;  %v3845_v8 = vpop.f32.mrb[25].mxu0  ;;  %v3962_v14 = vsel %vm3916_vm3, %v6727_v56, 0.0 }
 0x209   : > { %v3960_v5 = vsel %vm3916_vm3, %v6731_v60, 0.0  ;;  %v5146_v7 = vpop.f32.mrb[24].mxu1 }
 0x20a   : > { %v3961_v9 = vadd.f32 %v3960_v5, %v3959_v62  ;;  %v6735_v11 = vadd.f32 %v5346_v0, %v5146_v7  ;;  %v2284_v12 = vpop.f32.mrb[25].mxu1 }
 0x20b   : > { %v6739_v15 = vadd.f32 %v3845_v8, %v2284_v12  ;;  %v5349_v17 = vpop.f32.mrb[26].mxu0 }
 0x20c   : > { %v3963_v16 = vadd.f32 %v3962_v14, %v3961_v9  ;;  %v3855_v40 = vpop.f32.mrb[27].mxu0  ;;  %v3966_v19 = vsel %vm3916_vm3, %v6735_v11, 0.0 }
 0x20d   : > { %v3964_v22 = vsel %vm3916_vm3, %v6739_v15, 0.0  ;;  %v5149_v33 = vpop.f32.mrb[26].mxu1 }
 0x20e   : > { %v3965_v18 = vadd.f32 %v3964_v22, %v3963_v16  ;;  %v6743_v44 = vadd.f32 %v5349_v17, %v5149_v33  ;;  %v2294_v50 = vpop.f32.mrb[27].mxu1 }
 0x20f   : > { %v6747_v52 = vadd.f32 %v3855_v40, %v2294_v50  ;;  %v5352_v20 = vpop.f32.mrb[28].mxu0 }
 0x210   : > { %v3967_v53 = vadd.f32 %v3966_v19, %v3965_v18  ;;  %v3865_v27 = vpop.f32.mrb[29].mxu0  ;;  %v3970_v31 = vsel %vm3916_vm3, %v6743_v44, 0.0 }
 0x211   : > { %v3968_v51 = vsel %vm3916_vm3, %v6747_v52, 0.0  ;;  %v5152_v47 = vpop.f32.mrb[28].mxu1 }
 0x212   : > { %v3969_v30 = vadd.f32 %v3968_v51, %v3967_v53  ;;  %v6751_v38 = vadd.f32 %v5352_v20, %v5152_v47  ;;  %v2304_v1 = vpop.f32.mrb[29].mxu1 }
 0x213   : > { %v6755_v59 = vadd.f32 %v3865_v27, %v2304_v1  ;;  %v5355_v26 = vpop.f32.mrb[30].mxu0 }
 0x214   : > { %v3971_v3 = vadd.f32 %v3970_v31, %v3969_v30  ;;  %v3875_v41 = vpop.f32.mrb[31].mxu0  ;;  %v3974_v57 = vsel %vm3916_vm3, %v6751_v38, 0.0 }
 0x215   : > { %v3972_v37 = vsel %vm3916_vm3, %v6755_v59, 0.0  ;;  %v5155_v39 = vpop.f32.mrb[30].mxu1 }
 0x216   : > { %v3973_v55 = vadd.f32 %v3972_v37, %v3971_v3  ;;  %v6759_v32 = vadd.f32 %v5355_v26, %v5155_v39  ;;  %v2314_v49 = vpop.f32.mrb[31].mxu1 }
 0x217   : > { %v6763_v58 = vadd.f32 %v3875_v41, %v2314_v49 }
 0x218   : > { %v3975_v62 = vadd.f32 %v3974_v57, %v3973_v55  ;;  %v3978_v7 = vsel %vm3916_vm3, %v6759_v32, 0.0 }
 0x219   : > { %v3976_v0 = vsel %vm3916_vm3, %v6763_v58, 0.0 }
 0x21a   : > { %v3977_v5 = vadd.f32 %v3976_v0, %v3975_v62 }
 0x21c   : > { %v3979_v8 = vadd.f32 %v3978_v7, %v3977_v5 }
 0x21e   : > { %v3980_v9 = vrot.slane %v3979_v8, 4 }
 0x220   : > { %v3981_v12 = vadd.f32 %v3980_v9, %v3979_v8 }
 0x222   : > { %v3982_v14 = vrot.slane %v3981_v12, 2 }
 0x224   : > { %v3983_v16 = vadd.f32 %v3982_v14, %v3981_v12 }
 0x226   : > { %v3984_v17 = vrot.slane %v3983_v16, 1 }
 0x228   : > { %v6769_v22 = vadd.f32 %v3984_v17, %v3983_v16 }
 0x22a   : > { %v6772_v33 = vmul.f32 0.00390625, %v6769_v22 }
 0x22c   : > { %v3987_v40 = vsub.f32 %v6643_v35, %v6772_v33  ;;  %v3988_v18 = vsub.f32 %v6641_v29, %v6772_v33  ;;  %v3989_v50 = vsub.f32 %v6651_v46, %v6772_v33  ;;  %v3990_v19 = vsub.f32 %v6649_v43, %v6772_v33 }
 0x22d   : > { %v3991_v51 = vsub.f32 %v6659_v45, %v6772_v33  ;;  %v3992_v27 = vsub.f32 %v6655_v23, %v6772_v33  ;;  %v3993_v46 = vsub.f32 %v6667_v48, %v6772_v33  ;;  %v3994_v45 = vsub.f32 %v6663_v36, %v6772_v33 }
 0x22e   : > { %v4019_v53 = vmul.f32 %v3987_v40, %v3987_v40  ;;  %v4020_v20 = vmul.f32 %v3988_v18, %v3988_v18  ;;  %v4021_v47 = vmul.f32 %v3989_v50, %v3989_v50  ;;  %v4022_v30 = vmul.f32 %v3990_v19, %v3990_v19 }
 0x22f   : > { %v4023_v31 = vmul.f32 %v3991_v51, %v3991_v51  ;;  %v4024_v26 = vmul.f32 %v3992_v27, %v3992_v27  ;;  %v3995_v39 = vsub.f32 %v6675_v34, %v6772_v33  ;;  %v4025_v41 = vmul.f32 %v3993_v46, %v3993_v46 }
 0x230   : > { %v4051_v35 = vsel %vm3916_vm3, %v4019_v53, 0.0  ;;  %v4052_v29 = vsel %vm3916_vm3, %v4020_v20, 0.0  ;;  %v4054_v43 = vsel %vm3916_vm3, %v4021_v47, 0.0  ;;  %v4056_v37 = vsel %vm3916_vm3, %v4022_v30, 0.0 }
 0x231   : > { %v4053_v1 = vadd.f32 %v4052_v29, %v4051_v35  ;;  %v4058_v55 = vsel %vm3916_vm3, %v4023_v31, 0.0  ;;  %v3996_v48 = vsub.f32 %v6671_v2, %v6772_v33  ;;  %v4026_v57 = vmul.f32 %v3994_v45, %v3994_v45 }
 0x232   : > { %v4060_v62 = vsel %vm3916_vm3, %v4024_v26, 0.0  ;;  %v3997_v36 = vsub.f32 %v6683_v54, %v6772_v33  ;;  %v4027_v5 = vmul.f32 %v3995_v39, %v3995_v39  ;;  %v4062_v7 = vsel %vm3916_vm3, %v4025_v41, 0.0 }
 0x233   : > { %v4055_v3 = vadd.f32 %v4054_v43, %v4053_v1  ;;  %v3998_v34 = vsub.f32 %v6679_v63, %v6772_v33  ;;  %v4028_v9 = vmul.f32 %v3996_v48, %v3996_v48  ;;  %v4064_v12 = vsel %vm3916_vm3, %v4026_v57, 0.0 }
 0x234   : > { %v3999_v2 = vsub.f32 %v6691_v4, %v6772_v33  ;;  %v4029_v16 = vmul.f32 %v3997_v36, %v3997_v36  ;;  %v4066_v17 = vsel %vm3916_vm3, %v4027_v5, 0.0  ;;  %v4000_v54 = vsub.f32 %v6687_v61, %v6772_v33 }
 0x235   : > { %v4057_v23 = vadd.f32 %v4056_v37, %v4055_v3  ;;  %v4030_v18 = vmul.f32 %v3998_v34, %v3998_v34  ;;  %v4068_v50 = vsel %vm3916_vm3, %v4028_v9, 0.0  ;;  %v4001_v63 = vsub.f32 %v6699_v13, %v6772_v33 }
 0x236   : > { %v4031_v53 = vmul.f32 %v3999_v2, %v3999_v2  ;;  %v4070_v20 = vsel %vm3916_vm3, %v4029_v16, 0.0  ;;  %v4002_v4 = vsub.f32 %v6695_v10, %v6772_v33  ;;  %v4032_v47 = vmul.f32 %v4000_v54, %v4000_v54 }
 0x237   : > { %v4059_v49 = vadd.f32 %v4058_v55, %v4057_v23  ;;  %v4072_v27 = vsel %vm3916_vm3, %v4030_v18, 0.0  ;;  %v4003_v61 = vsub.f32 %v6707_v25, %v6772_v33  ;;  %v4033_v35 = vmul.f32 %v4001_v63, %v4001_v63 }
 0x238   : > { %v4074_v29 = vsel %vm3916_vm3, %v4031_v53, 0.0  ;;  %v4004_v13 = vsub.f32 %v6705_v42, %v6772_v33  ;;  %v4034_v46 = vmul.f32 %v4002_v4, %v4002_v4  ;;  %v4076_v31 = vsel %vm3916_vm3, %v4032_v47, 0.0 }
 0x239   : > { %v4061_v0 = vadd.f32 %v4060_v62, %v4059_v49  ;;  %v4005_v10 = vsub.f32 %v6715_v21, %v6772_v33  ;;  %v4035_v3 = vmul.f32 %v4003_v61, %v4003_v61  ;;  %v4078_v45 = vsel %vm3916_vm3, %v4033_v35, 0.0 }
 0x23a   : > { %v4006_v25 = vsub.f32 %v6711_v6, %v6772_v33  ;;  %v4036_v37 = vmul.f32 %v4004_v13, %v4004_v13  ;;  %v4080_v23 = vsel %vm3916_vm3, %v4034_v46, 0.0  ;;  %v4007_v42 = vsub.f32 %v6723_v28, %v6772_v33 }
 0x23b   : > { %v4063_v8 = vadd.f32 %v4062_v7, %v4061_v0  ;;  %v4037_v41 = vmul.f32 %v4005_v10, %v4005_v10  ;;  %v4082_v55 = vsel %vm3916_vm3, %v4035_v3, 0.0  ;;  %v4008_v21 = vsub.f32 %v6719_v24, %v6772_v33 }
 0x23c   : > { %v4038_v48 = vmul.f32 %v4006_v25, %v4006_v25  ;;  %v4084_v57 = vsel %vm3916_vm3, %v4036_v37, 0.0  ;;  %v4009_v6 = vsub.f32 %v6731_v60, %v6772_v33  ;;  %v4039_v0 = vmul.f32 %v4007_v42, %v4007_v42 }
 0x23d   : > { %v4065_v14 = vadd.f32 %v4064_v12, %v4063_v8  ;;  %v4086_v36 = vsel %vm3916_vm3, %v4037_v41, 0.0  ;;  %v4010_v28 = vsub.f32 %v6727_v56, %v6772_v33  ;;  %v4040_v7 = vmul.f32 %v4008_v21, %v4008_v21 }
 0x23e   : > { %v4088_v8 = vsel %vm3916_vm3, %v4038_v48, 0.0  ;;  %v4011_v24 = vsub.f32 %v6739_v15, %v6772_v33  ;;  %v4041_v9 = vmul.f32 %v4009_v6, %v4009_v6  ;;  %v4090_v12 = vsel %vm3916_vm3, %v4039_v0, 0.0 }
 0x23f   : > { %v4067_v40 = vadd.f32 %v4066_v17, %v4065_v14  ;;  %v4012_v60 = vsub.f32 %v6735_v11, %v6772_v33  ;;  %v4042_v2 = vmul.f32 %v4010_v28, %v4010_v28  ;;  %v4092_v16 = vsel %vm3916_vm3, %v4040_v7, 0.0 }
 0x240   : > { %v4013_v56 = vsub.f32 %v6747_v52, %v6772_v33  ;;  %v4094_v54 = vsel %vm3916_vm3, %v4041_v9, 0.0  ;;  %v4014_v15 = vsub.f32 %v6743_v44, %v6772_v33  ;;  %v4015_v11 = vsub.f32 %v6755_v59, %v6772_v33 }
 0x241   : > { %v4069_v19 = vadd.f32 %v4068_v50, %v4067_v40  ;;  %v4043_v40 = vmul.f32 %v4011_v24, %v4011_v24  ;;  %v4044_v50 = vmul.f32 %v4012_v60, %v4012_v60  ;;  %v4016_v52 = vsub.f32 %v6751_v38, %v6772_v33 }
 0x242   : > { %v4045_v53 = vmul.f32 %v4013_v56, %v4013_v56  ;;  %v4046_v4 = vmul.f32 %v4014_v15, %v4014_v15  ;;  %v4017_v44 = vsub.f32 %v6763_v58, %v6772_v33  ;;  %v4018_v59 = vsub.f32 %v6759_v32, %v6772_v33 }
 0x243   : > { %v4071_v51 = vadd.f32 %v4070_v20, %v4069_v19  ;;  %v4096_v19 = vsel %vm3916_vm3, %v4042_v2, 0.0  ;;  %v4098_v20 = vsel %vm3916_vm3, %v4043_v40, 0.0  ;;  %v4100_v47 = vsel %vm3916_vm3, %v4044_v50, 0.0 }
 0x244   : > { %v4102_v61 = vsel %vm3916_vm3, %v4045_v53, 0.0  ;;  %v4049_v38 = vmul.f32 %v4017_v44, %v4017_v44 }
 0x245   : > { %v4073_v30 = vadd.f32 %v4072_v27, %v4071_v51 }
 0x246   : > { %v4110_v3 = vsel %vm3916_vm3, %v4049_v38, 0.0 }
 0x247   : > { %v4075_v1 = vadd.f32 %v4074_v29, %v4073_v30  ;;  %v4047_v30 = vmul.f32 %v4015_v11, %v4015_v11  ;;  %v4048_v29 = vmul.f32 %v4016_v52, %v4016_v52 }
 0x249   : > { %v4077_v43 = vadd.f32 %v4076_v31, %v4075_v1  ;;  %v4104_v1 = vsel %vm3916_vm3, %v4046_v4, 0.0  ;;  %v4106_v46 = vsel %vm3916_vm3, %v4047_v30, 0.0  ;;  %v4108_v10 = vsel %vm3916_vm3, %v4048_v29, 0.0 }
 0x24b   : > { %v4079_v26 = vadd.f32 %v4078_v45, %v4077_v43  ;;  %v4050_v43 = vmul.f32 %v4018_v59, %v4018_v59 }
 0x24d   : > { %v4081_v39 = vadd.f32 %v4080_v23, %v4079_v26  ;;  %v4112_v26 = vsel %vm3916_vm3, %v4050_v43, 0.0 }
 0x24f   : > { %v4083_v49 = vadd.f32 %v4082_v55, %v4081_v39 }
 0x251   : > { %v4085_v62 = vadd.f32 %v4084_v57, %v4083_v49 }
 0x253   : > { %v4087_v5 = vadd.f32 %v4086_v36, %v4085_v62 }
 0x255   : > { %v4089_v34 = vadd.f32 %v4088_v8, %v4087_v5 }
 0x257   : > { %v4091_v14 = vadd.f32 %v4090_v12, %v4089_v34 }
 0x259   : > { %v4093_v17 = vadd.f32 %v4092_v16, %v4091_v14 }
 0x25b   : > { %v4095_v18 = vadd.f32 %v4094_v54, %v4093_v17 }
 0x25d   : > { %v4097_v63 = vadd.f32 %v4096_v19, %v4095_v18 }
 0x25f   : > { %v4099_v51 = vadd.f32 %v4098_v20, %v4097_v63 }
 0x261   : > { %v4101_v27 = vadd.f32 %v4100_v47, %v4099_v51 }
 0x263   : > { %v4103_v35 = vadd.f32 %v4102_v61, %v4101_v27 }
 0x265   : > { %v4105_v13 = vadd.f32 %v4104_v1, %v4103_v35 }
 0x267   : > { %v4107_v31 = vadd.f32 %v4106_v46, %v4105_v13 }
 0x269   : > { %v4109_v58 = vadd.f32 %v4108_v10, %v4107_v31 }
 0x26b   : > { %v4111_v45 = vadd.f32 %v4110_v3, %v4109_v58 }
 0x26d   : > { %v4113_v25 = vadd.f32 %v4112_v26, %v4111_v45 }
 0x26f   : > { %v4114_v32 = vrot.slane %v4113_v25, 4 }
 0x271   : > { %v4115_v33 = vadd.f32 %v4114_v32, %v4113_v25 }
 0x273   : > { %v4116_v37 = vrot.slane %v4115_v33, 2 }
 0x275   : > { %v4117_v23 = vadd.f32 %v4116_v37, %v4115_v33 }
 0x277   : > { %v4118_v39 = vrot.slane %v4117_v23, 1 }
 0x279   : > { %v4119_v42 = vadd.f32 %v4118_v39, %v4117_v23 }
 0x27b   : > { %v4121_v41 = vsel %vm4120_vm4, %v6769_v22, %v4119_v42 }
 0x27c   : > { %4123 = vst.msk [vmem:[%s302_s29] sm:$0x3] %vm4122_vm5, %v4121_v41 }
 0x27d PF: > { %s14_s17 = sadd.s32 1, %s5662_s17   ;;  %s6993_s15 = smov %s5658_s16 }
 0x27e   : > { %p11_p5 = scmp.ge.s32.totalorder %s14_s17, 4   ;;  %s6994_s16 = smov %s6996_s18 }
 0x280   :  { %13 = sbr.rel (!%p11_p5) target bundleno = 2 (0x2), region = 83 }

// kernel: cbrblock_forward.3
= control target key start
LH: loop header
LB: loop body
LE: loop exit
PB: predicated region body
PF: predicated region fallthrough
CT: control target
= control target key end

     0   :  { %s5740_s21 = smov 0   ;;  %s5742_s22 = smov 0   ;;  %s6788_s0 = inlined_call_operand.vmem [shape: bf16[2,16,18,4], index: 0, kind: input, shape index: {}]   ;;  %s6789_s1 = inlined_call_operand.vmem [shape: bf16[2,1,18,4], index: 1, kind: input, shape index: {}, may-alias: {1,2}]   ;;  %s6790_s2 = inlined_call_operand.vmem [shape: bf16[2,1,18,4], index: 2, kind: input, shape index: {}, may-alias: {1,2}]   ;;  %s6791_s3 = inlined_call_operand.vmem [shape: f32[9,4,8], index: 3, kind: input, shape index: {}]   ;;  %s6792_s4 = inlined_call_operand.vmem [shape: f32[1,8], index: 4, kind: input, shape index: {}]   ;;  %s6793_s5 = inlined_call_operand.vmem [shape: f32[1,8], index: 5, kind: input, shape index: {}]   ;;  %s6794_s6 = inlined_call_operand.vmem [shape: f32[2,8,256], index: 6, kind: output, shape index: {}]  }
   0x1   :  { %s5744_s23 = smov 0  }
   0x2 LB: > { %s28_s24 = sadd.s32 1, %s5699_s22  ;;  %p4287_p0 = scmp.ge.s32.totalorder %s5703_s23, 1  ;;  %s5703_s23 = sphi %s5744_s23, %s16_s23   ;;  %s5699_s22 = sphi %s5742_s22, %s6900_s22   ;;  %s5695_s21 = sphi %s5740_s21, %s6899_s21  }
   0x3   : > { %p30_p1 = scmp.ge.s32.totalorder %s28_s24, 2  ;;  %p266_p2 = scmp.lt.s32.totalorder %s5703_s23, 3 }
   0x5   : > { %s6902_s24 = smov (%p30_p1, %s28_s24), 0  ;;  %p267_p3 = pnand %p4287_p0, %p266_p2 }
   0x7   : > { %270 = sbr.rel (%p267_p3) target bundleno = 645 (0x285), region = 44 }
   0xe   : > { %v4293_v0 = vld [vmem:[%s6791_s3 + $0x4] sm:$0xf]  ;;  %vm691_vm0 = vcmask 1043456   ;;  %v5764_v1 = vld [vmem:[%s6791_s3 + $0x10] sm:$0xf]  ;;  %p324_p4 = scmp.lt.s32.totalorder %s5695_s21, 1 }
   0xf   : > { %4947 = vmatprep.subr.msk.mxu1 %vm691_vm0, %v4293_v0  ;;  %5147 = vmatprep.subr.msk.mxu0 %vm691_vm0, %v5764_v1  ;;  %v5772_v2 = vld [vmem:[%s6791_s3] sm:$0xf]  ;;  %v5777_v3 = vld [vmem:[%s6791_s3 + $0x14] sm:$0xf]  ;;  %vm368_vm1 = vcmask 31744   ;;  %vm371_vm2 = vcmask 25600  }
  0x10   : > { %4948 = vmatpush3.msk.msra.mxu1 %vm691_vm0, %v4293_v0  ;;  %5148 = vmatpush3.msk.msra.mxu0 %vm691_vm0, %v5764_v1  ;;  %s6904_s21 = smov (!%p324_p4, %s5695_s21), 1 }
  0x11   : > { %4997 = vmatprep.subr.msk.mxu1 %vm691_vm0, %v5772_v2  ;;  %5197 = vmatprep.subr.msk.mxu0 %vm691_vm0, %v5777_v3  ;;  %s5655_s9 = smul.u32 192, %s6904_s21  ;;  %s4602_s14 = sshll.u32 %s6904_s21, 4 }
  0x12   : > { %s5656_s10 = smul.u32 12, %s6904_s21  ;;  %s360_s17 = scalar_lea.vmem %s6794_s6, %s4602_s14 }
  0x13   : > { %s5793_s13 = scalar_lea.vmem %s6788_s0, %s5655_s9 }
  0x14   : > { %s342_s16 = scalar_lea.vmem %s6789_s1, %s5656_s10  ;;  %v4608_v4 = vld [vmem:[%s5793_s13] sm:$0xff]   ;;  %v375_v5 = vld [vmem:[%s5793_s13 + $0x8] sm:$0x1]  ;;  %v376_v6 = vld [vmem:[%s5793_s13 + $0xc] sm:$0xff]   ;;  %s5992_s27 = scalar_lea.vmem %s6790_s2, %s5656_s10 }
  0x15   : > { %v4604_v7 = vld [vmem:[%s342_s16] sm:$0xff]   ;;  %v364_v8 = vld [vmem:[%s342_s16 + $0x8] sm:$0x1]  ;;  %v4609_v9 = vunpack.c.l.bf16 %v4608_v4  ;;  %v4610_v10 = vunpack.c.h.bf16 %v4608_v4  ;;  %v423_v11 = vunpack.c.l.bf16 %v375_v5  ;;  %v424_v12 = vunpack.c.l.bf16 %v376_v6  ;;  %v378_v13 = vld [vmem:[%s5793_s13 + $0x14] sm:$0x1] }
  0x16   : > { %v4605_v14 = vunpack.c.l.bf16 %v4604_v7  ;;  %v4606_v15 = vunpack.c.h.bf16 %v4604_v7  ;;  %v367_v16 = vunpack.c.l.bf16 %v364_v8  ;;  %v425_v17 = vunpack.c.h.bf16 %v376_v6  ;;  %v4643_v18 = vld [vmem:[%s5793_s13 + $0x18] sm:$0xff]   ;;  %v381_v19 = vld [vmem:[%s5793_s13 + $0x20] sm:$0x1]  ;;  %v382_v20 = vld [vmem:[%s5793_s13 + $0x24] sm:$0xff]  }
  0x17   : > { %470 = vst.msk [vmem:[#allocation2 + $0x18] sm:$0xff] %vm368_vm1, %v4609_v9  ;;  %471 = vst.msk [vmem:[#allocation2 + $0x20] sm:$0xff] %vm368_vm1, %v4610_v10  ;;  %v426_v21 = vunpack.c.l.bf16 %v378_v13  ;;  %v4613_v22 = vunpack.c.l.bf16 %v4643_v18  ;;  %v4614_v23 = vunpack.c.h.bf16 %v4643_v18  ;;  %v429_v24 = vunpack.c.l.bf16 %v381_v19  ;;  %v384_v25 = vld [vmem:[%s5793_s13 + $0x2c] sm:$0x1]  ;;  %v4644_v26 = vld [vmem:[%s5793_s13 + $0x30] sm:$0xff]  }
  0x18   : > { %472 = vst.msk [vmem:[#allocation2 + $0x28] sm:$0x3] %vm371_vm2, %v423_v11  ;;  %v387_v27 = vld [vmem:[%s5793_s13 + $0x38] sm:$0x1]  ;;  %372 = vst.msk [vmem:[#allocation2 + $0x10] sm:$0x3] %vm371_vm2, %v367_v16  ;;  %v430_v28 = vunpack.c.l.bf16 %v382_v20  ;;  %v431_v29 = vunpack.c.h.bf16 %v382_v20  ;;  %v432_v30 = vunpack.c.l.bf16 %v384_v25  ;;  %v4617_v31 = vunpack.c.l.bf16 %v4644_v26 }
  0x19   : > { %473 = vst.msk [vmem:[#allocation2 + $0x30] sm:$0xff] %vm368_vm1, %v424_v12  ;;  %369 = vst.msk [vmem:[#allocation2] sm:$0xff] %vm368_vm1, %v4605_v14  ;;  %v388_v32 = vld [vmem:[%s5793_s13 + $0x3c] sm:$0xff]   ;;  %v390_v33 = vld [vmem:[%s5793_s13 + $0x44] sm:$0x1]  ;;  %v4618_v35 = vunpack.c.h.bf16 %v4644_v26  ;;  %v435_v36 = vunpack.c.l.bf16 %v387_v27 }
  0x1a   : > { %370 = vst.msk [vmem:[#allocation2 + $0x8] sm:$0xff] %vm368_vm1, %v4606_v15  ;;  %474 = vst.msk [vmem:[#allocation2 + $0x38] sm:$0xff] %vm368_vm1, %v425_v17  ;;  %v4645_v34 = vld [vmem:[%s5793_s13 + $0x48] sm:$0xff]   ;;  %v436_v37 = vunpack.c.l.bf16 %v388_v32  ;;  %v437_v38 = vunpack.c.h.bf16 %v388_v32  ;;  %v393_v39 = vld [vmem:[%s5793_s13 + $0x50] sm:$0x1]  ;;  %v438_v42 = vunpack.c.l.bf16 %v390_v33 }
  0x1b   : > { %475 = vst.msk [vmem:[#allocation2 + $0x40] sm:$0x3] %vm371_vm2, %v426_v21  ;;  %478 = vst.msk [vmem:[#allocation2 + $0x58] sm:$0x3] %vm371_vm2, %v429_v24  ;;  %v394_v40 = vld [vmem:[%s5793_s13 + $0x54] sm:$0xff]   ;;  %v4621_v43 = vunpack.c.l.bf16 %v4645_v34  ;;  %v4622_v44 = vunpack.c.h.bf16 %v4645_v34  ;;  %v441_v45 = vunpack.c.l.bf16 %v393_v39  ;;  %v4646_v46 = vld [vmem:[%s5793_s13 + $0x60] sm:$0xff]  }
  0x1c   : > { %476 = vst.msk [vmem:[#allocation2 + $0x48] sm:$0xff] %vm368_vm1, %v4613_v22  ;;  %477 = vst.msk [vmem:[#allocation2 + $0x50] sm:$0xff] %vm368_vm1, %v4614_v23  ;;  %v396_v41 = vld [vmem:[%s5793_s13 + $0x5c] sm:$0x1]  ;;  %v399_v47 = vld [vmem:[%s5793_s13 + $0x68] sm:$0x1]  ;;  %v442_v49 = vunpack.c.l.bf16 %v394_v40  ;;  %v443_v50 = vunpack.c.h.bf16 %v394_v40  ;;  %v4625_v52 = vunpack.c.l.bf16 %v4646_v46  ;;  %v4626_v56 = vunpack.c.h.bf16 %v4646_v46 }
  0x1d   : > { %479 = vst.msk [vmem:[#allocation2 + $0x60] sm:$0xff] %vm368_vm1, %v430_v28  ;;  %480 = vst.msk [vmem:[#allocation2 + $0x68] sm:$0xff] %vm368_vm1, %v431_v29  ;;  %v400_v48 = vld [vmem:[%s5793_s13 + $0x6c] sm:$0xff]   ;;  %v444_v51 = vunpack.c.l.bf16 %v396_v41  ;;  %v402_v53 = vld [vmem:[%s5793_s13 + $0x74] sm:$0x1]  ;;  %v447_v57 = vunpack.c.l.bf16 %v399_v47 }
  0x1e   : > { %481 = vst.msk [vmem:[#allocation2 + $0x70] sm:$0x3] %vm371_vm2, %v432_v30  ;;  %484 = vst.msk [vmem:[#allocation2 + $0x88] sm:$0x3] %vm371_vm2, %v435_v36  ;;  %v4647_v54 = vld [vmem:[%s5793_s13 + $0x78] sm:$0xff]   ;;  %v448_v58 = vunpack.c.l.bf16 %v400_v48  ;;  %v449_v59 = vunpack.c.h.bf16 %v400_v48  ;;  %v406_v60 = vld [vmem:[%s5793_s13 + $0x84] sm:$0xff]   ;;  %v450_v63 = vunpack.c.l.bf16 %v402_v53 }
  0x1f   : > { %482 = vst.msk [vmem:[#allocation2 + $0x78] sm:$0xff] %vm368_vm1, %v4617_v31  ;;  %483 = vst.msk [vmem:[#allocation2 + $0x80] sm:$0xff] %vm368_vm1, %v4618_v35  ;;  %v405_v55 = vld [vmem:[%s5793_s13 + $0x80] sm:$0x1]  ;;  %v408_v61 = vld [vmem:[%s5793_s13 + $0x8c] sm:$0x1]  ;;  %v4629_v0 = vunpack.c.l.bf16 %v4647_v54  ;;  %v4630_v4 = vunpack.c.h.bf16 %v4647_v54  ;;  %v454_v11 = vunpack.c.l.bf16 %v406_v60  ;;  %v455_v12 = vunpack.c.h.bf16 %v406_v60 }
  0x20   : > { %485 = vst.msk [vmem:[#allocation2 + $0x90] sm:$0xff] %vm368_vm1, %v436_v37  ;;  %486 = vst.msk [vmem:[#allocation2 + $0x98] sm:$0xff] %vm368_vm1, %v437_v38  ;;  %v4648_v62 = vld [vmem:[%s5793_s13 + $0x90] sm:$0xff]   ;;  %v453_v5 = vunpack.c.l.bf16 %v405_v55  ;;  %v411_v6 = vld [vmem:[%s5793_s13 + $0x98] sm:$0x1]  ;;  %v456_v13 = vunpack.c.l.bf16 %v408_v61 }
  0x21   : > { %487 = vst.msk [vmem:[#allocation2 + $0xa0] sm:$0x3] %vm371_vm2, %v438_v42  ;;  %490 = vst.msk [vmem:[#allocation2 + $0xb8] sm:$0x3] %vm371_vm2, %v441_v45  ;;  %v412_v7 = vld [vmem:[%s5793_s13 + $0x9c] sm:$0xff]   ;;  %v4633_v14 = vunpack.c.l.bf16 %v4648_v62  ;;  %v562_v16 = vld [vmem:[#allocation2 + $0x9] sm:$0xff]  ;;  %v4634_v17 = vunpack.c.h.bf16 %v4648_v62  ;;  %v459_v18 = vunpack.c.l.bf16 %v411_v6 }
  0x22   : > { %488 = vst.msk [vmem:[#allocation2 + $0xa8] sm:$0xff] %vm368_vm1, %v4621_v43  ;;  %489 = vst.msk [vmem:[#allocation2 + $0xb0] sm:$0xff] %vm368_vm1, %v4622_v44  ;;  %v414_v8 = vld [vmem:[%s5793_s13 + $0xa4] sm:$0x1]  ;;  %v2024_v9 = vld [vmem:[#allocation2 + $0x19] sm:$0xff]  ;;  %v460_v19 = vunpack.c.l.bf16 %v412_v7  ;;  %v461_v20 = vunpack.c.h.bf16 %v412_v7 }
  0x23   : > { %491 = vst.msk [vmem:[#allocation2 + $0xc0] sm:$0xff] %vm368_vm1, %v442_v49  ;;  %492 = vst.msk [vmem:[#allocation2 + $0xc8] sm:$0xff] %vm368_vm1, %v443_v50  ;;  %v2025_v10 = vld [vmem:[#allocation2 + $0x21] sm:$0xff]  ;;  %5149 = vmatprep.mubr.msk.f32.mxu0 %vm368_vm1, %v2024_v9  ;;  %v5867_v21 = vld [vmem:[#allocation2 + $0x31] sm:$0xff]  ;;  %v462_v23 = vunpack.c.l.bf16 %v414_v8 }
  0x24   : > { %493 = vst.msk [vmem:[#allocation2 + $0xd0] sm:$0x3] %vm371_vm2, %v444_v51  ;;  %496 = vst.msk [vmem:[#allocation2 + $0xe8] sm:$0x3] %vm371_vm2, %v447_v57  ;;  %v561_v15 = vld [vmem:[#allocation2 + $0x1] sm:$0xff]  ;;  %5150 = vmatmul.mubr.msk.f32.vlgmr.msra.gmra.mrb[0].mxu0 %vm368_vm1, %v2025_v10  ;;  %v5881_v24 = vld [vmem:[#allocation2 + $0x39] sm:$0xff] }
  0x25   : > { %494 = vst.msk [vmem:[#allocation2 + $0xd8] sm:$0xff] %vm368_vm1, %v4625_v52  ;;  %495 = vst.msk [vmem:[#allocation2 + $0xe0] sm:$0xff] %vm368_vm1, %v4626_v56  ;;  %4949 = vmatprep.mubr.msk.f32.mxu1 %vm368_vm1, %v561_v15  ;;  %v5872_v22 = vld [vmem:[%s6791_s3 + $0x18] sm:$0xf]  ;;  %5198 = vmatpush3.msk.msra.mxu0 %vm691_vm0, %v5777_v3  ;;  %v5890_v25 = vld [vmem:[%s6791_s3 + $0x8] sm:$0xf] }
  0x26   : > { %497 = vst.msk [vmem:[#allocation2 + $0xf0] sm:$0xff] %vm368_vm1, %v448_v58  ;;  %498 = vst.msk [vmem:[#allocation2 + $0xf8] sm:$0xff] %vm368_vm1, %v449_v59  ;;  %4950 = vmatmul.mubr.msk.f32.vlgmr.msra.gmra.mrb[0].mxu1 %vm368_vm1, %v562_v16  ;;  %v5895_v3 = vld [vmem:[#allocation2 + $0x49] sm:$0xff]  ;;  %5152 = vmatprep.mubr.msk.f32.mxu0 %vm368_vm1, %v5867_v21  ;;  %v5913_v26 = vld [vmem:[#allocation2 + $0x61] sm:$0xff] }
  0x27   : > { %499 = vst.msk [vmem:[#allocation2 + $0x100] sm:$0x3] %vm371_vm2, %v450_v63  ;;  %502 = vst.msk [vmem:[#allocation2 + $0x118] sm:$0x3] %vm371_vm2, %v453_v5  ;;  %4998 = vmatpush3.msk.msra.mxu1 %vm691_vm0, %v5772_v2  ;;  %4952 = vmatprep.mubr.msk.f32.mxu1 %vm368_vm1, %v2024_v9  ;;  %v5909_v2 = vld [vmem:[#allocation2 + $0x51] sm:$0xff]  ;;  %v5921_v27 = vld [vmem:[#allocation2 + $0x69] sm:$0xff] }
  0x28   : > { %500 = vst.msk [vmem:[#allocation2 + $0x108] sm:$0xff] %vm368_vm1, %v4629_v0  ;;  %501 = vst.msk [vmem:[#allocation2 + $0x110] sm:$0xff] %vm368_vm1, %v4630_v4  ;;  %5247 = vmatprep.subr.msk.mxu0 %vm691_vm0, %v5872_v22  ;;  %5153 = vmatmul.mubr.msk.f32.gmra.mrb[2].mxu0 %vm368_vm1, %v5881_v24  ;;  %v5925_v28 = vld [vmem:[#allocation2 + $0x79] sm:$0xff]  ;;  %v4649_v29 = vld [vmem:[%s5793_s13 + $0xa8] sm:$0xff]  }
  0x29   : > { %503 = vst.msk [vmem:[#allocation2 + $0x120] sm:$0xff] %vm368_vm1, %v454_v11  ;;  %504 = vst.msk [vmem:[#allocation2 + $0x128] sm:$0xff] %vm368_vm1, %v455_v12  ;;  %5047 = vmatprep.subr.msk.mxu1 %vm691_vm0, %v5890_v25  ;;  %5155 = vmatprep.mubr.msk.f32.mxu0 %vm368_vm1, %v5895_v3  ;;  %v5934_v30 = vld [vmem:[#allocation2 + $0x81] sm:$0xff]  ;;  %v4637_v31 = vunpack.c.l.bf16 %v4649_v29  ;;  %v4638_v32 = vunpack.c.h.bf16 %v4649_v29  ;;  %v417_v33 = vld [vmem:[%s5793_s13 + $0xb0] sm:$0x1] }
  0x2a   : > { %505 = vst.msk [vmem:[#allocation2 + $0x130] sm:$0x3] %vm371_vm2, %v456_v13  ;;  %508 = vst.msk [vmem:[#allocation2 + $0x148] sm:$0x3] %vm371_vm2, %v459_v18  ;;  %4953 = vmatmul.mubr.msk.f32.gmra.mrb[2].mxu1 %vm368_vm1, %v2025_v10  ;;  %v5939_v34 = vld [vmem:[#allocation2 + $0x91] sm:$0xff]  ;;  %v465_v35 = vunpack.c.l.bf16 %v417_v33  ;;  %v5950_v36 = vld [vmem:[#allocation2 + $0x99] sm:$0xff] }
  0x2b   : > { %506 = vst.msk [vmem:[#allocation2 + $0x138] sm:$0xff] %vm368_vm1, %v4633_v14  ;;  %507 = vst.msk [vmem:[#allocation2 + $0x140] sm:$0xff] %vm368_vm1, %v4634_v17  ;;  %4955 = vmatprep.mubr.msk.f32.mxu1 %vm368_vm1, %v5867_v21  ;;  %v5954_v37 = vld [vmem:[#allocation2 + $0xa9] sm:$0xff]  ;;  %v5962_v38 = vld [vmem:[#allocation2 + $0xb1] sm:$0xff] }
  0x2c   : > { %509 = vst.msk [vmem:[#allocation2 + $0x150] sm:$0xff] %vm368_vm1, %v460_v19  ;;  %510 = vst.msk [vmem:[#allocation2 + $0x158] sm:$0xff] %vm368_vm1, %v461_v20  ;;  %5156 = vmatmul.mubr.msk.f32.gmra.mrb[4].mxu0 %vm368_vm1, %v5909_v2  ;;  %v5966_v39 = vld [vmem:[#allocation2 + $0xc1] sm:$0xff]  ;;  %v418_v40 = vld [vmem:[%s5793_s13 + $0xb4] sm:$0xff]  }
  0x2d   : > { %511 = vst.msk [vmem:[#allocation2 + $0x160] sm:$0x3] %vm371_vm2, %v462_v23  ;;  %5158 = vmatprep.mubr.msk.f32.mxu0 %vm368_vm1, %v5913_v26  ;;  %514 = vst.msk [vmem:[#allocation2 + $0x178] sm:$0x3] %vm371_vm2, %v465_v35  ;;  %v5975_v41 = vld [vmem:[#allocation2 + $0xc9] sm:$0xff]  ;;  %v466_v42 = vunpack.c.l.bf16 %v418_v40  ;;  %v467_v43 = vunpack.c.h.bf16 %v418_v40  ;;  %v5980_v45 = vld [vmem:[#allocation2 + $0x1a] sm:$0xff] }
  0x2e   : > { %4956 = vmatmul.mubr.msk.f32.gmra.mrb[4].mxu1 %vm368_vm1, %v5881_v24  ;;  %512 = vst.msk [vmem:[#allocation2 + $0x168] sm:$0xff] %vm368_vm1, %v4637_v31  ;;  %513 = vst.msk [vmem:[#allocation2 + $0x170] sm:$0xff] %vm368_vm1, %v4638_v32  ;;  %v420_v44 = vld [vmem:[%s5793_s13 + $0xbc] sm:$0x1]  ;;  %v5998_v47 = vld [vmem:[#allocation2 + $0x22] sm:$0xff] }
  0x2f   : > { %4958 = vmatprep.mubr.msk.f32.mxu1 %vm368_vm1, %v5895_v3  ;;  %v468_v46 = vunpack.c.l.bf16 %v420_v44  ;;  %515 = vst.msk [vmem:[#allocation2 + $0x180] sm:$0xff] %vm368_vm1, %v466_v42  ;;  %516 = vst.msk [vmem:[#allocation2 + $0x188] sm:$0xff] %vm368_vm1, %v467_v43  ;;  %v6002_v48 = vld [vmem:[#allocation2 + $0xd9] sm:$0xff]  ;;  %v6024_v55 = vld [vmem:[#allocation2 + $0xe1] sm:$0xff] }
  0x30   : > { %5159 = vmatmul.mubr.msk.f32.gmra.mrb[6].mxu0 %vm368_vm1, %v5921_v27  ;;  %v6004_v49 = vld [vmem:[#allocation2 + $0x32] sm:$0xff]  ;;  %v4640_v50 = vld [vmem:[%s5992_s27] sm:$0xff]   ;;  %v6012_v51 = vld [vmem:[%s6791_s3 + $0x1c] sm:$0xf] }
  0x31   : > { %5161 = vmatprep.mubr.msk.f32.mxu0 %vm368_vm1, %v5925_v28  ;;  %517 = vst.msk [vmem:[#allocation2 + $0x190] sm:$0x3] %vm371_vm2, %v468_v46  ;;  %v4641_v52 = vunpack.c.l.bf16 %v4640_v50  ;;  %v4642_v53 = vunpack.c.h.bf16 %v4640_v50  ;;  %v6018_v54 = vld [vmem:[#allocation2 + $0x3a] sm:$0xff]  ;;  %v6026_v56 = vld [vmem:[#allocation2 + $0x4a] sm:$0xff]  ;;  %v6040_v58 = vld [vmem:[#allocation2 + $0x52] sm:$0xff] }
  0x32   : > { %4959 = vmatmul.mubr.msk.f32.gmra.mrb[6].mxu1 %vm368_vm1, %v5909_v2  ;;  %v6030_v57 = vld [vmem:[#allocation2 + $0xf1] sm:$0xff]  ;;  %v6044_v59 = vld [vmem:[#allocation2 + $0xf9] sm:$0xff]  ;;  %v6046_v60 = vld [vmem:[#allocation2 + $0x62] sm:$0xff] }
  0x33   : > { %4961 = vmatprep.mubr.msk.f32.mxu1 %vm368_vm1, %v5913_v26  ;;  %525 = vst.msk [vmem:[#allocation2 + $0x198] sm:$0xff] %vm368_vm1, %v4641_v52  ;;  %526 = vst.msk [vmem:[#allocation2 + $0x1a0] sm:$0xff] %vm368_vm1, %v4642_v53  ;;  %v6048_v61 = vld [vmem:[#allocation2 + $0x109] sm:$0xff]  ;;  %v6060_v63 = vld [vmem:[#allocation2 + $0x111] sm:$0xff] }
  0x34   : > { %5162 = vmatmul.mubr.msk.f32.gmra.mrb[8].mxu0 %vm368_vm1, %v5934_v30  ;;  %6837 = vst [vmem:[#allocation3_spill] sm:$0xff] %v6030_v57  ;;  %6838 = vst [vmem:[#allocation4_spill] sm:$0xff] %v6044_v59  ;;  %v6056_v62 = vld [vmem:[#allocation2 + $0x6a] sm:$0xff]  ;;  %v6062_v0 = vld [vmem:[#allocation2 + $0x7a] sm:$0xff] }
  0x35   : > { %5164 = vmatprep.mubr.msk.f32.mxu0 %vm368_vm1, %v5939_v34  ;;  %6839 = vst [vmem:[#allocation5_spill] sm:$0xff] %v6048_v61  ;;  %6840 = vst [vmem:[#allocation6_spill] sm:$0xff] %v6060_v63  ;;  %v6064_v4 = vld [vmem:[#allocation2 + $0x121] sm:$0xff]  ;;  %v6076_v6 = vld [vmem:[#allocation2 + $0x129] sm:$0xff] }
  0x36   : > { %4962 = vmatmul.mubr.msk.f32.gmra.mrb[8].mxu1 %vm368_vm1, %v5921_v27  ;;  %6841 = vst [vmem:[#allocation7_spill] sm:$0xff] %v6064_v4  ;;  %v6072_v5 = vld [vmem:[#allocation2 + $0x82] sm:$0xff]  ;;  %6842 = vst [vmem:[#allocation8_spill] sm:$0xff] %v6076_v6  ;;  %v6078_v7 = vld [vmem:[#allocation2 + $0x92] sm:$0xff] }
  0x37   : > { %4964 = vmatprep.mubr.msk.f32.mxu1 %vm368_vm1, %v5925_v28  ;;  %v6080_v8 = vld [vmem:[#allocation2 + $0x139] sm:$0xff]  ;;  %v6092_v10 = vld [vmem:[#allocation2 + $0x141] sm:$0xff]  ;;  %v6094_v11 = vld [vmem:[#allocation2 + $0xaa] sm:$0xff] }
  0x38   : > { %5165 = vmatmul.mubr.msk.f32.gmra.mrb[10].mxu0 %vm368_vm1, %v5950_v36  ;;  %6843 = vst [vmem:[#allocation9_spill] sm:$0xff] %v6080_v8  ;;  %v6088_v9 = vld [vmem:[#allocation2 + $0x9a] sm:$0xff]  ;;  %6844 = vst [vmem:[#allocation10_spill] sm:$0xff] %v6092_v10  ;;  %v6096_v12 = vld [vmem:[#allocation2 + $0x151] sm:$0xff] }
  0x39   : > { %5167 = vmatprep.mubr.msk.f32.mxu0 %vm368_vm1, %v5954_v37  ;;  %6845 = vst [vmem:[#allocation11_spill] sm:$0xff] %v6096_v12  ;;  %v6104_v13 = vld [vmem:[#allocation2 + $0xb2] sm:$0xff]  ;;  %v6110_v15 = vld [vmem:[#allocation2 + $0xc2] sm:$0xff]  ;;  %v6120_v17 = vld [vmem:[#allocation2 + $0xca] sm:$0xff] }
  0x3a   : > { %4965 = vmatmul.mubr.msk.f32.gmra.mrb[10].mxu1 %vm368_vm1, %v5934_v30  ;;  %v6108_v14 = vld [vmem:[#allocation2 + $0x159] sm:$0xff]  ;;  %v6112_v16 = vld [vmem:[#allocation2 + $0x169] sm:$0xff]  ;;  %v6124_v18 = vld [vmem:[#allocation2 + $0x171] sm:$0xff] }
  0x3b   : > { %4967 = vmatprep.mubr.msk.f32.mxu1 %vm368_vm1, %v5939_v34  ;;  %6846 = vst [vmem:[#allocation12_spill] sm:$0xff] %v6108_v14  ;;  %6847 = vst [vmem:[#allocation13_spill] sm:$0xff] %v6112_v16  ;;  %v6126_v19 = vld [vmem:[#allocation2 + $0xda] sm:$0xff]  ;;  %v529_v23 = vld [vmem:[#allocation2 + $0x8] sm:$0xff] }
  0x3c   : > { %5168 = vmatmul.mubr.msk.f32.gmra.mrb[12].mxu0 %vm368_vm1, %v5962_v38  ;;  %6848 = vst [vmem:[#allocation14_spill] sm:$0xff] %v6124_v18  ;;  %v528_v20 = vld [vmem:[#allocation2] sm:$0xff]  ;;  %v6137_v29 = vld [vmem:[#allocation2 + $0xf2] sm:$0xff]  ;;  %v6146_v32 = vld [vmem:[%s6791_s3 + $0xc] sm:$0xf] }
  0x3d   : > { %5170 = vmatprep.mubr.msk.f32.mxu0 %vm368_vm1, %v5966_v39  ;;  %v6139_v31 = vld [vmem:[#allocation2 + $0x18] sm:$0xff]  ;;  %v6157_v35 = vld [vmem:[#allocation2 + $0x20] sm:$0xff]  ;;  %v6159_v40 = vld [vmem:[#allocation2 + $0x10a] sm:$0xff] }
  0x3e   : > { %4968 = vmatmul.mubr.msk.f32.gmra.mrb[12].mxu1 %vm368_vm1, %v5950_v36  ;;  %6849 = vst [vmem:[#allocation15_spill] sm:$0xff] %v6139_v31  ;;  %v6151_v33 = vld [vmem:[#allocation2 + $0xfa] sm:$0xff]  ;;  %6850 = vst [vmem:[#allocation16_spill] sm:$0xff] %v6157_v35  ;;  %v6161_v42 = vld [vmem:[#allocation2 + $0x30] sm:$0xff] }
  0x3f   : > { %4970 = vmatprep.mubr.msk.f32.mxu1 %vm368_vm1, %v5954_v37  ;;  %6851 = vst [vmem:[#allocation17_spill] sm:$0xff] %v6161_v42  ;;  %v6175_v43 = vld [vmem:[#allocation2 + $0x38] sm:$0xff]  ;;  %v6177_v44 = vld [vmem:[#allocation2 + $0x122] sm:$0xff]  ;;  %v6187_v50 = vld [vmem:[#allocation2 + $0x12a] sm:$0xff] }
  0x40   : > { %5171 = vmatmul.mubr.msk.f32.gmra.mrb[14].mxu0 %vm368_vm1, %v5975_v41  ;;  %6852 = vst [vmem:[#allocation18_spill] sm:$0xff] %v6175_v43  ;;  %v6179_v46 = vld [vmem:[#allocation2 + $0x48] sm:$0xff]  ;;  %v6191_v52 = vld [vmem:[#allocation2 + $0x50] sm:$0xff]  ;;  %v6193_v53 = vld [vmem:[#allocation2 + $0x13a] sm:$0xff] }
  0x41   : > { %5199 = vmatprep.mubr.msk.f32.mxu0 %vm368_vm1, %v5980_v45  ;;  %6853 = vst [vmem:[#allocation19_spill] sm:$0xff] %v6179_v46  ;;  %6854 = vst [vmem:[#allocation20_spill] sm:$0xff] %v6191_v52 }
  0x42   : > { %4971 = vmatmul.mubr.msk.f32.gmra.mrb[14].mxu1 %vm368_vm1, %v5962_v38 }
  0x43   : > { %4973 = vmatprep.mubr.msk.f32.mxu1 %vm368_vm1, %v5966_v39 }
  0x44   : > { %5200 = vmatmul.mubr.msk.f32.vlgmr.msra.gmra.mrb[0].mxu0 %vm368_vm1, %v5998_v47 }
  0x45   : > { %5248 = vmatpush3.msk.msra.mxu0 %vm691_vm0, %v5872_v22  ;;  %5202 = vmatprep.mubr.msk.f32.mxu0 %vm368_vm1, %v6004_v49  ;;  %v6134_v22 = vld [vmem:[#allocation2 + $0xe2] sm:$0xff] }
  0x46   : > { %4974 = vmatmul.mubr.msk.f32.gmra.mrb[16].mxu1 %vm368_vm1, %v5975_v41  ;;  %5297 = vmatprep.subr.msk.mxu0 %vm691_vm0, %v6012_v51 }
  0x47   : > { %4976 = vmatprep.mubr.msk.f32.mxu1 %vm368_vm1, %v6002_v48 }
  0x48   : > { %5203 = vmatmul.mubr.msk.f32.gmra.mrb[2].mxu0 %vm368_vm1, %v6018_v54 }
  0x49   : > { %5205 = vmatprep.mubr.msk.f32.mxu0 %vm368_vm1, %v6026_v56 }
  0x4a   : > { %4977 = vmatmul.mubr.msk.f32.gmra.mrb[18].mxu1 %vm368_vm1, %v6024_v55 }
  0x4b   : > { %4979 = vmatprep.mubr.msk.f32.mxu1 %vm368_vm1, %v6030_v57  ;;  %v6259_v57 = vld [vmem:[#allocation2 + $0xc0] sm:$0xff] }
  0x4c   : > { %5206 = vmatmul.mubr.msk.f32.gmra.mrb[4].mxu0 %vm368_vm1, %v6040_v58  ;;  %6866 = vst [vmem:[#allocation32_spill] sm:$0xff] %v6259_v57 }
  0x4d   : > { %5208 = vmatprep.mubr.msk.f32.mxu0 %vm368_vm1, %v6046_v60 }
  0x4e   : > { %4980 = vmatmul.mubr.msk.f32.gmra.mrb[20].mxu1 %vm368_vm1, %v6044_v59  ;;  %v6243_v59 = vld [vmem:[#allocation2 + $0x182] sm:$0xff] }
  0x4f   : > { %4982 = vmatprep.mubr.msk.f32.mxu1 %vm368_vm1, %v6048_v61  ;;  %v6236_v61 = vld [vmem:[#allocation2 + $0x172] sm:$0xff]  ;;  %6862 = vst [vmem:[#allocation28_spill] sm:$0xff] %v6243_v59 }
  0x50   : > { %5209 = vmatmul.mubr.msk.f32.gmra.mrb[6].mxu0 %vm368_vm1, %v6056_v62  ;;  %6860 = vst [vmem:[#allocation26_spill] sm:$0xff] %v6236_v61 }
  0x51   : > { %5211 = vmatprep.mubr.msk.f32.mxu0 %vm368_vm1, %v6062_v0 }
  0x52   : > { %4983 = vmatmul.mubr.msk.f32.gmra.mrb[22].mxu1 %vm368_vm1, %v6060_v63 }
  0x53   : > { %4985 = vmatprep.mubr.msk.f32.mxu1 %vm368_vm1, %v6064_v4  ;;  %v6228_v4 = vld [vmem:[#allocation2 + $0x90] sm:$0xff] }
  0x54   : > { %5212 = vmatmul.mubr.msk.f32.gmra.mrb[8].mxu0 %vm368_vm1, %v6072_v5  ;;  %6859 = vst [vmem:[#allocation25_spill] sm:$0xff] %v6228_v4 }
  0x55   : > { %5214 = vmatprep.mubr.msk.f32.mxu0 %vm368_vm1, %v6078_v7 }
  0x56   : > { %4986 = vmatmul.mubr.msk.f32.gmra.mrb[24].mxu1 %vm368_vm1, %v6076_v6  ;;  %v520_v6 = vld [vmem:[%s5992_s27 + $0x8] sm:$0x1] }
  0x57   : > { %4988 = vmatprep.mubr.msk.f32.mxu1 %vm368_vm1, %v6080_v8  ;;  %v6225_v8 = vld [vmem:[#allocation2 + $0x16a] sm:$0xff]  ;;  %v523_v63 = vunpack.c.l.bf16 %v520_v6 }
  0x58   : > { %5215 = vmatmul.mubr.msk.f32.gmra.mrb[10].mxu0 %vm368_vm1, %v6088_v9  ;;  %v6245_v6 = vld [vmem:[#allocation2 + $0xa8] sm:$0xff] }
  0x59   : > { %5217 = vmatprep.mubr.msk.f32.mxu0 %vm368_vm1, %v6094_v11  ;;  %527 = vst.msk [vmem:[#allocation2 + $0x1a8] sm:$0x3] %vm371_vm2, %v523_v63  ;;  %6863 = vst [vmem:[#allocation29_spill] sm:$0xff] %v6245_v6  ;;  %v6257_v63 = vld [vmem:[#allocation2 + $0xb0] sm:$0xff] }
  0x5a   : > { %4989 = vmatmul.mubr.msk.f32.gmra.mrb[26].mxu1 %vm368_vm1, %v6092_v10  ;;  %v6223_v10 = vld [vmem:[#allocation2 + $0x80] sm:$0xff]  ;;  %6865 = vst [vmem:[#allocation31_spill] sm:$0xff] %v6257_v63 }
  0x5b   : > { %4991 = vmatprep.mubr.msk.f32.mxu1 %vm368_vm1, %v6096_v12  ;;  %v6219_v12 = vld [vmem:[#allocation2 + $0x15a] sm:$0xff]  ;;  %6858 = vst [vmem:[#allocation24_spill] sm:$0xff] %v6223_v10 }
  0x5c   : > { %5218 = vmatmul.mubr.msk.f32.gmra.mrb[12].mxu0 %vm368_vm1, %v6104_v13 }
  0x5d   : > { %5220 = vmatprep.mubr.msk.f32.mxu0 %vm368_vm1, %v6110_v15 }
  0x5e   : > { %4992 = vmatmul.mubr.msk.f32.gmra.mrb[28].mxu1 %vm368_vm1, %v6108_v14  ;;  %v6211_v14 = vld [vmem:[#allocation2 + $0x78] sm:$0xff] }
  0x5f   : > { %4994 = vmatprep.mubr.msk.f32.mxu1 %vm368_vm1, %v6112_v16  ;;  %v6209_v16 = vld [vmem:[#allocation2 + $0x152] sm:$0xff]  ;;  %6857 = vst [vmem:[#allocation23_spill] sm:$0xff] %v6211_v14 }
  0x60   : > { %5221 = vmatmul.mubr.msk.f32.gmra.mrb[14].mxu0 %vm368_vm1, %v6120_v17 }
  0x61   : > { %5223 = vmatprep.mubr.msk.f32.mxu0 %vm368_vm1, %v6126_v19 }
  0x62   : > { %4995 = vmatmul.mubr.msk.f32.gmra.mrb[30].mxu1 %vm368_vm1, %v6124_v18  ;;  %v6207_v18 = vld [vmem:[#allocation2 + $0x68] sm:$0xff] }
  0x63   : > { %4999 = vmatprep.mubr.msk.f32.mxu1 %vm368_vm1, %v528_v20  ;;  %v6195_v20 = vld [vmem:[#allocation2 + $0x60] sm:$0xff]  ;;  %6856 = vst [vmem:[#allocation22_spill] sm:$0xff] %v6207_v18 }
  0x64   : > { %5224 = vmatmul.mubr.msk.f32.gmra.mrb[16].mxu0 %vm368_vm1, %v6134_v22  ;;  %6855 = vst [vmem:[#allocation21_spill] sm:$0xff] %v6195_v20 }
  0x65   : > { %5226 = vmatprep.mubr.msk.f32.mxu0 %vm368_vm1, %v6137_v29 }
  0x66   : > { %5000 = vmatmul.mubr.msk.f32.vlgmr.msra.gmra.mrb[0].mxu1 %vm368_vm1, %v529_v23  ;;  %v6203_v23 = vld [vmem:[#allocation2 + $0x142] sm:$0xff] }
  0x67   : > { %5048 = vmatpush3.msk.msra.mxu1 %vm691_vm0, %v5890_v25  ;;  %5002 = vmatprep.mubr.msk.f32.mxu1 %vm368_vm1, %v6139_v31  ;;  %v6171_v25 = vld [vmem:[#allocation2 + $0x112] sm:$0xff]  ;;  %v6253_v31 = vld [vmem:[#allocation2 + $0x18a] sm:$0xff] }
  0x68   : > { %5097 = vmatprep.subr.msk.mxu1 %vm691_vm0, %v6146_v32  ;;  %5227 = vmatmul.mubr.msk.f32.gmra.mrb[18].mxu0 %vm368_vm1, %v6151_v33  ;;  %6864 = vst [vmem:[#allocation30_spill] sm:$0xff] %v6253_v31 }
  0x69   : > { %5229 = vmatprep.mubr.msk.f32.mxu0 %vm368_vm1, %v6159_v40 }
  0x6a   : > { %5003 = vmatmul.mubr.msk.f32.gmra.mrb[2].mxu1 %vm368_vm1, %v6157_v35  ;;  %v6241_v35 = vld [vmem:[#allocation2 + $0x98] sm:$0xff] }
  0x6b   : > { %5005 = vmatprep.mubr.msk.f32.mxu1 %vm368_vm1, %v6161_v42  ;;  %6861 = vst [vmem:[#allocation27_spill] sm:$0xff] %v6241_v35 }
  0x6c   : > { %5230 = vmatmul.mubr.msk.f32.gmra.mrb[20].mxu0 %vm368_vm1, %v6171_v25 }
  0x6d   : > { %5232 = vmatprep.mubr.msk.f32.mxu0 %vm368_vm1, %v6177_v44 }
  0x6e   : > { %5006 = vmatmul.mubr.msk.f32.gmra.mrb[4].mxu1 %vm368_vm1, %v6175_v43 }
  0x6f   : > { %5008 = vmatprep.mubr.msk.f32.mxu1 %vm368_vm1, %v6179_v46 }
  0x70   : > { %5233 = vmatmul.mubr.msk.f32.gmra.mrb[22].mxu0 %vm368_vm1, %v6187_v50 }
  0x71   : > { %5235 = vmatprep.mubr.msk.f32.mxu0 %vm368_vm1, %v6193_v53 }
  0x72   : > { %5009 = vmatmul.mubr.msk.f32.gmra.mrb[6].mxu1 %vm368_vm1, %v6191_v52 }
  0x73   : > { %5011 = vmatprep.mubr.msk.f32.mxu1 %vm368_vm1, %v6195_v20 }
  0x74   : > { %5236 = vmatmul.mubr.msk.f32.gmra.mrb[24].mxu0 %vm368_vm1, %v6203_v23 }
  0x75   : > { %5238 = vmatprep.mubr.msk.f32.mxu0 %vm368_vm1, %v6209_v16 }
  0x76   : > { %5012 = vmatmul.mubr.msk.f32.gmra.mrb[8].mxu1 %vm368_vm1, %v6207_v18 }
  0x77   : > { %5014 = vmatprep.mubr.msk.f32.mxu1 %vm368_vm1, %v6211_v14 }
  0x78   : > { %5239 = vmatmul.mubr.msk.f32.gmra.mrb[26].mxu0 %vm368_vm1, %v6219_v12 }
  0x79   : > { %5241 = vmatprep.mubr.msk.f32.mxu0 %vm368_vm1, %v6225_v8 }
  0x7a   : > { %5015 = vmatmul.mubr.msk.f32.gmra.mrb[10].mxu1 %vm368_vm1, %v6223_v10 }
  0x7b   : > { %5017 = vmatprep.mubr.msk.f32.mxu1 %vm368_vm1, %v6228_v4 }
  0x7c   : > { %5242 = vmatmul.mubr.msk.f32.gmra.mrb[28].mxu0 %vm368_vm1, %v6236_v61  ;;  %v6271_v61 = vld [vmem:[#allocation2 + $0xd8] sm:$0xff] }
  0x7d   : > { %5244 = vmatprep.mubr.msk.f32.mxu0 %vm368_vm1, %v6243_v59  ;;  %v6269_v59 = vld [vmem:[#allocation2 + $0xc8] sm:$0xff] }
  0x7e   : > { %5018 = vmatmul.mubr.msk.f32.gmra.mrb[12].mxu1 %vm368_vm1, %v6241_v35  ;;  %6867 = vst [vmem:[#allocation33_spill] sm:$0xff] %v6269_v59 }
  0x7f   : > { %5020 = vmatprep.mubr.msk.f32.mxu1 %vm368_vm1, %v6245_v6 }
  0x80   : > { %5245 = vmatmul.mubr.msk.f32.gmra.mrb[30].mxu0 %vm368_vm1, %v6253_v31  ;;  %v6278_v31 = vld [vmem:[%s6791_s3 + $0x20] sm:$0xf] }
  0x81   : > { %5249 = vmatprep.mubr.msk.f32.mxu0 %vm368_vm1, %v6161_v42  ;;  %v6288_v42 = vld [vmem:[#allocation2 + $0xe0] sm:$0xff] }
  0x82   : > { %5021 = vmatmul.mubr.msk.f32.gmra.mrb[14].mxu1 %vm368_vm1, %v6257_v63 }
  0x83   : > { %5023 = vmatprep.mubr.msk.f32.mxu1 %vm368_vm1, %v6259_v57 }
  0x84   : > { %5250 = vmatmul.mubr.msk.f32.vlgmr.msra.gmra.mrb[0].mxu0 %vm368_vm1, %v6175_v43  ;;  %v6290_v43 = vld [vmem:[#allocation2 + $0xf0] sm:$0xff] }
  0x85   : > { %5298 = vmatpush3.msk.msra.mxu0 %vm691_vm0, %v6012_v51  ;;  %5252 = vmatprep.mubr.msk.f32.mxu0 %vm368_vm1, %v6179_v46  ;;  %v6302_v51 = vld [vmem:[#allocation2 + $0xf8] sm:$0xff]  ;;  %v6304_v46 = vld [vmem:[#allocation2 + $0x108] sm:$0xff] }
  0x86   : > { %5024 = vmatmul.mubr.msk.f32.gmra.mrb[16].mxu1 %vm368_vm1, %v6269_v59  ;;  %5347 = vmatprep.subr.msk.mxu0 %vm691_vm0, %v6278_v31 }
  0x87   : > { %5026 = vmatprep.mubr.msk.f32.mxu1 %vm368_vm1, %v6271_v61 }
  0x88   : > { %5253 = vmatmul.mubr.msk.f32.gmra.mrb[2].mxu0 %vm368_vm1, %v6191_v52  ;;  %v6316_v52 = vld [vmem:[#allocation2 + $0x120] sm:$0xff] }
  0x89   : > { %5255 = vmatprep.mubr.msk.f32.mxu0 %vm368_vm1, %v6195_v20  ;;  %v6314_v20 = vld [vmem:[#allocation2 + $0x110] sm:$0xff] }
  0x8a   : > { %5027 = vmatmul.mubr.msk.f32.gmra.mrb[18].mxu1 %vm368_vm1, %v6288_v42 }
  0x8b   : > { %5029 = vmatprep.mubr.msk.f32.mxu1 %vm368_vm1, %v6290_v43 }
  0x8c   : > { %5256 = vmatmul.mubr.msk.f32.gmra.mrb[4].mxu0 %vm368_vm1, %v6207_v18  ;;  %v6328_v18 = vld [vmem:[#allocation2 + $0x138] sm:$0xff] }
  0x8d   : > { %5258 = vmatprep.mubr.msk.f32.mxu0 %vm368_vm1, %v6211_v14  ;;  %v6326_v14 = vld [vmem:[#allocation2 + $0x128] sm:$0xff] }
  0x8e   : > { %5030 = vmatmul.mubr.msk.f32.gmra.mrb[20].mxu1 %vm368_vm1, %v6302_v51 }
  0x8f   : > { %5032 = vmatprep.mubr.msk.f32.mxu1 %vm368_vm1, %v6304_v46 }
  0x90   : > { %5259 = vmatmul.mubr.msk.f32.gmra.mrb[6].mxu0 %vm368_vm1, %v6223_v10  ;;  %v6340_v10 = vld [vmem:[#allocation2 + $0x150] sm:$0xff] }
  0x91   : > { %5261 = vmatprep.mubr.msk.f32.mxu0 %vm368_vm1, %v6228_v4  ;;  %v6338_v4 = vld [vmem:[#allocation2 + $0x140] sm:$0xff] }
  0x92   : > { %5033 = vmatmul.mubr.msk.f32.gmra.mrb[22].mxu1 %vm368_vm1, %v6314_v20 }
  0x93   : > { %5035 = vmatprep.mubr.msk.f32.mxu1 %vm368_vm1, %v6316_v52 }
  0x94   : > { %5262 = vmatmul.mubr.msk.f32.gmra.mrb[8].mxu0 %vm368_vm1, %v6241_v35  ;;  %v6352_v35 = vld [vmem:[#allocation2 + $0x168] sm:$0xff] }
  0x95   : > { %5264 = vmatprep.mubr.msk.f32.mxu0 %vm368_vm1, %v6245_v6  ;;  %v6350_v6 = vld [vmem:[#allocation2 + $0x158] sm:$0xff] }
  0x96   : > { %5036 = vmatmul.mubr.msk.f32.gmra.mrb[24].mxu1 %vm368_vm1, %v6326_v14 }
  0x97   : > { %5038 = vmatprep.mubr.msk.f32.mxu1 %vm368_vm1, %v6328_v18 }
  0x98   : > { %5265 = vmatmul.mubr.msk.f32.gmra.mrb[10].mxu0 %vm368_vm1, %v6257_v63  ;;  %v1244_v63 = vld [vmem:[#allocation2 + $0x2] sm:$0xff] }
  0x99   : > { %5267 = vmatprep.mubr.msk.f32.mxu0 %vm368_vm1, %v6259_v57  ;;  %v6362_v57 = vld [vmem:[#allocation2 + $0x170] sm:$0xff] }
  0x9a   : > { %5039 = vmatmul.mubr.msk.f32.gmra.mrb[26].mxu1 %vm368_vm1, %v6338_v4 }
  0x9b   : > { %5041 = vmatprep.mubr.msk.f32.mxu1 %vm368_vm1, %v6340_v10 }
  0x9c   : > { %5268 = vmatmul.mubr.msk.f32.gmra.mrb[12].mxu0 %vm368_vm1, %v6269_v59  ;;  %v1245_v59 = vld [vmem:[#allocation2 + $0xa] sm:$0xff] }
  0x9d   : > { %5270 = vmatprep.mubr.msk.f32.mxu0 %vm368_vm1, %v6271_v61 }
  0x9e   : > { %5042 = vmatmul.mubr.msk.f32.gmra.mrb[28].mxu1 %vm368_vm1, %v6350_v6 }
  0x9f   : > { %5044 = vmatprep.mubr.msk.f32.mxu1 %vm368_vm1, %v6352_v35 }
  0xa0   : > { %5271 = vmatmul.mubr.msk.f32.gmra.mrb[14].mxu0 %vm368_vm1, %v6288_v42 }
  0xa1   : > { %5273 = vmatprep.mubr.msk.f32.mxu0 %vm368_vm1, %v6290_v43 }
  0xa2   : > { %5045 = vmatmul.mubr.msk.f32.gmra.mrb[30].mxu1 %vm368_vm1, %v6362_v57 }
  0xa3   : > { %5049 = vmatprep.mubr.msk.f32.mxu1 %vm368_vm1, %v1244_v63  ;;  %v6886_v63 = vld [vmem:[#allocation23_spill] sm:$0xff] }
  0xa4   : > { %5274 = vmatmul.mubr.msk.f32.gmra.mrb[16].mxu0 %vm368_vm1, %v6302_v51 }
  0xa5   : > { %5276 = vmatprep.mubr.msk.f32.mxu0 %vm368_vm1, %v6304_v46 }
  0xa6   : > { %5050 = vmatmul.mubr.msk.f32.vlgmr.msra.gmra.mrb[0].mxu1 %vm368_vm1, %v1245_v59  ;;  %v2835_v59 = vld [vmem:[#allocation2 + $0x198] sm:$0xff] }
  0xa7   : > { %5098 = vmatpush3.msk.msra.mxu1 %vm691_vm0, %v6146_v32  ;;  %5052 = vmatprep.mubr.msk.f32.mxu1 %vm368_vm1, %v5980_v45  ;;  %v6414_v45 = vld [vmem:[#allocation2 + $0x180] sm:$0xff] }
  0xa8   : > { %5397 = vmatprep.subr.msk.mxu1 %vm691_vm0, %v5764_v1  ;;  %5277 = vmatmul.mubr.msk.f32.gmra.mrb[18].mxu0 %vm368_vm1, %v6314_v20  ;;  %v2836_v32 = vld [vmem:[#allocation2 + $0x1a0] sm:$0xff] }
  0xa9   : > { %5279 = vmatprep.mubr.msk.f32.mxu0 %vm368_vm1, %v6316_v52 }
  0xaa   : > { %5053 = vmatmul.mubr.msk.f32.gmra.mrb[2].mxu1 %vm368_vm1, %v5998_v47  ;;  %v6422_v47 = vld [vmem:[#allocation2 + $0x188] sm:$0xff] }
  0xab   : > { %5055 = vmatprep.mubr.msk.f32.mxu1 %vm368_vm1, %v6004_v49 }
  0xac   : > { %5280 = vmatmul.mubr.msk.f32.gmra.mrb[20].mxu0 %vm368_vm1, %v6326_v14 }
  0xad   : > { %5282 = vmatprep.mubr.msk.f32.mxu0 %vm368_vm1, %v6328_v18 }
  0xae   : > { %5056 = vmatmul.mubr.msk.f32.gmra.mrb[4].mxu1 %vm368_vm1, %v6018_v54 }
  0xaf   : > { %5058 = vmatprep.mubr.msk.f32.mxu1 %vm368_vm1, %v6026_v56 }
  0xb0   : > { %5283 = vmatmul.mubr.msk.f32.gmra.mrb[22].mxu0 %vm368_vm1, %v6338_v4 }
  0xb1   : > { %5285 = vmatprep.mubr.msk.f32.mxu0 %vm368_vm1, %v6340_v10 }
  0xb2   : > { %5059 = vmatmul.mubr.msk.f32.gmra.mrb[6].mxu1 %vm368_vm1, %v6040_v58 }
  0xb3   : > { %5061 = vmatprep.mubr.msk.f32.mxu1 %vm368_vm1, %v6046_v60 }
  0xb4   : > { %5286 = vmatmul.mubr.msk.f32.gmra.mrb[24].mxu0 %vm368_vm1, %v6350_v6 }
  0xb5   : > { %5288 = vmatprep.mubr.msk.f32.mxu0 %vm368_vm1, %v6352_v35 }
  0xb6   : > { %5062 = vmatmul.mubr.msk.f32.gmra.mrb[8].mxu1 %vm368_vm1, %v6056_v62 }
  0xb7   : > { %5064 = vmatprep.mubr.msk.f32.mxu1 %vm368_vm1, %v6062_v0 }
  0xb8   : > { %5289 = vmatmul.mubr.msk.f32.gmra.mrb[26].mxu0 %vm368_vm1, %v6362_v57 }
  0xb9   : > { %5291 = vmatprep.mubr.msk.f32.mxu0 %vm368_vm1, %v6414_v45 }
  0xba   : > { %5065 = vmatmul.mubr.msk.f32.gmra.mrb[10].mxu1 %vm368_vm1, %v6072_v5 }
  0xbb   : > { %5067 = vmatprep.mubr.msk.f32.mxu1 %vm368_vm1, %v6078_v7 }
  0xbc   : > { %5292 = vmatmul.mubr.msk.f32.gmra.mrb[28].mxu0 %vm368_vm1, %v6422_v47 }
  0xbd   : > { %5294 = vmatprep.mubr.msk.f32.mxu0 %vm368_vm1, %v2835_v59  ;;  %v6887_v59 = vld [vmem:[#allocation12_spill] sm:$0xff] }
  0xbe   : > { %5068 = vmatmul.mubr.msk.f32.gmra.mrb[12].mxu1 %vm368_vm1, %v6088_v9 }
  0xbf   : > { %5070 = vmatprep.mubr.msk.f32.mxu1 %vm368_vm1, %v6094_v11 }
  0xc0   : > { %5295 = vmatmul.mubr.msk.f32.gmra.mrb[30].mxu0 %vm368_vm1, %v2836_v32  ;;  %v6888_v32 = vld [vmem:[#allocation24_spill] sm:$0xff] }
  0xc1   : > { %5299 = vmatprep.mubr.msk.f32.mxu0 %vm368_vm1, %v5867_v21  ;;  %v6868_v21 = vld [vmem:[#allocation26_spill] sm:$0xff] }
  0xc2   : > { %5071 = vmatmul.mubr.msk.f32.gmra.mrb[14].mxu1 %vm368_vm1, %v6104_v13 }
  0xc3   : > { %5073 = vmatprep.mubr.msk.f32.mxu1 %vm368_vm1, %v6110_v15 }
  0xc4   : > { %5300 = vmatmul.mubr.msk.f32.vlgmr.msra.gmra.mrb[0].mxu0 %vm368_vm1, %v5881_v24  ;;  %v6869_v24 = vld [vmem:[#allocation3_spill] sm:$0xff] }
  0xc5   : > { %5348 = vmatpush3.msk.msra.mxu0 %vm691_vm0, %v6278_v31  ;;  %5302 = vmatprep.mubr.msk.f32.mxu0 %vm368_vm1, %v5895_v3  ;;  %v6870_v3 = vld [vmem:[#allocation15_spill] sm:$0xff] }
  0xc6   : > { %5074 = vmatmul.mubr.msk.f32.gmra.mrb[16].mxu1 %vm368_vm1, %v6120_v17  ;;  %v6885_v31 = vld [vmem:[#allocation11_spill] sm:$0xff] }
  0xc7   : > { %5076 = vmatprep.mubr.msk.f32.mxu1 %vm368_vm1, %v6126_v19 }
  0xc8   : > { %5303 = vmatmul.mubr.msk.f32.gmra.mrb[2].mxu0 %vm368_vm1, %v5909_v2  ;;  %v6871_v2 = vld [vmem:[#allocation4_spill] sm:$0xff] }
  0xc9   : > { %5305 = vmatprep.mubr.msk.f32.mxu0 %vm368_vm1, %v5913_v26  ;;  %v6872_v26 = vld [vmem:[#allocation16_spill] sm:$0xff] }
  0xca   : > { %5077 = vmatmul.mubr.msk.f32.gmra.mrb[18].mxu1 %vm368_vm1, %v6134_v22 }
  0xcb   : > { %5079 = vmatprep.mubr.msk.f32.mxu1 %vm368_vm1, %v6137_v29 }
  0xcc   : > { %5306 = vmatmul.mubr.msk.f32.gmra.mrb[4].mxu0 %vm368_vm1, %v5921_v27  ;;  %v6873_v27 = vld [vmem:[#allocation5_spill] sm:$0xff] }
  0xcd   : > { %5308 = vmatprep.mubr.msk.f32.mxu0 %vm368_vm1, %v5925_v28  ;;  %v6874_v28 = vld [vmem:[#allocation17_spill] sm:$0xff] }
  0xce   : > { %5080 = vmatmul.mubr.msk.f32.gmra.mrb[20].mxu1 %vm368_vm1, %v6151_v33 }
  0xcf   : > { %5082 = vmatprep.mubr.msk.f32.mxu1 %vm368_vm1, %v6159_v40 }
  0xd0   : > { %5309 = vmatmul.mubr.msk.f32.gmra.mrb[6].mxu0 %vm368_vm1, %v5934_v30  ;;  %v6875_v30 = vld [vmem:[#allocation6_spill] sm:$0xff] }
  0xd1   : > { %5311 = vmatprep.mubr.msk.f32.mxu0 %vm368_vm1, %v5939_v34  ;;  %v6876_v34 = vld [vmem:[#allocation18_spill] sm:$0xff] }
  0xd2   : > { %5083 = vmatmul.mubr.msk.f32.gmra.mrb[22].mxu1 %vm368_vm1, %v6171_v25 }
  0xd3   : > { %5085 = vmatprep.mubr.msk.f32.mxu1 %vm368_vm1, %v6177_v44 }
  0xd4   : > { %5312 = vmatmul.mubr.msk.f32.gmra.mrb[8].mxu0 %vm368_vm1, %v5950_v36  ;;  %v6877_v36 = vld [vmem:[#allocation7_spill] sm:$0xff] }
  0xd5   : > { %5314 = vmatprep.mubr.msk.f32.mxu0 %vm368_vm1, %v5954_v37  ;;  %v6878_v37 = vld [vmem:[#allocation19_spill] sm:$0xff] }
  0xd6   : > { %5086 = vmatmul.mubr.msk.f32.gmra.mrb[24].mxu1 %vm368_vm1, %v6187_v50 }
  0xd7   : > { %5088 = vmatprep.mubr.msk.f32.mxu1 %vm368_vm1, %v6193_v53 }
  0xd8   : > { %5315 = vmatmul.mubr.msk.f32.gmra.mrb[10].mxu0 %vm368_vm1, %v5962_v38  ;;  %v6879_v38 = vld [vmem:[#allocation8_spill] sm:$0xff] }
  0xd9   : > { %5317 = vmatprep.mubr.msk.f32.mxu0 %vm368_vm1, %v5966_v39  ;;  %v6880_v39 = vld [vmem:[#allocation20_spill] sm:$0xff] }
  0xda   : > { %5089 = vmatmul.mubr.msk.f32.gmra.mrb[26].mxu1 %vm368_vm1, %v6203_v23 }
  0xdb   : > { %5091 = vmatprep.mubr.msk.f32.mxu1 %vm368_vm1, %v6209_v16 }
  0xdc   : > { %5318 = vmatmul.mubr.msk.f32.gmra.mrb[12].mxu0 %vm368_vm1, %v5975_v41  ;;  %v6882_v41 = vld [vmem:[#allocation21_spill] sm:$0xff] }
  0xdd   : > { %5320 = vmatprep.mubr.msk.f32.mxu0 %vm368_vm1, %v6002_v48  ;;  %v6883_v48 = vld [vmem:[#allocation10_spill] sm:$0xff] }
  0xde   : > { %5092 = vmatmul.mubr.msk.f32.gmra.mrb[28].mxu1 %vm368_vm1, %v6219_v12 }
  0xdf   : > { %5094 = vmatprep.mubr.msk.f32.mxu1 %vm368_vm1, %v6225_v8 }
  0xe0   : > { %5321 = vmatmul.mubr.msk.f32.gmra.mrb[14].mxu0 %vm368_vm1, %v6024_v55  ;;  %v6884_v55 = vld [vmem:[#allocation22_spill] sm:$0xff] }
  0xe1   : > { %5323 = vmatprep.mubr.msk.f32.mxu0 %vm368_vm1, %v6869_v24  ;;  %v6889_v24 = vld [vmem:[#allocation13_spill] sm:$0xff] }
  0xe2   : > { %5095 = vmatmul.mubr.msk.f32.gmra.mrb[30].mxu1 %vm368_vm1, %v6868_v21 }
  0xe3   : > { %5099 = vmatprep.mubr.msk.f32.mxu1 %vm368_vm1, %v6870_v3  ;;  %v6890_v3 = vld [vmem:[#allocation25_spill] sm:$0xff] }
  0xe4   : > { %5324 = vmatmul.mubr.msk.f32.gmra.mrb[16].mxu0 %vm368_vm1, %v6871_v2  ;;  %v6548_v2 = vld [vmem:[#allocation2 + $0x181] sm:$0xff] }
  0xe5   : > { %5326 = vmatprep.mubr.msk.f32.mxu0 %vm368_vm1, %v6873_v27 }
  0xe6   : > { %5100 = vmatmul.mubr.msk.f32.vlgmr.msra.gmra.mrb[0].mxu1 %vm368_vm1, %v6872_v26  ;;  %v6891_v26 = vld [vmem:[#allocation14_spill] sm:$0xff] }
  0xe7   : > { %5398 = vmatpush3.msk.msra.mxu1 %vm691_vm0, %v5764_v1  ;;  %5102 = vmatprep.mubr.msk.f32.mxu1 %vm368_vm1, %v6874_v28  ;;  %v6881_v1 = vld [vmem:[#allocation9_spill] sm:$0xff]  ;;  %v6892_v28 = vld [vmem:[#allocation27_spill] sm:$0xff] }
  0xe8   : > { %5327 = vmatmul.mubr.msk.f32.gmra.mrb[18].mxu0 %vm368_vm1, %v6875_v30 }
  0xe9   : > { %5329 = vmatprep.mubr.msk.f32.mxu0 %vm368_vm1, %v6877_v36 }
  0xea   : > { %5103 = vmatmul.mubr.msk.f32.gmra.mrb[2].mxu1 %vm368_vm1, %v6876_v34  ;;  %v6556_v34 = vld [vmem:[#allocation2 + $0x189] sm:$0xff] }
  0xeb   : > { %5105 = vmatprep.mubr.msk.f32.mxu1 %vm368_vm1, %v6878_v37  ;;  %v6893_v37 = vld [vmem:[#allocation29_spill] sm:$0xff] }
  0xec   : > { %5330 = vmatmul.mubr.msk.f32.gmra.mrb[20].mxu0 %vm368_vm1, %v6879_v38 }
  0xed   : > { %5332 = vmatprep.mubr.msk.f32.mxu0 %vm368_vm1, %v6881_v1 }
  0xee   : > { %5106 = vmatmul.mubr.msk.f32.gmra.mrb[4].mxu1 %vm368_vm1, %v6880_v39  ;;  %v3225_v39 = vld [vmem:[#allocation2 + $0x199] sm:$0xff] }
  0xef   : > { %5108 = vmatprep.mubr.msk.f32.mxu1 %vm368_vm1, %v6882_v41  ;;  %v6894_v41 = vld [vmem:[#allocation31_spill] sm:$0xff] }
  0xf0   : > { %5333 = vmatmul.mubr.msk.f32.gmra.mrb[22].mxu0 %vm368_vm1, %v6883_v48 }
  0xf1   : > { %5335 = vmatprep.mubr.msk.f32.mxu0 %vm368_vm1, %v6885_v31 }
  0xf2   : > { %5109 = vmatmul.mubr.msk.f32.gmra.mrb[6].mxu1 %vm368_vm1, %v6884_v55  ;;  %v3226_v55 = vld [vmem:[#allocation2 + $0x1a1] sm:$0xff] }
  0xf3   : > { %5111 = vmatprep.mubr.msk.f32.mxu1 %vm368_vm1, %v6886_v63  ;;  %v6895_v63 = vld [vmem:[#allocation32_spill] sm:$0xff] }
  0xf4   : > { %5336 = vmatmul.mubr.msk.f32.gmra.mrb[24].mxu0 %vm368_vm1, %v6887_v59 }
  0xf5   : > { %5338 = vmatprep.mubr.msk.f32.mxu0 %vm368_vm1, %v6889_v24 }
  0xf6   : > { %5112 = vmatmul.mubr.msk.f32.gmra.mrb[8].mxu1 %vm368_vm1, %v6888_v32  ;;  %v6896_v32 = vld [vmem:[#allocation33_spill] sm:$0xff] }
  0xf7   : > { %5114 = vmatprep.mubr.msk.f32.mxu1 %vm368_vm1, %v6890_v3 }
  0xf8   : > { %5339 = vmatmul.mubr.msk.f32.gmra.mrb[26].mxu0 %vm368_vm1, %v6891_v26 }
  0xf9   : > { %5341 = vmatprep.mubr.msk.f32.mxu0 %vm368_vm1, %v6548_v2 }
  0xfa   : > { %5115 = vmatmul.mubr.msk.f32.gmra.mrb[10].mxu1 %vm368_vm1, %v6892_v28 }
  0xfb   : > { %5117 = vmatprep.mubr.msk.f32.mxu1 %vm368_vm1, %v6893_v37 }
  0xfc   : > { %5342 = vmatmul.mubr.msk.f32.gmra.mrb[28].mxu0 %vm368_vm1, %v6556_v34 }
  0xfd   : > { %5344 = vmatprep.mubr.msk.f32.mxu0 %vm368_vm1, %v3225_v39 }
  0xfe   : > { %5118 = vmatmul.mubr.msk.f32.gmra.mrb[12].mxu1 %vm368_vm1, %v6894_v41 }
  0xff   : > { %5120 = vmatprep.mubr.msk.f32.mxu1 %vm368_vm1, %v6895_v63 }
 0x100   : > { %5345 = vmatmul.mubr.msk.f32.gmra.mrb[30].mxu0 %vm368_vm1, %v3226_v55 }
 0x101   : > { %5349 = vmatprep.mubr.msk.f32.mxu0 %vm368_vm1, %v6004_v49  ;;  %v2040_v49 = vld [vmem:[#allocation2 + $0xd9] sm:$0xff] }
 0x102   : > { %5121 = vmatmul.mubr.msk.f32.gmra.mrb[14].mxu1 %vm368_vm1, %v6896_v32 }
 0x103   : > { %5123 = vmatprep.mubr.msk.f32.mxu1 %vm368_vm1, %v6271_v61  ;;  %v6898_v61 = vld [vmem:[#allocation30_spill] sm:$0xff] }
 0x104   : > { %5350 = vmatmul.mubr.msk.f32.vlgmr.msra.gmra.mrb[0].mxu0 %vm368_vm1, %v6018_v54  ;;  %v2041_v54 = vld [vmem:[#allocation2 + $0xe1] sm:$0xff] }
 0x105   : > { %5352 = vmatprep.mubr.msk.f32.mxu0 %vm368_vm1, %v6026_v56  ;;  %v2042_v56 = vld [vmem:[#allocation2 + $0xf1] sm:$0xff] }
 0x106   : > { %5124 = vmatmul.mubr.msk.f32.gmra.mrb[16].mxu1 %vm368_vm1, %v6288_v42  ;;  %v6700_v42 = vld [vmem:[%s6793_s5] ss:$0 sm:$0xff] }
 0x107   : > { %5126 = vmatprep.mubr.msk.f32.mxu1 %vm368_vm1, %v6290_v43 }
 0x108   : > { %5353 = vmatmul.mubr.msk.f32.gmra.mrb[2].mxu0 %vm368_vm1, %v6040_v58  ;;  %v6897_v58 = vld [vmem:[#allocation28_spill] sm:$0xff] }
 0x109   : > { %5355 = vmatprep.mubr.msk.f32.mxu0 %vm368_vm1, %v6046_v60  ;;  %v3615_v60 = vld [vmem:[#allocation2 + $0x19a] sm:$0xff] }
 0x10a   : > { %5127 = vmatmul.mubr.msk.f32.gmra.mrb[18].mxu1 %vm368_vm1, %v6302_v51 }
 0x10b   : > { %5129 = vmatprep.mubr.msk.f32.mxu1 %vm368_vm1, %v6304_v46 }
 0x10c   : > { %5356 = vmatmul.mubr.msk.f32.gmra.mrb[4].mxu0 %vm368_vm1, %v6056_v62  ;;  %v3616_v62 = vld [vmem:[#allocation2 + $0x1a2] sm:$0xff] }
 0x10d   : > { %5358 = vmatprep.mubr.msk.f32.mxu0 %vm368_vm1, %v6062_v0 }
 0x10e   : > { %5130 = vmatmul.mubr.msk.f32.gmra.mrb[20].mxu1 %vm368_vm1, %v6314_v20 }
 0x10f   : > { %5132 = vmatprep.mubr.msk.f32.mxu1 %vm368_vm1, %v6316_v52 }
 0x110   : > { %5359 = vmatmul.mubr.msk.f32.gmra.mrb[6].mxu0 %vm368_vm1, %v6072_v5 }
 0x111   : > { %5361 = vmatprep.mubr.msk.f32.mxu0 %vm368_vm1, %v6078_v7 }
 0x112   : > { %5133 = vmatmul.mubr.msk.f32.gmra.mrb[22].mxu1 %vm368_vm1, %v6326_v14 }
 0x113   : > { %5135 = vmatprep.mubr.msk.f32.mxu1 %vm368_vm1, %v6328_v18 }
 0x114   : > { %5362 = vmatmul.mubr.msk.f32.gmra.mrb[8].mxu0 %vm368_vm1, %v6088_v9 }
 0x115   : > { %5364 = vmatprep.mubr.msk.f32.mxu0 %vm368_vm1, %v6094_v11 }
 0x116   : > { %5136 = vmatmul.mubr.msk.f32.gmra.mrb[24].mxu1 %vm368_vm1, %v6338_v4 }
 0x117   : > { %5138 = vmatprep.mubr.msk.f32.mxu1 %vm368_vm1, %v6340_v10 }
 0x118   : > { %5365 = vmatmul.mubr.msk.f32.gmra.mrb[10].mxu0 %vm368_vm1, %v6104_v13 }
 0x119   : > { %5367 = vmatprep.mubr.msk.f32.mxu0 %vm368_vm1, %v6110_v15 }
 0x11a   : > { %5139 = vmatmul.mubr.msk.f32.gmra.mrb[26].mxu1 %vm368_vm1, %v6350_v6 }
 0x11b   : > { %5141 = vmatprep.mubr.msk.f32.mxu1 %vm368_vm1, %v6352_v35 }
 0x11c   : > { %5368 = vmatmul.mubr.msk.f32.gmra.mrb[12].mxu0 %vm368_vm1, %v6120_v17 }
 0x11d   : > { %5370 = vmatprep.mubr.msk.f32.mxu0 %vm368_vm1, %v6126_v19 }
 0x11e   : > { %5142 = vmatmul.mubr.msk.f32.gmra.mrb[28].mxu1 %vm368_vm1, %v6362_v57  ;;  %v2043_v57 = vld [vmem:[#allocation2 + $0xf9] sm:$0xff] }
 0x11f   : > { %5144 = vmatprep.mubr.msk.f32.mxu1 %vm368_vm1, %v6414_v45 }
 0x120   : > { %5371 = vmatmul.mubr.msk.f32.gmra.mrb[14].mxu0 %vm368_vm1, %v6134_v22 }
 0x121   : > { %5373 = vmatprep.mubr.msk.f32.mxu0 %vm368_vm1, %v6137_v29 }
 0x122   : > { %5145 = vmatmul.mubr.msk.f32.gmra.mrb[30].mxu1 %vm368_vm1, %v6422_v47 }
 0x123   : > { %5173 = vmatprep.mubr.msk.f32.mxu1 %vm368_vm1, %v2040_v49 }
 0x124   : > { %5374 = vmatmul.mubr.msk.f32.gmra.mrb[16].mxu0 %vm368_vm1, %v6151_v33  ;;  %v6695_v33 = vld [vmem:[%s6792_s4] ss:$0 sm:$0xff] }
 0x125   : > { %5376 = vmatprep.mubr.msk.f32.mxu0 %vm368_vm1, %v6159_v40 }
 0x126   : > { %5174 = vmatmul.mubr.msk.f32.vlgmr.msra.gmra.mrb[16].mxu1 %vm368_vm1, %v2041_v54 }
 0x127   : > { %5176 = vmatprep.mubr.msk.f32.mxu1 %vm368_vm1, %v2042_v56 }
 0x128   : > { %5377 = vmatmul.mubr.msk.f32.gmra.mrb[18].mxu0 %vm368_vm1, %v6171_v25 }
 0x129   : > { %5379 = vmatprep.mubr.msk.f32.mxu0 %vm368_vm1, %v6177_v44 }
 0x12a   : > { %5177 = vmatmul.mubr.msk.f32.gmra.mrb[18].mxu1 %vm368_vm1, %v2043_v57 }
 0x12b   : > { %5179 = vmatprep.mubr.msk.f32.mxu1 %vm368_vm1, %v6873_v27 }
 0x12c   : > { %5380 = vmatmul.mubr.msk.f32.gmra.mrb[20].mxu0 %vm368_vm1, %v6187_v50 }
 0x12d   : > { %5382 = vmatprep.mubr.msk.f32.mxu0 %vm368_vm1, %v6193_v53 }
 0x12e   : > { %5180 = vmatmul.mubr.msk.f32.gmra.mrb[20].mxu1 %vm368_vm1, %v6875_v30 }
 0x12f   : > { %5182 = vmatprep.mubr.msk.f32.mxu1 %vm368_vm1, %v6877_v36 }
 0x130   : > { %5383 = vmatmul.mubr.msk.f32.gmra.mrb[22].mxu0 %vm368_vm1, %v6203_v23 }
 0x131   : > { %5385 = vmatprep.mubr.msk.f32.mxu0 %vm368_vm1, %v6209_v16 }
 0x132   : > { %5183 = vmatmul.mubr.msk.f32.gmra.mrb[22].mxu1 %vm368_vm1, %v6879_v38 }
 0x133   : > { %5185 = vmatprep.mubr.msk.f32.mxu1 %vm368_vm1, %v6881_v1 }
 0x134   : > { %5386 = vmatmul.mubr.msk.f32.gmra.mrb[24].mxu0 %vm368_vm1, %v6219_v12 }
 0x135   : > { %5388 = vmatprep.mubr.msk.f32.mxu0 %vm368_vm1, %v6225_v8 }
 0x136   : > { %5186 = vmatmul.mubr.msk.f32.gmra.mrb[24].mxu1 %vm368_vm1, %v6883_v48 }
 0x137   : > { %5188 = vmatprep.mubr.msk.f32.mxu1 %vm368_vm1, %v6885_v31 }
 0x138   : > { %5389 = vmatmul.mubr.msk.f32.gmra.mrb[26].mxu0 %vm368_vm1, %v6868_v21 }
 0x139   : > { %5391 = vmatprep.mubr.msk.f32.mxu0 %vm368_vm1, %v6897_v58 }
 0x13a   : > { %5189 = vmatmul.mubr.msk.f32.gmra.mrb[26].mxu1 %vm368_vm1, %v6887_v59 }
 0x13b   : > { %5191 = vmatprep.mubr.msk.f32.mxu1 %vm368_vm1, %v6889_v24 }
 0x13c   : > { %5392 = vmatmul.mubr.msk.f32.gmra.mrb[28].mxu0 %vm368_vm1, %v6898_v61 }
 0x13d   : > { %5394 = vmatprep.mubr.msk.f32.mxu0 %vm368_vm1, %v3615_v60 }
 0x13e   : > { %5192 = vmatmul.mubr.msk.f32.gmra.mrb[28].mxu1 %vm368_vm1, %v6891_v26 }
 0x13f   : > { %5194 = vmatprep.mubr.msk.f32.mxu1 %vm368_vm1, %v6548_v2 }
 0x140   : > { %5395 = vmatmul.mubr.msk.f32.gmra.mrb[30].mxu0 %vm368_vm1, %v3616_v62 }
 0x142   : > { %5195 = vmatmul.mubr.msk.f32.gmra.mrb[30].mxu1 %vm368_vm1, %v6556_v34 }
 0x1b9   : > { %v5101_v0 = vpop.f32.mrb[0].mxu1 }
 0x1ba   : > { %v1833_v4 = vpop.f32.mrb[1].mxu1 }
 0x1bd   : > { %v5104_v5 = vpop.f32.mrb[2].mxu1 }
 0x1be   : > { %v1843_v7 = vpop.f32.mrb[3].mxu1 }
 0x1c1   : > { %v5107_v8 = vpop.f32.mrb[4].mxu1 }
 0x1c2   : > { %v1853_v9 = vpop.f32.mrb[5].mxu1 }
 0x1c5   : > { %v5110_v10 = vpop.f32.mrb[6].mxu1 }
 0x1c6   : > { %v1863_v11 = vpop.f32.mrb[7].mxu1 }
 0x1c9   : > { %v5113_v12 = vpop.f32.mrb[8].mxu1 }
 0x1ca   : > { %v1873_v13 = vpop.f32.mrb[9].mxu1 }
 0x1cd   : > { %v5116_v14 = vpop.f32.mrb[10].mxu1 }
 0x1ce   : > { %v1883_v15 = vpop.f32.mrb[11].mxu1 }
 0x1d1   : > { %v5119_v16 = vpop.f32.mrb[12].mxu1 }
 0x1d2   : > { %v1893_v17 = vpop.f32.mrb[13].mxu1 }
 0x1d5   : > { %v5122_v18 = vpop.f32.mrb[14].mxu1 }
 0x1d6   : > { %v1903_v19 = vpop.f32.mrb[15].mxu1 }
 0x1d7   : > { %v5351_v22 = vpop.f32.mrb[0].mxu0 }
 0x1d8   : > { %v5399_v29 = vadd.f32 %v5351_v22, %v5101_v0  ;;  %v3784_v35 = vpop.f32.mrb[1].mxu0 }
 0x1d9   : > { %v5400_v40 = vadd.f32 %v3784_v35, %v1833_v4 }
 0x1da   : > { %v3983_v25 = vmul.f32 %v5399_v29, %v6695_v33 }
 0x1db   : > { %v5354_v43 = vpop.f32.mrb[2].mxu0  ;;  %v3982_v44 = vmul.f32 %v5400_v40, %v6695_v33 }
 0x1dc   : > { %v5401_v46 = vadd.f32 %v5354_v43, %v5104_v5  ;;  %v3794_v50 = vpop.f32.mrb[3].mxu0  ;;  %v4022_v51 = vadd.f32 %v6700_v42, %v3983_v25 }
 0x1dd   : > { %v5402_v52 = vadd.f32 %v3794_v50, %v1843_v7  ;;  %v4021_v53 = vadd.f32 %v6700_v42, %v3982_v44 }
 0x1de   : > { %v3985_v27 = vmul.f32 %v5401_v46, %v6695_v33  ;;  %v4054_v36 = vmax.f32 %v4022_v51, 0.0 }
 0x1df   : > { %v3984_v20 = vmul.f32 %v5402_v52, %v6695_v33  ;;  %v5357_v23 = vpop.f32.mrb[4].mxu0  ;;  %v4053_v6 = vmax.f32 %v4021_v53, 0.0 }
 0x1e0   : > { %v5403_v45 = vadd.f32 %v5357_v23, %v5107_v8  ;;  %v3804_v47 = vpop.f32.mrb[5].mxu0  ;;  %v4024_v2 = vadd.f32 %v6700_v42, %v3985_v27 }
 0x1e1   : > { %v5404_v21 = vadd.f32 %v3804_v47, %v1853_v9  ;;  %4085 = vxpose.xlu0.b32.start [1/16] (narrow) %v4053_v6, 8  ;;  %v4023_v38 = vadd.f32 %v6700_v42, %v3984_v20 }
 0x1e2   : > { %v3987_v37 = vmul.f32 %v5403_v45, %v6695_v33  ;;  %v4056_v41 = vmax.f32 %v4024_v2, 0.0 }
 0x1e3   : > { %v5360_v30 = vpop.f32.mrb[6].mxu0  ;;  %v3986_v59 = vmul.f32 %v5404_v21, %v6695_v33  ;;  %v4055_v3 = vmax.f32 %v4023_v38, 0.0 }
 0x1e4   : > { %v5405_v1 = vadd.f32 %v5360_v30, %v5110_v10  ;;  %v3814_v48 = vpop.f32.mrb[7].mxu0  ;;  %v4026_v58 = vadd.f32 %v6700_v42, %v3987_v37 }
 0x1e5   : > { %v5406_v31 = vadd.f32 %v3814_v48, %v1863_v11  ;;  %4086 = vxpose.xlu0.b32.cont [2/16] (narrow) %v4054_v36, 8  ;;  %v4025_v55 = vadd.f32 %v6700_v42, %v3986_v59 }
 0x1e6   : > { %v3989_v0 = vmul.f32 %v5405_v1, %v6695_v33  ;;  %v4058_v5 = vmax.f32 %v4026_v58, 0.0 }
 0x1e7   : > { %v5363_v24 = vpop.f32.mrb[8].mxu0  ;;  %v3988_v54 = vmul.f32 %v5406_v31, %v6695_v33  ;;  %v4057_v57 = vmax.f32 %v4025_v55, 0.0 }
 0x1e8   : > { %v5407_v26 = vadd.f32 %v5363_v24, %v5113_v12  ;;  %v3824_v28 = vpop.f32.mrb[9].mxu0 }
 0x1e9   : > { %v5408_v34 = vadd.f32 %v3824_v28, %v1873_v13  ;;  %4087 = vxpose.xlu0.b32.cont [3/16] (narrow) %v4055_v3, 8  ;;  %v4027_v7 = vadd.f32 %v6700_v42, %v3988_v54 }
 0x1ea   : > { %v3991_v35 = vmul.f32 %v5407_v26, %v6695_v33 }
 0x1eb   : > { %v5366_v39 = vpop.f32.mrb[10].mxu0  ;;  %v3990_v11 = vmul.f32 %v5408_v34, %v6695_v33  ;;  %v4059_v13 = vmax.f32 %v4027_v7, 0.0 }
 0x1ec   : > { %v5409_v63 = vadd.f32 %v5366_v39, %v5116_v14  ;;  %v3834_v32 = vpop.f32.mrb[11].mxu0  ;;  %v4028_v14 = vadd.f32 %v6700_v42, %v3989_v0  ;;  %v4030_v45 = vadd.f32 %v6700_v42, %v3991_v35 }
 0x1ed   : > { %v5410_v49 = vadd.f32 %v3834_v32, %v1883_v15  ;;  %4088 = vxpose.xlu0.b32.cont [4/16] (narrow) %v4056_v41, 8 }
 0x1ee   : > { %v4060_v40 = vmax.f32 %v4028_v14, 0.0  ;;  %v3993_v31 = vmul.f32 %v5409_v63, %v6695_v33  ;;  %v4062_v24 = vmax.f32 %v4030_v45, 0.0 }
 0x1ef   : > { %v5369_v56 = vpop.f32.mrb[12].mxu0  ;;  %v3992_v23 = vmul.f32 %v5410_v49, %v6695_v33 }
 0x1f0   : > { %v6715_v60 = vadd.f32 %v5369_v56, %v5119_v16  ;;  %v3844_v61 = vpop.f32.mrb[13].mxu0  ;;  %v4032_v54 = vadd.f32 %v6700_v42, %v3993_v31 }
 0x1f1   : > { %v5412_v62 = vadd.f32 %v3844_v61, %v1893_v17  ;;  %4089 = vxpose.xlu0.b32.cont [5/16] (narrow) %v4057_v57, 8  ;;  %v4031_v3 = vadd.f32 %v6700_v42, %v3992_v23 }
 0x1f3   : > { %v5372_v4 = vpop.f32.mrb[14].mxu0  ;;  %v3994_v32 = vmul.f32 %v5412_v62, %v6695_v33  ;;  %v4063_v63 = vmax.f32 %v4031_v3, 0.0 }
 0x1f4   : > { %v6719_v8 = vadd.f32 %v5372_v4, %v5122_v18  ;;  %v3854_v9 = vpop.f32.mrb[15].mxu0 }
 0x1f5   : > { %v6721_v10 = vadd.f32 %v3854_v9, %v1903_v19  ;;  %4090 = vxpose.xlu0.b32.cont [6/16] (narrow) %v4058_v5, 8  ;;  %v4029_v19 = vadd.f32 %v6700_v42, %v3990_v11  ;;  %v3995_v9 = vmul.f32 %v6715_v60, %v6695_v33 }
 0x1f7   : > { %v5375_v12 = vpop.f32.mrb[16].mxu0  ;;  %v4061_v51 = vmax.f32 %v4029_v19, 0.0 }
 0x1f8   : > { %v3864_v16 = vpop.f32.mrb[17].mxu0 }
 0x1f9   : > { %v5175_v15 = vpop.f32.mrb[16].mxu1  ;;  %4091 = vxpose.xlu0.b32.cont [7/16] (narrow) %v4059_v13, 8  ;;  %v4033_v13 = vadd.f32 %v6700_v42, %v3994_v32 }
 0x1fa   : > { %v5415_v17 = vadd.f32 %v5375_v12, %v5175_v15  ;;  %v2303_v22 = vpop.f32.mrb[17].mxu1  ;;  %v4064_v12 = vmax.f32 %v4032_v54, 0.0 }
 0x1fb   : > { %v5416_v29 = vadd.f32 %v3864_v16, %v2303_v22  ;;  %v5378_v18 = vpop.f32.mrb[18].mxu0 }
 0x1fc   : > { %v3999_v25 = vmul.f32 %v5415_v17, %v6695_v33  ;;  %v3874_v44 = vpop.f32.mrb[19].mxu0 }
 0x1fd   : > { %v5178_v43 = vpop.f32.mrb[18].mxu1  ;;  %v3998_v46 = vmul.f32 %v5416_v29, %v6695_v33  ;;  %4092 = vxpose.xlu0.b32.cont [8/16] (narrow) %v4060_v40, 8 }
 0x1fe   : > { %v5417_v50 = vadd.f32 %v5378_v18, %v5178_v43  ;;  %v2313_v52 = vpop.f32.mrb[19].mxu1  ;;  %v4038_v36 = vadd.f32 %v6700_v42, %v3999_v25  ;;  %v3996_v25 = vmul.f32 %v6721_v10, %v6695_v33 }
 0x1ff   : > { %v5418_v53 = vadd.f32 %v3874_v44, %v2313_v52  ;;  %v4037_v20 = vadd.f32 %v6700_v42, %v3998_v46  ;;  %v5381_v6 = vpop.f32.mrb[20].mxu0  ;;  %v4065_v46 = vmax.f32 %v4033_v13, 0.0 }
 0x200   : > { %v3884_v27 = vpop.f32.mrb[21].mxu0  ;;  %v4001_v2 = vmul.f32 %v5417_v50, %v6695_v33  ;;  %v4070_v34 = vmax.f32 %v4038_v36, 0.0  ;;  %v4034_v50 = vadd.f32 %v6700_v42, %v3995_v9 }
 0x201   : > { %v4000_v47 = vmul.f32 %v5418_v53, %v6695_v33  ;;  %v5181_v21 = vpop.f32.mrb[20].mxu1  ;;  %v4069_v30 = vmax.f32 %v4037_v20, 0.0  ;;  %4093 = vxpose.xlu0.b32.cont [9/16] (narrow) %v4061_v51, 8 }
 0x202   : > { %v5419_v38 = vadd.f32 %v5381_v6, %v5181_v21  ;;  %v2323_v1 = vpop.f32.mrb[21].mxu1  ;;  %v4040_v0 = vadd.f32 %v6700_v42, %v4001_v2 }
 0x203   : > { %v5420_v48 = vadd.f32 %v3884_v27, %v2323_v1  ;;  %4117 = vxpose.xlu1.b32.start [1/16] (narrow) %v4069_v30, 8  ;;  %v5384_v59 = vpop.f32.mrb[22].mxu0  ;;  %v4039_v37 = vadd.f32 %v6700_v42, %v4000_v47  ;;  %v3997_v30 = vmul.f32 %v6719_v8, %v6695_v33  ;;  %v4066_v1 = vmax.f32 %v4034_v50, 0.0 }
 0x204   : > { %v3894_v28 = vpop.f32.mrb[23].mxu0  ;;  %v4003_v14 = vmul.f32 %v5419_v38, %v6695_v33  ;;  %v4072_v22 = vmax.f32 %v4040_v0, 0.0 }
 0x205   : > { %v5184_v26 = vpop.f32.mrb[22].mxu1  ;;  %4094 = vxpose.xlu0.b32.cont [10/16] (narrow) %v4062_v24, 8  ;;  %v4002_v56 = vmul.f32 %v5420_v48, %v6695_v33  ;;  %v4071_v61 = vmax.f32 %v4039_v37, 0.0  ;;  %v4035_v48 = vadd.f32 %v6700_v42, %v3996_v25 }
 0x206   : > { %v5421_v39 = vadd.f32 %v5384_v59, %v5184_v26  ;;  %v2333_v41 = vpop.f32.mrb[23].mxu1  ;;  %v4042_v51 = vadd.f32 %v6700_v42, %v4003_v14 }
 0x207   : > { %v5422_v55 = vadd.f32 %v3894_v28, %v2333_v41  ;;  %4118 = vxpose.xlu1.b32.cont [2/16] (narrow) %v4070_v34, 8  ;;  %v5387_v49 = vpop.f32.mrb[24].mxu0  ;;  %v4041_v29 = vadd.f32 %v6700_v42, %v4002_v56  ;;  %v4067_v32 = vmax.f32 %v4035_v48, 0.0 }
 0x208   : > { %v3904_v58 = vpop.f32.mrb[25].mxu0  ;;  %v4005_v31 = vmul.f32 %v5421_v39, %v6695_v33  ;;  %v4074_v2 = vmax.f32 %v4042_v51, 0.0  ;;  %v4036_v39 = vadd.f32 %v6700_v42, %v3997_v30 }
 0x209   : > { %v5187_v57 = vpop.f32.mrb[24].mxu1  ;;  %4095 = vxpose.xlu0.b32.cont [11/16] (narrow) %v4063_v63, 8  ;;  %v4004_v52 = vmul.f32 %v5422_v55, %v6695_v33  ;;  %v4073_v6 = vmax.f32 %v4041_v29, 0.0 }
 0x20a   : > { %v5423_v4 = vadd.f32 %v5387_v49, %v5187_v57  ;;  %v2343_v5 = vpop.f32.mrb[25].mxu1  ;;  %v4044_v54 = vadd.f32 %v6700_v42, %v4005_v31 }
 0x20b   : > { %v5424_v7 = vadd.f32 %v3904_v58, %v2343_v5  ;;  %4119 = vxpose.xlu1.b32.cont [3/16] (narrow) %v4071_v61, 8  ;;  %v5390_v11 = vpop.f32.mrb[26].mxu0  ;;  %v4043_v26 = vadd.f32 %v6700_v42, %v4004_v52  ;;  %v4068_v58 = vmax.f32 %v4036_v39, 0.0 }
 0x20c   : > { %v4007_v62 = vmul.f32 %v5423_v4, %v6695_v33  ;;  %v3914_v17 = vpop.f32.mrb[27].mxu0  ;;  %v4076_v61 = vmax.f32 %v4044_v54, 0.0 }
 0x20d   : > { %v4006_v15 = vmul.f32 %v5424_v7, %v6695_v33  ;;  %v5190_v16 = vpop.f32.mrb[26].mxu1  ;;  %4096 = vxpose.xlu0.b32.cont [12/16] (narrow) %v4064_v12, 8  ;;  %v4075_v63 = vmax.f32 %v4043_v26, 0.0 }
 0x20e   : > { %v5425_v35 = vadd.f32 %v5390_v11, %v5190_v16  ;;  %v2353_v18 = vpop.f32.mrb[27].mxu1  ;;  %v4046_v60 = vadd.f32 %v6700_v42, %v4007_v62 }
 0x20f   : > { %v5426_v40 = vadd.f32 %v3914_v17, %v2353_v18  ;;  %4120 = vxpose.xlu1.b32.cont [4/16] (narrow) %v4072_v22, 8  ;;  %v4045_v19 = vadd.f32 %v6700_v42, %v4006_v15  ;;  %v5393_v44 = vpop.f32.mrb[28].mxu0 }
 0x210   : > { %v4009_v43 = vmul.f32 %v5425_v35, %v6695_v33  ;;  %v3924_v23 = vpop.f32.mrb[29].mxu0  ;;  %v4078_v4 = vmax.f32 %v4046_v60, 0.0 }
 0x211   : > { %v4008_v53 = vmul.f32 %v5426_v40, %v6695_v33  ;;  %v5193_v20 = vpop.f32.mrb[28].mxu1  ;;  %4097 = vxpose.xlu0.b32.cont [13/16] (narrow) %v4065_v46, 8  ;;  %v4077_v0 = vmax.f32 %v4045_v19, 0.0 }
 0x212   : > { %v5427_v45 = vadd.f32 %v5393_v44, %v5193_v20  ;;  %v2363_v47 = vpop.f32.mrb[29].mxu1  ;;  %v4048_v10 = vadd.f32 %v6700_v42, %v4009_v43 }
 0x213   : > { %v5428_v21 = vadd.f32 %v3924_v23, %v2363_v47  ;;  %4121 = vxpose.xlu1.b32.cont [5/16] (narrow) %v4073_v6, 8  ;;  %v4047_v27 = vadd.f32 %v6700_v42, %v4008_v53  ;;  %v5396_v38 = vpop.f32.mrb[30].mxu0 }
 0x214   : > { %v4011_v36 = vmul.f32 %v5427_v45, %v6695_v33  ;;  %v3934_v3 = vpop.f32.mrb[31].mxu0 }
 0x215   : > { %v4010_v59 = vmul.f32 %v5428_v21, %v6695_v33  ;;  %v5196_v24 = vpop.f32.mrb[30].mxu1  ;;  %4098 = vxpose.xlu0.b32.cont [14/16] (narrow) %v4066_v1, 8  ;;  %v4079_v5 = vmax.f32 %v4047_v27, 0.0 }
 0x216   : > { %v5429_v28 = vadd.f32 %v5396_v38, %v5196_v24  ;;  %v2373_v34 = vpop.f32.mrb[31].mxu1  ;;  %v4050_v8 = vadd.f32 %v6700_v42, %v4011_v36 }
 0x217   : > { %v5430_v37 = vadd.f32 %v3934_v3, %v2373_v34  ;;  %4122 = vxpose.xlu1.b32.cont [6/16] (narrow) %v4074_v2, 8  ;;  %v4049_v41 = vadd.f32 %v6700_v42, %v4010_v59 }
 0x218   : > { %v4013_v55 = vmul.f32 %v5429_v28, %v6695_v33  ;;  %v4082_v9 = vmax.f32 %v4050_v8, 0.0 }
 0x219   : > { %v4012_v49 = vmul.f32 %v5430_v37, %v6695_v33  ;;  %4099 = vxpose.xlu0.b32.cont [15/16] (narrow) %v4067_v32, 8  ;;  %v4080_v33 = vmax.f32 %v4048_v10, 0.0  ;;  %v4081_v7 = vmax.f32 %v4049_v41, 0.0 }
 0x21a   : > { %v4052_v56 = vadd.f32 %v6700_v42, %v4013_v55 }
 0x21b   : > { %4123 = vxpose.xlu1.b32.cont [7/16] (narrow) %v4075_v63, 8  ;;  %v4051_v57 = vadd.f32 %v6700_v42, %v4012_v49 }
 0x21c   : > { %v4084_v42 = vmax.f32 %v4052_v56, 0.0 }
 0x21d   : > { %4100 = vxpose.xlu0.b32.end [16/16] (narrow) %v4068_v58, 8  ;;  %v4083_v62 = vmax.f32 %v4051_v57, 0.0 }
 0x21f   : > { %4124 = vxpose.xlu1.b32.cont [8/16] (narrow) %v4076_v61, 8 }
 0x223   : > { %4125 = vxpose.xlu1.b32.cont [9/16] (narrow) %v4077_v0, 8 }
 0x227   : > { %4126 = vxpose.xlu1.b32.cont [10/16] (narrow) %v4078_v4, 8 }
 0x22b   : > { %4127 = vxpose.xlu1.b32.cont [11/16] (narrow) %v4079_v5, 8 }
 0x22f   : > { %4128 = vxpose.xlu1.b32.cont [12/16] (narrow) %v4080_v33, 8 }
 0x233   : > { %4129 = vxpose.xlu1.b32.cont [13/16] (narrow) %v4081_v7, 8 }
 0x237   : > { %4130 = vxpose.xlu1.b32.cont [14/16] (narrow) %v4082_v9, 8 }
 0x23b   : > { %4131 = vxpose.xlu1.b32.cont [15/16] (narrow) %v4083_v62, 8 }
 0x23f   : > { %4132 = vxpose.xlu1.b32.end [16/16] (narrow) %v4084_v42, 8 }
 0x261   : > { %v4101_v11 = vpop.trf.xlu0 }
 0x262   : > { %4149 = vst [vmem:[%s360_s17] sm:$0xff] %v4101_v11 }
 0x283   : > { %v4133_v12 = vpop.trf.xlu1 }
 0x284   : > { %4150 = vst [vmem:[%s360_s17 + $0x8] sm:$0xff] %v4133_v12 }
 0x285 PF: > { %s16_s23 = sadd.s32 1, %s5703_s23   ;;  %s6899_s21 = smov %s5699_s22 }
 0x286   : > { %p13_p5 = scmp.ge.s32.totalorder %s16_s23, 4   ;;  %s6900_s22 = smov %s6902_s24 }
 0x288   :  { %15 = sbr.rel (!%p13_p5) target bundleno = 2 (0x2), region = 91 }

</bundles_post_ra>
